<compile_context>
chip_gen: v6e
topology: v6e:2x2x1
jax: 0.10.0
libtpu: 0.0.40
codegen_flags: <defaults>
</compile_context>

<pallas_src>
import functools

import numpy as np

import jax
import jax.numpy as jnp
from jax import lax
from jax.experimental import pallas as pl
from jax.experimental.pallas import tpu as pltpu


def _paspp_kernel(x_ref, masks_ref, w1_ref, b1_ref,
                  wd1_ref, wd2_ref, wd4_ref, wd8_ref, bdil_ref,
                  w2l_ref, w2r_ref, b2_ref, w3l_ref, w3r_ref, b3_ref,
                  o_ref, taps_ref, *, H, W, tap_offsets, mask_starts, group):
    """One batch element: the whole PASPP block, spatially flattened to (channels, S)."""
    C4 = w1_ref.shape[0]
    S = x_ref.shape[2]
    cdt = w1_ref.dtype            # compute dtype (f32 or bf16); accumulation is f32
    f32 = jnp.float32

    # conv1 (1x1x1) + folded BN + ReLU; shared by all four conv1() calls (eval-mode BN).
    x = x_ref[0].astype(cdt)                                        # (C, S)
    a = jnp.maximum(
        jnp.dot(w1_ref[...], x, preferred_element_type=f32) + b1_ref[...], 0.0)
    a_c = a.astype(cdt)                                             # (C4, S)
    two_a = a + a                 # residual for x4 only; x1..x3 residual folded in weights

    def dilated_conv(u_c, w_ref, bias, offs, m0):
        # 3x3x3 "same" conv with dilation on u_c (C4, S).  Pruned taps are built with an
        # XLU roll + {0,1} mask multiply, written to disjoint rows of the taps scratch in
        # chunks of `group` taps, and each chunk feeds an MXU dot immediately so tap-build
        # and matmul overlap.
        n_taps = len(offs)
        w_full = w_ref[...]                                 # tiny (C4, n_taps*C4)
        acc = None
        for t0 in range(0, n_taps, group):
            g = min(group, n_taps - t0)
            for j in range(g):
                dz, dy, dx = offs[t0 + j]
                r0 = (t0 + j) * C4
                if dz == 0 and dy == 0 and dx == 0:
                    taps_ref[r0:r0 + C4, :] = u_c           # center tap: mask is all-ones
                else:
                    k = dz * H * W + dy * W + dx            # flat lane shift, 0 < |k| < S
                    rolled = pltpu.roll(u_c, (-k) % S, axis=1)
                    m = masks_ref[m0 + t0 + j:m0 + t0 + j + 1, :]
                    taps_ref[r0:r0 + C4, :] = rolled * m    # mask zeros wrapped/OOB lanes
            part = jnp.dot(w_full[:, t0 * C4:(t0 + g) * C4],
                           taps_ref[t0 * C4:(t0 + g) * C4, :],
                           preferred_element_type=f32)
            acc = part if acc is None else acc + part
        return acc + bias                                   # (C4, S) f32

    offs1, offs2, offs4, offs8 = tap_offsets
    m1, m2, m4, m8 = mask_starts

    # x1/x2/x3 already include their "+2a" residual (folded into the center-tap weights).
    x1 = dilated_conv(a_c, wd1_ref, bdil_ref[0], offs1, m1)
    x2 = dilated_conv(a_c, wd2_ref, bdil_ref[1], offs2, m2)
    o1 = jnp.maximum(
        jnp.dot(w2l_ref[...], x1.astype(cdt), preferred_element_type=f32)
        + jnp.dot(w2r_ref[...], x2.astype(cdt), preferred_element_type=f32)
        + b2_ref[...], 0.0)                                 # (C2, S)

    x3 = dilated_conv(a_c, wd4_ref, bdil_ref[2], offs4, m4)
    # Faithful to the PyTorch forward: dil8 consumes the *updated* x2; its residual is 2a.
    x4 = dilated_conv(x2.astype(cdt), wd8_ref, bdil_ref[3], offs8, m8) + two_a
    o2 = jnp.maximum(
        jnp.dot(w2l_ref[...], x3.astype(cdt), preferred_element_type=f32)
        + jnp.dot(w2r_ref[...], x4.astype(cdt), preferred_element_type=f32)
        + b2_ref[...], 0.0)                                 # (C2, S)

    out = jnp.maximum(
        jnp.dot(w3l_ref[...], o1.astype(cdt), preferred_element_type=f32)
        + jnp.dot(w3r_ref[...], o2.astype(cdt), preferred_element_type=f32)
        + b3_ref[...], 0.0)                                 # (C, S)

    o_ref[0] = out.astype(o_ref.dtype)


@functools.partial(jax.jit, static_argnames=("eps", "compute_dtype"))
def paspp_block(x, params, eps=1e-5, compute_dtype=jnp.float32):
    """Pallas implementation of PASPP_block.forward (eval-mode BatchNorm).

    compute_dtype=jnp.bfloat16 switches taps/weights/dot operands to bf16 with f32
    accumulation (half the tap store/load traffic and scratch, native bf16 MXU path on
    v5e/v6e/v7x, ~1e-2 relative error); float32 (default) matches PyTorch to ~1e-6.
    """
    N, C, D, H, W = x.shape
    assert C % 4 == 0, "PASPP_block requires in_channels divisible by 4"
    C4, C2 = C // 4, C // 2
    S = D * H * W
    f32 = jnp.float32
    cdt = np.dtype(compute_dtype)

    # ---- static tap enumeration: drop taps that are OOB for every output voxel ---------
    def valid_offsets(d):
        offs = []
        for dz in (-d, 0, d):
            for dy in (-d, 0, d):
                for dx in (-d, 0, d):
                    if abs(dz) < D and abs(dy) < H and abs(dx) < W:
                        offs.append((dz, dy, dx))
        return tuple(offs)

    dils = (1, 2, 4, 8)
    tap_offsets = tuple(valid_offsets(d) for d in dils)
    tap_counts = [len(o) for o in tap_offsets]
    mask_starts = tuple(int(s) for s in np.cumsum([0] + tap_counts[:-1]))
    max_taps = max(tap_counts)

    # ---- fold eval-mode BN into the 1x1 convs (wrapper glue math) ----------------------
    def fold(p):
        s = (p["gamma"] / jnp.sqrt(p["var"] + eps)).astype(f32)
        wf = p["w"][:, :, 0, 0, 0].astype(f32) * s[:, None]
        bf = ((p["b"] - p["mean"]) * s + p["beta"]).astype(f32)
        return wf.astype(cdt), bf[:, None]

    w1f, b1f = fold(params["conv1"])                         # (C4, C), (C4, 1)
    w2f, b2f = fold(params["conv2"])                         # (C2, C2), (C2, 1)
    w3f, b3f = fold(params["conv3"])                         # (C, C),  (C, 1)
    w2l, w2r = w2f[:, :C4], w2f[:, C4:]                      # split instead of in-kernel cat
    w3l, w3r = w3f[:, :C2], w3f[:, C2:]

    # ---- dilated conv weights: keep only valid taps (tap-major, in-channel minor) and
    #      fold the "+2a" residual into the center tap of dil1/dil2/dil4 -----------------
    eye2 = 2.0 * jnp.eye(C4, dtype=f32)

    def flat_dil(p, d, offs, fold_residual):
        w = p["w"].astype(f32)                               # (C4, C4, 3, 3, 3)
        cols = []
        for dz, dy, dx in offs:
            wk = w[:, :, dz // d + 1, dy // d + 1, dx // d + 1]
            if fold_residual and (dz, dy, dx) == (0, 0, 0):
                wk = wk + eye2
            cols.append(wk)
        return jnp.concatenate(cols, axis=1).astype(cdt), p["b"].astype(f32)[:, None]

    wd, bd = [], []
    for d, offs, key, fold_res in zip(dils, tap_offsets,
                                      ("dil1", "dil2", "dil4", "dil8"),
                                      (True, True, True, False)):
        wfi, bfi = flat_dil(params[key], d, offs, fold_res)
        wd.append(wfi)
        bd.append(bfi)
    bdil = jnp.stack(bd, axis=0)                             # (4, C4, 1) f32

    # ---- precomputed {0,1} boundary masks, one (1, S) row per kept tap -----------------
    zs = np.arange(D).reshape(D, 1, 1)
    ys = np.arange(H).reshape(1, H, 1)
    xs = np.arange(W).reshape(1, 1, W)
    rows = []
    for offs in tap_offsets:
        for dz, dy, dx in offs:
            m = ((zs + dz >= 0) & (zs + dz < D) & (ys + dy >= 0) & (ys + dy < H)
                 & (xs + dx >= 0) & (xs + dx < W))
            rows.append(np.broadcast_to(m, (D, H, W)).reshape(S))
    masks = jnp.asarray(np.stack(rows, axis=0), dtype=cdt)   # (n_taps_total, S)

    x_flat = x.reshape(N, C, S)
    group = max(1, 32 // C4)      # taps per MXU chunk (~32-row K per dot)

    kernel = functools.partial(_paspp_kernel, H=H, W=W, tap_offsets=tap_offsets,
                               mask_starts=mask_starts, group=group)

    operands = (x_flat, masks, w1f, b1f, wd[0], wd[1], wd[2], wd[3], bdil,
                w2l, w2r, b2f, w3l, w3r, b3f)

    # vmem budget from the actual working set (review: don't hard-code 48 MiB).
    def nbytes(a):
        return int(np.prod(a.shape)) * np.dtype(a.dtype).itemsize

    io_block = 2 * C * S * np.dtype(x.dtype).itemsize        # x block + out block
    const_block = sum(nbytes(a) for a in operands[1:])
    scratch_bytes = max_taps * C4 * S * cdt.itemsize
    vmem_limit = int(min(48 << 20, max(32 << 20,
                         2 * (io_block + const_block) + scratch_bytes + (16 << 20))))

    out_flat = pl.pallas_call(
        kernel,
        out_shape=jax.ShapeDtypeStruct((N, C, S), x.dtype),
        grid=(N,),
        in_specs=[
            pl.BlockSpec((1, C, S), lambda n: (n, 0, 0)),                 # x
            pl.BlockSpec(masks.shape, lambda n: (0, 0)),                  # boundary masks
            pl.BlockSpec(w1f.shape, lambda n: (0, 0)),                    # conv1 (folded)
            pl.BlockSpec(b1f.shape, lambda n: (0, 0)),
            pl.BlockSpec(wd[0].shape, lambda n: (0, 0)),                  # dil1 (pruned)
            pl.BlockSpec(wd[1].shape, lambda n: (0, 0)),                  # dil2
            pl.BlockSpec(wd[2].shape, lambda n: (0, 0)),                  # dil4
            pl.BlockSpec(wd[3].shape, lambda n: (0, 0)),                  # dil8
            pl.BlockSpec(bdil.shape, lambda n: (0, 0, 0)),
            pl.BlockSpec(w2l.shape, lambda n: (0, 0)),                    # conv2 (folded)
            pl.BlockSpec(w2r.shape, lambda n: (0, 0)),
            pl.BlockSpec(b2f.shape, lambda n: (0, 0)),
            pl.BlockSpec(w3l.shape, lambda n: (0, 0)),                    # conv3 (folded)
            pl.BlockSpec(w3r.shape, lambda n: (0, 0)),
            pl.BlockSpec(b3f.shape, lambda n: (0, 0)),
        ],
        out_specs=pl.BlockSpec((1, C, S), lambda n: (n, 0, 0)),
        scratch_shapes=[pltpu.VMEM((max_taps * C4, S), cdt)],
        compiler_params=pltpu.CompilerParams(
            dimension_semantics=("parallel",),
            vmem_limit_bytes=vmem_limit,
        ),
    )(*operands)

    return out_flat.reshape(N, C, D, H, W)


def _reference(x, params, eps=1e-5):
    """Pure-JAX reference mirroring the PyTorch forward line by line (eval-mode BN)."""
    def conv3d(v, w, b, dilation, padding):
        y = lax.conv_general_dilated(
            v, w, window_strides=(1, 1, 1),
            padding=((padding, padding),) * 3,
            rhs_dilation=(dilation,) * 3,
            dimension_numbers=("NCDHW", "OIDHW", "NCDHW"))
        return y + b.reshape(1, -1, 1, 1, 1)

    def bcast(v):
        return v.reshape(1, -1, 1, 1, 1)

    def conv_relu(v, p):
        y = conv3d(v, p["w"], p["b"], 1, 0)
        y = (y - bcast(p["mean"])) * bcast(p["gamma"] / jnp.sqrt(p["var"] + eps)) \
            + bcast(p["beta"])
        return jax.nn.relu(y)

    x1 = conv_relu(x, params["conv1"])
    x2 = conv_relu(x, params["conv1"])
    x12 = x1 + x2
    x1 = conv3d(x1, params["dil1"]["w"], params["dil1"]["b"], 1, 1) + x12
    x2 = conv3d(x2, params["dil2"]["w"], params["dil2"]["b"], 2, 2) + x12
    o1 = conv_relu(jnp.concatenate([x1, x2], axis=1), params["conv2"])
    x3 = conv_relu(x, params["conv1"])
    x4 = conv_relu(x, params["conv1"])
    x34 = x3 + x4
    x3 = conv3d(x3, params["dil4"]["w"], params["dil4"]["b"], 4, 4) + x34
    x4 = conv3d(x2, params["dil8"]["w"], params["dil8"]["b"], 8, 8) + x34
    o2 = conv_relu(jnp.concatenate([x3, x4], axis=1), params["conv2"])
    return conv_relu(jnp.concatenate([o1, o2], axis=1), params["conv3"])


if __name__ == "__main__":
    key = jax.random.PRNGKey(0)
    kx, k1, k2, k3, kd1, kd2, kd4, kd8 = jax.random.split(key, 8)

    N, C, D, H, W = 2, 16, 8, 8, 8      # small NCDHW input; in_channels = 16
    C4, C2 = C // 4, C // 2
    x = jax.random.normal(kx, (N, C, D, H, W), dtype=jnp.float32)

    def convrelu_params(k, cin, cout):
        kw, kb, kg, kbt, km, kv = jax.random.split(k, 6)
        return dict(
            w=0.2 * jax.random.normal(kw, (cout, cin, 1, 1, 1), jnp.float32),
            b=0.1 * jax.random.normal(kb, (cout,), jnp.float32),
            gamma=1.0 + 0.1 * jax.random.normal(kg, (cout,), jnp.float32),
            beta=0.1 * jax.random.normal(kbt, (cout,), jnp.float32),
            mean=0.1 * jax.random.normal(km, (cout,), jnp.float32),
            var=1.0 + 0.1 * jax.random.uniform(kv, (cout,), jnp.float32),
        )

    def dil_params(k, c):
        kw, kb = jax.random.split(k, 2)
        return dict(
            w=0.05 * jax.random.normal(kw, (c, c, 3, 3, 3), jnp.float32),
            b=0.1 * jax.random.normal(kb, (c,), jnp.float32),
        )

    params = dict(
        conv1=convrelu_params(k1, C, C4),
        conv2=convrelu_params(k2, C2, C2),
        conv3=convrelu_params(k3, C, C),
        dil1=dil_params(kd1, C4),
        dil2=dil_params(kd2, C4),
        dil4=dil_params(kd4, C4),
        dil8=dil_params(kd8, C4),
    )

    ref = _reference(x, params)

    # f32 path: numerical parity with the PyTorch forward (tight tolerance).
    out_f32 = jax.block_until_ready(paspp_block(x, params, compute_dtype=jnp.float32))
    assert out_f32.shape == (N, C, D, H, W)
    assert jnp.allclose(out_f32, ref, rtol=1e-3, atol=1e-3), (
        "f32 mismatch vs reference: max abs err = "
        f"{float(jnp.max(jnp.abs(out_f32 - ref)))}")

    # bf16 fast path (review item): ~8-bit mantissa on taps/weights, f32 accumulation.
    out_bf16 = jax.block_until_ready(paspp_block(x, params, compute_dtype=jnp.bfloat16))
    assert jnp.allclose(out_bf16, ref, rtol=5e-2, atol=5e-2), (
        "bf16 mismatch vs reference: max abs err = "
        f"{float(jnp.max(jnp.abs(out_bf16 - ref)))}")

    print("KERNEL_OK")
</pallas_src>

<mosaic_0001>
module attributes {stable_mosaic.version = 11 : i64} {
  func.func @_paspp_kernel(%arg0: i32, %arg1: memref<1x16x512xf32, #tpu.memory_space<vmem>>, %arg2: memref<82x512xf32, #tpu.memory_space<vmem>>, %arg3: memref<4x16xf32, #tpu.memory_space<vmem>>, %arg4: memref<4x1xf32, #tpu.memory_space<vmem>>, %arg5: memref<4x108xf32, #tpu.memory_space<vmem>>, %arg6: memref<4x108xf32, #tpu.memory_space<vmem>>, %arg7: memref<4x108xf32, #tpu.memory_space<vmem>>, %arg8: memref<4x4xf32, #tpu.memory_space<vmem>>, %arg9: memref<4x4x1xf32, #tpu.memory_space<vmem>>, %arg10: memref<8x4xf32, #tpu.memory_space<vmem>>, %arg11: memref<8x4xf32, #tpu.memory_space<vmem>>, %arg12: memref<8x1xf32, #tpu.memory_space<vmem>>, %arg13: memref<16x8xf32, #tpu.memory_space<vmem>>, %arg14: memref<16x8xf32, #tpu.memory_space<vmem>>, %arg15: memref<16x1xf32, #tpu.memory_space<vmem>>, %arg16: memref<1x16x512xf32, #tpu.memory_space<vmem>>, %arg17: memref<108x512xf32, #tpu.memory_space<vmem>>) attributes {dimension_semantics = [#tpu.dimension_semantics<parallel>], iteration_bounds = array<i64: 2>, scalar_prefetch = 0 : i64, scratch_operands = 1 : i64, tpu.core_type = #tpu.core_type<tc>, window_params = [{transform_indices = @transform_0, window_bounds = array<i64: 1, 16, 512>}, {pipeline_mode = #tpu.pipeline_mode<synchronous>, transform_indices = @transform_1, window_bounds = array<i64: 82, 512>}, {pipeline_mode = #tpu.pipeline_mode<synchronous>, transform_indices = @transform_2, window_bounds = array<i64: 4, 16>}, {pipeline_mode = #tpu.pipeline_mode<synchronous>, transform_indices = @transform_3, window_bounds = array<i64: 4, 1>}, {pipeline_mode = #tpu.pipeline_mode<synchronous>, transform_indices = @transform_4, window_bounds = array<i64: 4, 108>}, {pipeline_mode = #tpu.pipeline_mode<synchronous>, transform_indices = @transform_5, window_bounds = array<i64: 4, 108>}, {pipeline_mode = #tpu.pipeline_mode<synchronous>, transform_indices = @transform_6, window_bounds = array<i64: 4, 108>}, {pipeline_mode = #tpu.pipeline_mode<synchronous>, transform_indices = @transform_7, window_bounds = array<i64: 4, 4>}, {pipeline_mode = #tpu.pipeline_mode<synchronous>, transform_indices = @transform_8, window_bounds = array<i64: 4, 4, 1>}, {pipeline_mode = #tpu.pipeline_mode<synchronous>, transform_indices = @transform_9, window_bounds = array<i64: 8, 4>}, {pipeline_mode = #tpu.pipeline_mode<synchronous>, transform_indices = @transform_10, window_bounds = array<i64: 8, 4>}, {pipeline_mode = #tpu.pipeline_mode<synchronous>, transform_indices = @transform_11, window_bounds = array<i64: 8, 1>}, {pipeline_mode = #tpu.pipeline_mode<synchronous>, transform_indices = @transform_12, window_bounds = array<i64: 16, 8>}, {pipeline_mode = #tpu.pipeline_mode<synchronous>, transform_indices = @transform_13, window_bounds = array<i64: 16, 8>}, {pipeline_mode = #tpu.pipeline_mode<synchronous>, transform_indices = @transform_14, window_bounds = array<i64: 16, 1>}, {transform_indices = @transform_15, window_bounds = array<i64: 1, 16, 512>}]} {
    %c0 = arith.constant 0 : index
    %c0_0 = arith.constant 0 : index
    %c0_1 = arith.constant 0 : index
    %0 = vector.load %arg1[%c0, %c0_0, %c0_1] : memref<1x16x512xf32, #tpu.memory_space<vmem>>, vector<1x16x512xf32>
    %1 = vector.shape_cast %0 : vector<1x16x512xf32> to vector<16x512xf32>
    %c0_2 = arith.constant 0 : index
    %c0_3 = arith.constant 0 : index
    %2 = vector.load %arg3[%c0_2, %c0_3] : memref<4x16xf32, #tpu.memory_space<vmem>>, vector<4x16xf32>
    %cst = arith.constant dense<0.000000e+00> : vector<4x512xf32>
    %3 = tpu.matmul %2, %1, %cst {dimension_numbers = #tpu.dot_dimension_numbers<[1], [0], [0], [1], [0, 0, 1, 1], [], []>} : vector<4x16xf32>, vector<16x512xf32>, vector<4x512xf32> -> vector<4x512xf32>
    %c0_4 = arith.constant 0 : index
    %c0_5 = arith.constant 0 : index
    %4 = vector.load %arg4[%c0_4, %c0_5] : memref<4x1xf32, #tpu.memory_space<vmem>>, vector<4x1xf32>
    %5 = vector.broadcast %4 : vector<4x1xf32> to vector<4x512xf32>
    %6 = arith.addf %3, %5 : vector<4x512xf32>
    %cst_6 = arith.constant 0.000000e+00 : f32
    %7 = vector.broadcast %cst_6 : f32 to vector<4x512xf32>
    %8 = arith.maximumf %6, %7 : vector<4x512xf32>
    %9 = arith.addf %8, %8 : vector<4x512xf32>
    %c0_7 = arith.constant 0 : index
    %c0_8 = arith.constant 0 : index
    %c0_9 = arith.constant 0 : index
    %10 = vector.load %arg9[%c0_7, %c0_8, %c0_9] : memref<4x4x1xf32, #tpu.memory_space<vmem>>, vector<1x4x1xf32>
    %11 = vector.shape_cast %10 : vector<1x4x1xf32> to vector<4x1xf32>
    %c0_10 = arith.constant 0 : index
    %c0_11 = arith.constant 0 : index
    %12 = vector.load %arg5[%c0_10, %c0_11] : memref<4x108xf32, #tpu.memory_space<vmem>>, vector<4x108xf32>
    %c73_i32 = arith.constant 73 : i32
    %13 = tpu.dynamic_rotate %8 by %c73_i32 dim 1 : vector<4x512xf32>, i32 -> vector<4x512xf32>
    %c0_12 = arith.constant 0 : index
    %c0_13 = arith.constant 0 : index
    %14 = vector.load %arg2[%c0_12, %c0_13] : memref<82x512xf32, #tpu.memory_space<vmem>>, vector<1x512xf32>
    %15 = vector.broadcast %14 : vector<1x512xf32> to vector<4x512xf32>
    %16 = arith.mulf %13, %15 : vector<4x512xf32>
    %c0_14 = arith.constant 0 : index
    %c0_15 = arith.constant 0 : index
    %17 = vector.load %arg17[%c0_14, %c0_15] : memref<108x512xf32, #tpu.memory_space<vmem>>, vector<4x512xf32>
    tpu.vector_store %arg17[%c0_14, %c0_15], %16 {strides = array<i32>} : memref<108x512xf32, #tpu.memory_space<vmem>>, vector<4x512xf32>,
    %c72_i32 = arith.constant 72 : i32
    %18 = tpu.dynamic_rotate %8 by %c72_i32 dim 1 : vector<4x512xf32>, i32 -> vector<4x512xf32>
    %c1 = arith.constant 1 : index
    %c0_16 = arith.constant 0 : index
    %19 = vector.load %arg2[%c1, %c0_16] : memref<82x512xf32, #tpu.memory_space<vmem>>, vector<1x512xf32>
    %20 = vector.broadcast %19 : vector<1x512xf32> to vector<4x512xf32>
    %21 = arith.mulf %18, %20 : vector<4x512xf32>
    %c4 = arith.constant 4 : index
    %c0_17 = arith.constant 0 : index
    %22 = vector.load %arg17[%c4, %c0_17] : memref<108x512xf32, #tpu.memory_space<vmem>>, vector<4x512xf32>
    tpu.vector_store %arg17[%c4, %c0_17], %21 {strides = array<i32>} : memref<108x512xf32, #tpu.memory_space<vmem>>, vector<4x512xf32>,
    %c71_i32 = arith.constant 71 : i32
    %23 = tpu.dynamic_rotate %8 by %c71_i32 dim 1 : vector<4x512xf32>, i32 -> vector<4x512xf32>
    %c2 = arith.constant 2 : index
    %c0_18 = arith.constant 0 : index
    %24 = vector.load %arg2[%c2, %c0_18] : memref<82x512xf32, #tpu.memory_space<vmem>>, vector<1x512xf32>
    %25 = vector.broadcast %24 : vector<1x512xf32> to vector<4x512xf32>
    %26 = arith.mulf %23, %25 : vector<4x512xf32>
    %c8 = arith.constant 8 : index
    %c0_19 = arith.constant 0 : index
    %27 = vector.load %arg17[%c8, %c0_19] : memref<108x512xf32, #tpu.memory_space<vmem>>, vector<4x512xf32>
    tpu.vector_store %arg17[%c8, %c0_19], %26 {strides = array<i32>} : memref<108x512xf32, #tpu.memory_space<vmem>>, vector<4x512xf32>,
    %c65_i32 = arith.constant 65 : i32
    %28 = tpu.dynamic_rotate %8 by %c65_i32 dim 1 : vector<4x512xf32>, i32 -> vector<4x512xf32>
    %c3 = arith.constant 3 : index
    %c0_20 = arith.constant 0 : index
    %29 = vector.load %arg2[%c3, %c0_20] : memref<82x512xf32, #tpu.memory_space<vmem>>, vector<1x512xf32>
    %30 = vector.broadcast %29 : vector<1x512xf32> to vector<4x512xf32>
    %31 = arith.mulf %28, %30 : vector<4x512xf32>
    %c12 = arith.constant 12 : index
    %c0_21 = arith.constant 0 : index
    %32 = vector.load %arg17[%c12, %c0_21] : memref<108x512xf32, #tpu.memory_space<vmem>>, vector<4x512xf32>
    tpu.vector_store %arg17[%c12, %c0_21], %31 {strides = array<i32>} : memref<108x512xf32, #tpu.memory_space<vmem>>, vector<4x512xf32>,
    %c64_i32 = arith.constant 64 : i32
    %33 = tpu.dynamic_rotate %8 by %c64_i32 dim 1 : vector<4x512xf32>, i32 -> vector<4x512xf32>
    %c4_22 = arith.constant 4 : index
    %c0_23 = arith.constant 0 : index
    %34 = vector.load %arg2[%c4_22, %c0_23] : memref<82x512xf32, #tpu.memory_space<vmem>>, vector<1x512xf32>
    %35 = vector.broadcast %34 : vector<1x512xf32> to vector<4x512xf32>
    %36 = arith.mulf %33, %35 : vector<4x512xf32>
    %c16 = arith.constant 16 : index
    %c0_24 = arith.constant 0 : index
    %37 = vector.load %arg17[%c16, %c0_24] : memref<108x512xf32, #tpu.memory_space<vmem>>, vector<4x512xf32>
    tpu.vector_store %arg17[%c16, %c0_24], %36 {strides = array<i32>} : memref<108x512xf32, #tpu.memory_space<vmem>>, vector<4x512xf32>,
    %c63_i32 = arith.constant 63 : i32
    %38 = tpu.dynamic_rotate %8 by %c63_i32 dim 1 : vector<4x512xf32>, i32 -> vector<4x512xf32>
    %c5 = arith.constant 5 : index
    %c0_25 = arith.constant 0 : index
    %39 = vector.load %arg2[%c5, %c0_25] : memref<82x512xf32, #tpu.memory_space<vmem>>, vector<1x512xf32>
    %40 = vector.broadcast %39 : vector<1x512xf32> to vector<4x512xf32>
    %41 = arith.mulf %38, %40 : vector<4x512xf32>
    %c20 = arith.constant 20 : index
    %c0_26 = arith.constant 0 : index
    %42 = vector.load %arg17[%c20, %c0_26] : memref<108x512xf32, #tpu.memory_space<vmem>>, vector<4x512xf32>
    tpu.vector_store %arg17[%c20, %c0_26], %41 {strides = array<i32>} : memref<108x512xf32, #tpu.memory_space<vmem>>, vector<4x512xf32>,
    %c57_i32 = arith.constant 57 : i32
    %43 = tpu.dynamic_rotate %8 by %c57_i32 dim 1 : vector<4x512xf32>, i32 -> vector<4x512xf32>
    %c6 = arith.constant 6 : index
    %c0_27 = arith.constant 0 : index
    %44 = vector.load %arg2[%c6, %c0_27] : memref<82x512xf32, #tpu.memory_space<vmem>>, vector<1x512xf32>
    %45 = vector.broadcast %44 : vector<1x512xf32> to vector<4x512xf32>
    %46 = arith.mulf %43, %45 : vector<4x512xf32>
    %c24 = arith.constant 24 : index
    %c0_28 = arith.constant 0 : index
    %47 = vector.load %arg17[%c24, %c0_28] : memref<108x512xf32, #tpu.memory_space<vmem>>, vector<4x512xf32>
    tpu.vector_store %arg17[%c24, %c0_28], %46 {strides = array<i32>} : memref<108x512xf32, #tpu.memory_space<vmem>>, vector<4x512xf32>,
    %c56_i32 = arith.constant 56 : i32
    %48 = tpu.dynamic_rotate %8 by %c56_i32 dim 1 : vector<4x512xf32>, i32 -> vector<4x512xf32>
    %c7 = arith.constant 7 : index
    %c0_29 = arith.constant 0 : index
    %49 = vector.load %arg2[%c7, %c0_29] : memref<82x512xf32, #tpu.memory_space<vmem>>, vector<1x512xf32>
    %50 = vector.broadcast %49 : vector<1x512xf32> to vector<4x512xf32>
    %51 = arith.mulf %48, %50 : vector<4x512xf32>
    %c28 = arith.constant 28 : index
    %c0_30 = arith.constant 0 : index
    %52 = vector.load %arg17[%c28, %c0_30] : memref<108x512xf32, #tpu.memory_space<vmem>>, vector<4x512xf32>
    tpu.vector_store %arg17[%c28, %c0_30], %51 {strides = array<i32>} : memref<108x512xf32, #tpu.memory_space<vmem>>, vector<4x512xf32>,
    %53 = vector.extract_strided_slice %12 {offsets = [0, 0], sizes = [4, 32], strides = [1, 1]} : vector<4x108xf32> to vector<4x32xf32>
    %c0_31 = arith.constant 0 : index
    %c0_32 = arith.constant 0 : index
    %54 = vector.load %arg17[%c0_31, %c0_32] : memref<108x512xf32, #tpu.memory_space<vmem>>, vector<32x512xf32>
    %cst_33 = arith.constant dense<0.000000e+00> : vector<4x512xf32>
    %55 = tpu.matmul %53, %54, %cst_33 {dimension_numbers = #tpu.dot_dimension_numbers<[1], [0], [0], [1], [0, 0, 1, 1], [], []>} : vector<4x32xf32>, vector<32x512xf32>, vector<4x512xf32> -> vector<4x512xf32>
    %c55_i32 = arith.constant 55 : i32
    %56 = tpu.dynamic_rotate %8 by %c55_i32 dim 1 : vector<4x512xf32>, i32 -> vector<4x512xf32>
    %c8_34 = arith.constant 8 : index
    %c0_35 = arith.constant 0 : index
    %57 = vector.load %arg2[%c8_34, %c0_35] : memref<82x512xf32, #tpu.memory_space<vmem>>, vector<1x512xf32>
    %58 = vector.broadcast %57 : vector<1x512xf32> to vector<4x512xf32>
    %59 = arith.mulf %56, %58 : vector<4x512xf32>
    %c32 = arith.constant 32 : index
    %c0_36 = arith.constant 0 : index
    %60 = vector.load %arg17[%c32, %c0_36] : memref<108x512xf32, #tpu.memory_space<vmem>>, vector<4x512xf32>
    tpu.vector_store %arg17[%c32, %c0_36], %59 {strides = array<i32>} : memref<108x512xf32, #tpu.memory_space<vmem>>, vector<4x512xf32>,
    %c9_i32 = arith.constant 9 : i32
    %61 = tpu.dynamic_rotate %8 by %c9_i32 dim 1 : vector<4x512xf32>, i32 -> vector<4x512xf32>
    %c9 = arith.constant 9 : index
    %c0_37 = arith.constant 0 : index
    %62 = vector.load %arg2[%c9, %c0_37] : memref<82x512xf32, #tpu.memory_space<vmem>>, vector<1x512xf32>
    %63 = vector.broadcast %62 : vector<1x512xf32> to vector<4x512xf32>
    %64 = arith.mulf %61, %63 : vector<4x512xf32>
    %c36 = arith.constant 36 : index
    %c0_38 = arith.constant 0 : index
    %65 = vector.load %arg17[%c36, %c0_38] : memref<108x512xf32, #tpu.memory_space<vmem>>, vector<4x512xf32>
    tpu.vector_store %arg17[%c36, %c0_38], %64 {strides = array<i32>} : memref<108x512xf32, #tpu.memory_space<vmem>>, vector<4x512xf32>,
    %c8_i32 = arith.constant 8 : i32
    %66 = tpu.dynamic_rotate %8 by %c8_i32 dim 1 : vector<4x512xf32>, i32 -> vector<4x512xf32>
    %c10 = arith.constant 10 : index
    %c0_39 = arith.constant 0 : index
    %67 = vector.load %arg2[%c10, %c0_39] : memref<82x512xf32, #tpu.memory_space<vmem>>, vector<1x512xf32>
    %68 = vector.broadcast %67 : vector<1x512xf32> to vector<4x512xf32>
    %69 = arith.mulf %66, %68 : vector<4x512xf32>
    %c40 = arith.constant 40 : index
    %c0_40 = arith.constant 0 : index
    %70 = vector.load %arg17[%c40, %c0_40] : memref<108x512xf32, #tpu.memory_space<vmem>>, vector<4x512xf32>
    tpu.vector_store %arg17[%c40, %c0_40], %69 {strides = array<i32>} : memref<108x512xf32, #tpu.memory_space<vmem>>, vector<4x512xf32>,
    %c7_i32 = arith.constant 7 : i32
    %71 = tpu.dynamic_rotate %8 by %c7_i32 dim 1 : vector<4x512xf32>, i32 -> vector<4x512xf32>
    %c11 = arith.constant 11 : index
    %c0_41 = arith.constant 0 : index
    %72 = vector.load %arg2[%c11, %c0_41] : memref<82x512xf32, #tpu.memory_space<vmem>>, vector<1x512xf32>
    %73 = vector.broadcast %72 : vector<1x512xf32> to vector<4x512xf32>
    %74 = arith.mulf %71, %73 : vector<4x512xf32>
    %c44 = arith.constant 44 : index
    %c0_42 = arith.constant 0 : index
    %75 = vector.load %arg17[%c44, %c0_42] : memref<108x512xf32, #tpu.memory_space<vmem>>, vector<4x512xf32>
    tpu.vector_store %arg17[%c44, %c0_42], %74 {strides = array<i32>} : memref<108x512xf32, #tpu.memory_space<vmem>>, vector<4x512xf32>,
    %c1_i32 = arith.constant 1 : i32
    %76 = tpu.dynamic_rotate %8 by %c1_i32 dim 1 : vector<4x512xf32>, i32 -> vector<4x512xf32>
    %c12_43 = arith.constant 12 : index
    %c0_44 = arith.constant 0 : index
    %77 = vector.load %arg2[%c12_43, %c0_44] : memref<82x512xf32, #tpu.memory_space<vmem>>, vector<1x512xf32>
    %78 = vector.broadcast %77 : vector<1x512xf32> to vector<4x512xf32>
    %79 = arith.mulf %76, %78 : vector<4x512xf32>
    %c48 = arith.constant 48 : index
    %c0_45 = arith.constant 0 : index
    %80 = vector.load %arg17[%c48, %c0_45] : memref<108x512xf32, #tpu.memory_space<vmem>>, vector<4x512xf32>
    tpu.vector_store %arg17[%c48, %c0_45], %79 {strides = array<i32>} : memref<108x512xf32, #tpu.memory_space<vmem>>, vector<4x512xf32>,
    %c52 = arith.constant 52 : index
    %c0_46 = arith.constant 0 : index
    %81 = vector.load %arg17[%c52, %c0_46] : memref<108x512xf32, #tpu.memory_space<vmem>>, vector<4x512xf32>
    tpu.vector_store %arg17[%c52, %c0_46], %8 {strides = array<i32>} : memref<108x512xf32, #tpu.memory_space<vmem>>, vector<4x512xf32>,
    %c511_i32 = arith.constant 511 : i32
    %82 = tpu.dynamic_rotate %8 by %c511_i32 dim 1 : vector<4x512xf32>, i32 -> vector<4x512xf32>
    %c14 = arith.constant 14 : index
    %c0_47 = arith.constant 0 : index
    %83 = vector.load %arg2[%c14, %c0_47] : memref<82x512xf32, #tpu.memory_space<vmem>>, vector<1x512xf32>
    %84 = vector.broadcast %83 : vector<1x512xf32> to vector<4x512xf32>
    %85 = arith.mulf %82, %84 : vector<4x512xf32>
    %c56 = arith.constant 56 : index
    %c0_48 = arith.constant 0 : index
    %86 = vector.load %arg17[%c56, %c0_48] : memref<108x512xf32, #tpu.memory_space<vmem>>, vector<4x512xf32>
    tpu.vector_store %arg17[%c56, %c0_48], %85 {strides = array<i32>} : memref<108x512xf32, #tpu.memory_space<vmem>>, vector<4x512xf32>,
    %c505_i32 = arith.constant 505 : i32
    %87 = tpu.dynamic_rotate %8 by %c505_i32 dim 1 : vector<4x512xf32>, i32 -> vector<4x512xf32>
    %c15 = arith.constant 15 : index
    %c0_49 = arith.constant 0 : index
    %88 = vector.load %arg2[%c15, %c0_49] : memref<82x512xf32, #tpu.memory_space<vmem>>, vector<1x512xf32>
    %89 = vector.broadcast %88 : vector<1x512xf32> to vector<4x512xf32>
    %90 = arith.mulf %87, %89 : vector<4x512xf32>
    %c60 = arith.constant 60 : index
    %c0_50 = arith.constant 0 : index
    %91 = vector.load %arg17[%c60, %c0_50] : memref<108x512xf32, #tpu.memory_space<vmem>>, vector<4x512xf32>
    tpu.vector_store %arg17[%c60, %c0_50], %90 {strides = array<i32>} : memref<108x512xf32, #tpu.memory_space<vmem>>, vector<4x512xf32>,
    %92 = vector.extract_strided_slice %12 {offsets = [0, 32], sizes = [4, 32], strides = [1, 1]} : vector<4x108xf32> to vector<4x32xf32>
    %c32_51 = arith.constant 32 : index
    %c0_52 = arith.constant 0 : index
    %93 = vector.load %arg17[%c32_51, %c0_52] : memref<108x512xf32, #tpu.memory_space<vmem>>, vector<32x512xf32>
    %cst_53 = arith.constant dense<0.000000e+00> : vector<4x512xf32>
    %94 = tpu.matmul %92, %93, %cst_53 {dimension_numbers = #tpu.dot_dimension_numbers<[1], [0], [0], [1], [0, 0, 1, 1], [], []>} : vector<4x32xf32>, vector<32x512xf32>, vector<4x512xf32> -> vector<4x512xf32>
    %95 = arith.addf %55, %94 : vector<4x512xf32>
    %c504_i32 = arith.constant 504 : i32
    %96 = tpu.dynamic_rotate %8 by %c504_i32 dim 1 : vector<4x512xf32>, i32 -> vector<4x512xf32>
    %c16_54 = arith.constant 16 : index
    %c0_55 = arith.constant 0 : index
    %97 = vector.load %arg2[%c16_54, %c0_55] : memref<82x512xf32, #tpu.memory_space<vmem>>, vector<1x512xf32>
    %98 = vector.broadcast %97 : vector<1x512xf32> to vector<4x512xf32>
    %99 = arith.mulf %96, %98 : vector<4x512xf32>
    %c64 = arith.constant 64 : index
    %c0_56 = arith.constant 0 : index
    %100 = vector.load %arg17[%c64, %c0_56] : memref<108x512xf32, #tpu.memory_space<vmem>>, vector<4x512xf32>
    tpu.vector_store %arg17[%c64, %c0_56], %99 {strides = array<i32>} : memref<108x512xf32, #tpu.memory_space<vmem>>, vector<4x512xf32>,
    %c503_i32 = arith.constant 503 : i32
    %101 = tpu.dynamic_rotate %8 by %c503_i32 dim 1 : vector<4x512xf32>, i32 -> vector<4x512xf32>
    %c17 = arith.constant 17 : index
    %c0_57 = arith.constant 0 : index
    %102 = vector.load %arg2[%c17, %c0_57] : memref<82x512xf32, #tpu.memory_space<vmem>>, vector<1x512xf32>
    %103 = vector.broadcast %102 : vector<1x512xf32> to vector<4x512xf32>
    %104 = arith.mulf %101, %103 : vector<4x512xf32>
    %c68 = arith.constant 68 : index
    %c0_58 = arith.constant 0 : index
    %105 = vector.load %arg17[%c68, %c0_58] : memref<108x512xf32, #tpu.memory_space<vmem>>, vector<4x512xf32>
    tpu.vector_store %arg17[%c68, %c0_58], %104 {strides = array<i32>} : memref<108x512xf32, #tpu.memory_space<vmem>>, vector<4x512xf32>,
    %c457_i32 = arith.constant 457 : i32
    %106 = tpu.dynamic_rotate %8 by %c457_i32 dim 1 : vector<4x512xf32>, i32 -> vector<4x512xf32>
    %c18 = arith.constant 18 : index
    %c0_59 = arith.constant 0 : index
    %107 = vector.load %arg2[%c18, %c0_59] : memref<82x512xf32, #tpu.memory_space<vmem>>, vector<1x512xf32>
    %108 = vector.broadcast %107 : vector<1x512xf32> to vector<4x512xf32>
    %109 = arith.mulf %106, %108 : vector<4x512xf32>
    %c72 = arith.constant 72 : index
    %c0_60 = arith.constant 0 : index
    %110 = vector.load %arg17[%c72, %c0_60] : memref<108x512xf32, #tpu.memory_space<vmem>>, vector<4x512xf32>
    tpu.vector_store %arg17[%c72, %c0_60], %109 {strides = array<i32>} : memref<108x512xf32, #tpu.memory_space<vmem>>, vector<4x512xf32>,
    %c456_i32 = arith.constant 456 : i32
    %111 = tpu.dynamic_rotate %8 by %c456_i32 dim 1 : vector<4x512xf32>, i32 -> vector<4x512xf32>
    %c19 = arith.constant 19 : index
    %c0_61 = arith.constant 0 : index
    %112 = vector.load %arg2[%c19, %c0_61] : memref<82x512xf32, #tpu.memory_space<vmem>>, vector<1x512xf32>
    %113 = vector.broadcast %112 : vector<1x512xf32> to vector<4x512xf32>
    %114 = arith.mulf %111, %113 : vector<4x512xf32>
    %c76 = arith.constant 76 : index
    %c0_62 = arith.constant 0 : index
    %115 = vector.load %arg17[%c76, %c0_62] : memref<108x512xf32, #tpu.memory_space<vmem>>, vector<4x512xf32>
    tpu.vector_store %arg17[%c76, %c0_62], %114 {strides = array<i32>} : memref<108x512xf32, #tpu.memory_space<vmem>>, vector<4x512xf32>,
    %c455_i32 = arith.constant 455 : i32
    %116 = tpu.dynamic_rotate %8 by %c455_i32 dim 1 : vector<4x512xf32>, i32 -> vector<4x512xf32>
    %c20_63 = arith.constant 20 : index
    %c0_64 = arith.constant 0 : index
    %117 = vector.load %arg2[%c20_63, %c0_64] : memref<82x512xf32, #tpu.memory_space<vmem>>, vector<1x512xf32>
    %118 = vector.broadcast %117 : vector<1x512xf32> to vector<4x512xf32>
    %119 = arith.mulf %116, %118 : vector<4x512xf32>
    %c80 = arith.constant 80 : index
    %c0_65 = arith.constant 0 : index
    %120 = vector.load %arg17[%c80, %c0_65] : memref<108x512xf32, #tpu.memory_space<vmem>>, vector<4x512xf32>
    tpu.vector_store %arg17[%c80, %c0_65], %119 {strides = array<i32>} : memref<108x512xf32, #tpu.memory_space<vmem>>, vector<4x512xf32>,
    %c449_i32 = arith.constant 449 : i32
    %121 = tpu.dynamic_rotate %8 by %c449_i32 dim 1 : vector<4x512xf32>, i32 -> vector<4x512xf32>
    %c21 = arith.constant 21 : index
    %c0_66 = arith.constant 0 : index
    %122 = vector.load %arg2[%c21, %c0_66] : memref<82x512xf32, #tpu.memory_space<vmem>>, vector<1x512xf32>
    %123 = vector.broadcast %122 : vector<1x512xf32> to vector<4x512xf32>
    %124 = arith.mulf %121, %123 : vector<4x512xf32>
    %c84 = arith.constant 84 : index
    %c0_67 = arith.constant 0 : index
    %125 = vector.load %arg17[%c84, %c0_67] : memref<108x512xf32, #tpu.memory_space<vmem>>, vector<4x512xf32>
    tpu.vector_store %arg17[%c84, %c0_67], %124 {strides = array<i32>} : memref<108x512xf32, #tpu.memory_space<vmem>>, vector<4x512xf32>,
    %c448_i32 = arith.constant 448 : i32
    %126 = tpu.dynamic_rotate %8 by %c448_i32 dim 1 : vector<4x512xf32>, i32 -> vector<4x512xf32>
    %c22 = arith.constant 22 : index
    %c0_68 = arith.constant 0 : index
    %127 = vector.load %arg2[%c22, %c0_68] : memref<82x512xf32, #tpu.memory_space<vmem>>, vector<1x512xf32>
    %128 = vector.broadcast %127 : vector<1x512xf32> to vector<4x512xf32>
    %129 = arith.mulf %126, %128 : vector<4x512xf32>
    %c88 = arith.constant 88 : index
    %c0_69 = arith.constant 0 : index
    %130 = vector.load %arg17[%c88, %c0_69] : memref<108x512xf32, #tpu.memory_space<vmem>>, vector<4x512xf32>
    tpu.vector_store %arg17[%c88, %c0_69], %129 {strides = array<i32>} : memref<108x512xf32, #tpu.memory_space<vmem>>, vector<4x512xf32>,
    %c447_i32 = arith.constant 447 : i32
    %131 = tpu.dynamic_rotate %8 by %c447_i32 dim 1 : vector<4x512xf32>, i32 -> vector<4x512xf32>
    %c23 = arith.constant 23 : index
    %c0_70 = arith.constant 0 : index
    %132 = vector.load %arg2[%c23, %c0_70] : memref<82x512xf32, #tpu.memory_space<vmem>>, vector<1x512xf32>
    %133 = vector.broadcast %132 : vector<1x512xf32> to vector<4x512xf32>
    %134 = arith.mulf %131, %133 : vector<4x512xf32>
    %c92 = arith.constant 92 : index
    %c0_71 = arith.constant 0 : index
    %135 = vector.load %arg17[%c92, %c0_71] : memref<108x512xf32, #tpu.memory_space<vmem>>, vector<4x512xf32>
    tpu.vector_store %arg17[%c92, %c0_71], %134 {strides = array<i32>} : memref<108x512xf32, #tpu.memory_space<vmem>>, vector<4x512xf32>,
    %136 = vector.extract_strided_slice %12 {offsets = [0, 64], sizes = [4, 32], strides = [1, 1]} : vector<4x108xf32> to vector<4x32xf32>
    %c64_72 = arith.constant 64 : index
    %c0_73 = arith.constant 0 : index
    %137 = vector.load %arg17[%c64_72, %c0_73] : memref<108x512xf32, #tpu.memory_space<vmem>>, vector<32x512xf32>
    %cst_74 = arith.constant dense<0.000000e+00> : vector<4x512xf32>
    %138 = tpu.matmul %136, %137, %cst_74 {dimension_numbers = #tpu.dot_dimension_numbers<[1], [0], [0], [1], [0, 0, 1, 1], [], []>} : vector<4x32xf32>, vector<32x512xf32>, vector<4x512xf32> -> vector<4x512xf32>
    %139 = arith.addf %95, %138 : vector<4x512xf32>
    %c441_i32 = arith.constant 441 : i32
    %140 = tpu.dynamic_rotate %8 by %c441_i32 dim 1 : vector<4x512xf32>, i32 -> vector<4x512xf32>
    %c24_75 = arith.constant 24 : index
    %c0_76 = arith.constant 0 : index
    %141 = vector.load %arg2[%c24_75, %c0_76] : memref<82x512xf32, #tpu.memory_space<vmem>>, vector<1x512xf32>
    %142 = vector.broadcast %141 : vector<1x512xf32> to vector<4x512xf32>
    %143 = arith.mulf %140, %142 : vector<4x512xf32>
    %c96 = arith.constant 96 : index
    %c0_77 = arith.constant 0 : index
    %144 = vector.load %arg17[%c96, %c0_77] : memref<108x512xf32, #tpu.memory_space<vmem>>, vector<4x512xf32>
    tpu.vector_store %arg17[%c96, %c0_77], %143 {strides = array<i32>} : memref<108x512xf32, #tpu.memory_space<vmem>>, vector<4x512xf32>,
    %c440_i32 = arith.constant 440 : i32
    %145 = tpu.dynamic_rotate %8 by %c440_i32 dim 1 : vector<4x512xf32>, i32 -> vector<4x512xf32>
    %c25 = arith.constant 25 : index
    %c0_78 = arith.constant 0 : index
    %146 = vector.load %arg2[%c25, %c0_78] : memref<82x512xf32, #tpu.memory_space<vmem>>, vector<1x512xf32>
    %147 = vector.broadcast %146 : vector<1x512xf32> to vector<4x512xf32>
    %148 = arith.mulf %145, %147 : vector<4x512xf32>
    %c100 = arith.constant 100 : index
    %c0_79 = arith.constant 0 : index
    %149 = vector.load %arg17[%c100, %c0_79] : memref<108x512xf32, #tpu.memory_space<vmem>>, vector<4x512xf32>
    tpu.vector_store %arg17[%c100, %c0_79], %148 {strides = array<i32>} : memref<108x512xf32, #tpu.memory_space<vmem>>, vector<4x512xf32>,
    %c439_i32 = arith.constant 439 : i32
    %150 = tpu.dynamic_rotate %8 by %c439_i32 dim 1 : vector<4x512xf32>, i32 -> vector<4x512xf32>
    %c26 = arith.constant 26 : index
    %c0_80 = arith.constant 0 : index
    %151 = vector.load %arg2[%c26, %c0_80] : memref<82x512xf32, #tpu.memory_space<vmem>>, vector<1x512xf32>
    %152 = vector.broadcast %151 : vector<1x512xf32> to vector<4x512xf32>
    %153 = arith.mulf %150, %152 : vector<4x512xf32>
    %c104 = arith.constant 104 : index
    %c0_81 = arith.constant 0 : index
    %154 = vector.load %arg17[%c104, %c0_81] : memref<108x512xf32, #tpu.memory_space<vmem>>, vector<4x512xf32>
    tpu.vector_store %arg17[%c104, %c0_81], %153 {strides = array<i32>} : memref<108x512xf32, #tpu.memory_space<vmem>>, vector<4x512xf32>,
    %155 = vector.extract_strided_slice %12 {offsets = [0, 96], sizes = [4, 12], strides = [1, 1]} : vector<4x108xf32> to vector<4x12xf32>
    %c96_82 = arith.constant 96 : index
    %c0_83 = arith.constant 0 : index
    %156 = vector.load %arg17[%c96_82, %c0_83] : memref<108x512xf32, #tpu.memory_space<vmem>>, vector<12x512xf32>
    %cst_84 = arith.constant dense<0.000000e+00> : vector<4x512xf32>
    %157 = tpu.matmul %155, %156, %cst_84 {dimension_numbers = #tpu.dot_dimension_numbers<[1], [0], [0], [1], [0, 0, 1, 1], [], []>} : vector<4x12xf32>, vector<12x512xf32>, vector<4x512xf32> -> vector<4x512xf32>
    %158 = arith.addf %139, %157 : vector<4x512xf32>
    %159 = vector.broadcast %11 : vector<4x1xf32> to vector<4x512xf32>
    %160 = arith.addf %158, %159 : vector<4x512xf32>
    %c1_85 = arith.constant 1 : index
    %c0_86 = arith.constant 0 : index
    %c0_87 = arith.constant 0 : index
    %161 = vector.load %arg9[%c1_85, %c0_86, %c0_87] : memref<4x4x1xf32, #tpu.memory_space<vmem>>, vector<1x4x1xf32>
    %162 = vector.shape_cast %161 : vector<1x4x1xf32> to vector<4x1xf32>
    %c0_88 = arith.constant 0 : index
    %c0_89 = arith.constant 0 : index
    %163 = vector.load %arg6[%c0_88, %c0_89] : memref<4x108xf32, #tpu.memory_space<vmem>>, vector<4x108xf32>
    %c146_i32 = arith.constant 146 : i32
    %164 = tpu.dynamic_rotate %8 by %c146_i32 dim 1 : vector<4x512xf32>, i32 -> vector<4x512xf32>
    %c27 = arith.constant 27 : index
    %c0_90 = arith.constant 0 : index
    %165 = vector.load %arg2[%c27, %c0_90] : memref<82x512xf32, #tpu.memory_space<vmem>>, vector<1x512xf32>
    %166 = vector.broadcast %165 : vector<1x512xf32> to vector<4x512xf32>
    %167 = arith.mulf %164, %166 : vector<4x512xf32>
    %c0_91 = arith.constant 0 : index
    %c0_92 = arith.constant 0 : index
    %168 = vector.load %arg17[%c0_91, %c0_92] : memref<108x512xf32, #tpu.memory_space<vmem>>, vector<4x512xf32>
    tpu.vector_store %arg17[%c0_91, %c0_92], %167 {strides = array<i32>} : memref<108x512xf32, #tpu.memory_space<vmem>>, vector<4x512xf32>,
    %c144_i32 = arith.constant 144 : i32
    %169 = tpu.dynamic_rotate %8 by %c144_i32 dim 1 : vector<4x512xf32>, i32 -> vector<4x512xf32>
    %c28_93 = arith.constant 28 : index
    %c0_94 = arith.constant 0 : index
    %170 = vector.load %arg2[%c28_93, %c0_94] : memref<82x512xf32, #tpu.memory_space<vmem>>, vector<1x512xf32>
    %171 = vector.broadcast %170 : vector<1x512xf32> to vector<4x512xf32>
    %172 = arith.mulf %169, %171 : vector<4x512xf32>
    %c4_95 = arith.constant 4 : index
    %c0_96 = arith.constant 0 : index
    %173 = vector.load %arg17[%c4_95, %c0_96] : memref<108x512xf32, #tpu.memory_space<vmem>>, vector<4x512xf32>
    tpu.vector_store %arg17[%c4_95, %c0_96], %172 {strides = array<i32>} : memref<108x512xf32, #tpu.memory_space<vmem>>, vector<4x512xf32>,
    %c142_i32 = arith.constant 142 : i32
    %174 = tpu.dynamic_rotate %8 by %c142_i32 dim 1 : vector<4x512xf32>, i32 -> vector<4x512xf32>
    %c29 = arith.constant 29 : index
    %c0_97 = arith.constant 0 : index
    %175 = vector.load %arg2[%c29, %c0_97] : memref<82x512xf32, #tpu.memory_space<vmem>>, vector<1x512xf32>
    %176 = vector.broadcast %175 : vector<1x512xf32> to vector<4x512xf32>
    %177 = arith.mulf %174, %176 : vector<4x512xf32>
    %c8_98 = arith.constant 8 : index
    %c0_99 = arith.constant 0 : index
    %178 = vector.load %arg17[%c8_98, %c0_99] : memref<108x512xf32, #tpu.memory_space<vmem>>, vector<4x512xf32>
    tpu.vector_store %arg17[%c8_98, %c0_99], %177 {strides = array<i32>} : memref<108x512xf32, #tpu.memory_space<vmem>>, vector<4x512xf32>,
    %c130_i32 = arith.constant 130 : i32
    %179 = tpu.dynamic_rotate %8 by %c130_i32 dim 1 : vector<4x512xf32>, i32 -> vector<4x512xf32>
    %c30 = arith.constant 30 : index
    %c0_100 = arith.constant 0 : index
    %180 = vector.load %arg2[%c30, %c0_100] : memref<82x512xf32, #tpu.memory_space<vmem>>, vector<1x512xf32>
    %181 = vector.broadcast %180 : vector<1x512xf32> to vector<4x512xf32>
    %182 = arith.mulf %179, %181 : vector<4x512xf32>
    %c12_101 = arith.constant 12 : index
    %c0_102 = arith.constant 0 : index
    %183 = vector.load %arg17[%c12_101, %c0_102] : memref<108x512xf32, #tpu.memory_space<vmem>>, vector<4x512xf32>
    tpu.vector_store %arg17[%c12_101, %c0_102], %182 {strides = array<i32>} : memref<108x512xf32, #tpu.memory_space<vmem>>, vector<4x512xf32>,
    %c128_i32 = arith.constant 128 : i32
    %184 = tpu.dynamic_rotate %8 by %c128_i32 dim 1 : vector<4x512xf32>, i32 -> vector<4x512xf32>
    %c31 = arith.constant 31 : index
    %c0_103 = arith.constant 0 : index
    %185 = vector.load %arg2[%c31, %c0_103] : memref<82x512xf32, #tpu.memory_space<vmem>>, vector<1x512xf32>
    %186 = vector.broadcast %185 : vector<1x512xf32> to vector<4x512xf32>
    %187 = arith.mulf %184, %186 : vector<4x512xf32>
    %c16_104 = arith.constant 16 : index
    %c0_105 = arith.constant 0 : index
    %188 = vector.load %arg17[%c16_104, %c0_105] : memref<108x512xf32, #tpu.memory_space<vmem>>, vector<4x512xf32>
    tpu.vector_store %arg17[%c16_104, %c0_105], %187 {strides = array<i32>} : memref<108x512xf32, #tpu.memory_space<vmem>>, vector<4x512xf32>,
    %c126_i32 = arith.constant 126 : i32
    %189 = tpu.dynamic_rotate %8 by %c126_i32 dim 1 : vector<4x512xf32>, i32 -> vector<4x512xf32>
    %c32_106 = arith.constant 32 : index
    %c0_107 = arith.constant 0 : index
    %190 = vector.load %arg2[%c32_106, %c0_107] : memref<82x512xf32, #tpu.memory_space<vmem>>, vector<1x512xf32>
    %191 = vector.broadcast %190 : vector<1x512xf32> to vector<4x512xf32>
    %192 = arith.mulf %189, %191 : vector<4x512xf32>
    %c20_108 = arith.constant 20 : index
    %c0_109 = arith.constant 0 : index
    %193 = vector.load %arg17[%c20_108, %c0_109] : memref<108x512xf32, #tpu.memory_space<vmem>>, vector<4x512xf32>
    tpu.vector_store %arg17[%c20_108, %c0_109], %192 {strides = array<i32>} : memref<108x512xf32, #tpu.memory_space<vmem>>, vector<4x512xf32>,
    %c114_i32 = arith.constant 114 : i32
    %194 = tpu.dynamic_rotate %8 by %c114_i32 dim 1 : vector<4x512xf32>, i32 -> vector<4x512xf32>
    %c33 = arith.constant 33 : index
    %c0_110 = arith.constant 0 : index
    %195 = vector.load %arg2[%c33, %c0_110] : memref<82x512xf32, #tpu.memory_space<vmem>>, vector<1x512xf32>
    %196 = vector.broadcast %195 : vector<1x512xf32> to vector<4x512xf32>
    %197 = arith.mulf %194, %196 : vector<4x512xf32>
    %c24_111 = arith.constant 24 : index
    %c0_112 = arith.constant 0 : index
    %198 = vector.load %arg17[%c24_111, %c0_112] : memref<108x512xf32, #tpu.memory_space<vmem>>, vector<4x512xf32>
    tpu.vector_store %arg17[%c24_111, %c0_112], %197 {strides = array<i32>} : memref<108x512xf32, #tpu.memory_space<vmem>>, vector<4x512xf32>,
    %c112_i32 = arith.constant 112 : i32
    %199 = tpu.dynamic_rotate %8 by %c112_i32 dim 1 : vector<4x512xf32>, i32 -> vector<4x512xf32>
    %c34 = arith.constant 34 : index
    %c0_113 = arith.constant 0 : index
    %200 = vector.load %arg2[%c34, %c0_113] : memref<82x512xf32, #tpu.memory_space<vmem>>, vector<1x512xf32>
    %201 = vector.broadcast %200 : vector<1x512xf32> to vector<4x512xf32>
    %202 = arith.mulf %199, %201 : vector<4x512xf32>
    %c28_114 = arith.constant 28 : index
    %c0_115 = arith.constant 0 : index
    %203 = vector.load %arg17[%c28_114, %c0_115] : memref<108x512xf32, #tpu.memory_space<vmem>>, vector<4x512xf32>
    tpu.vector_store %arg17[%c28_114, %c0_115], %202 {strides = array<i32>} : memref<108x512xf32, #tpu.memory_space<vmem>>, vector<4x512xf32>,
    %204 = vector.extract_strided_slice %163 {offsets = [0, 0], sizes = [4, 32], strides = [1, 1]} : vector<4x108xf32> to vector<4x32xf32>
    %c0_116 = arith.constant 0 : index
    %c0_117 = arith.constant 0 : index
    %205 = vector.load %arg17[%c0_116, %c0_117] : memref<108x512xf32, #tpu.memory_space<vmem>>, vector<32x512xf32>
    %cst_118 = arith.constant dense<0.000000e+00> : vector<4x512xf32>
    %206 = tpu.matmul %204, %205, %cst_118 {dimension_numbers = #tpu.dot_dimension_numbers<[1], [0], [0], [1], [0, 0, 1, 1], [], []>} : vector<4x32xf32>, vector<32x512xf32>, vector<4x512xf32> -> vector<4x512xf32>
    %c110_i32 = arith.constant 110 : i32
    %207 = tpu.dynamic_rotate %8 by %c110_i32 dim 1 : vector<4x512xf32>, i32 -> vector<4x512xf32>
    %c35 = arith.constant 35 : index
    %c0_119 = arith.constant 0 : index
    %208 = vector.load %arg2[%c35, %c0_119] : memref<82x512xf32, #tpu.memory_space<vmem>>, vector<1x512xf32>
    %209 = vector.broadcast %208 : vector<1x512xf32> to vector<4x512xf32>
    %210 = arith.mulf %207, %209 : vector<4x512xf32>
    %c32_120 = arith.constant 32 : index
    %c0_121 = arith.constant 0 : index
    %211 = vector.load %arg17[%c32_120, %c0_121] : memref<108x512xf32, #tpu.memory_space<vmem>>, vector<4x512xf32>
    tpu.vector_store %arg17[%c32_120, %c0_121], %210 {strides = array<i32>} : memref<108x512xf32, #tpu.memory_space<vmem>>, vector<4x512xf32>,
    %c18_i32 = arith.constant 18 : i32
    %212 = tpu.dynamic_rotate %8 by %c18_i32 dim 1 : vector<4x512xf32>, i32 -> vector<4x512xf32>
    %c36_122 = arith.constant 36 : index
    %c0_123 = arith.constant 0 : index
    %213 = vector.load %arg2[%c36_122, %c0_123] : memref<82x512xf32, #tpu.memory_space<vmem>>, vector<1x512xf32>
    %214 = vector.broadcast %213 : vector<1x512xf32> to vector<4x512xf32>
    %215 = arith.mulf %212, %214 : vector<4x512xf32>
    %c36_124 = arith.constant 36 : index
    %c0_125 = arith.constant 0 : index
    %216 = vector.load %arg17[%c36_124, %c0_125] : memref<108x512xf32, #tpu.memory_space<vmem>>, vector<4x512xf32>
    tpu.vector_store %arg17[%c36_124, %c0_125], %215 {strides = array<i32>} : memref<108x512xf32, #tpu.memory_space<vmem>>, vector<4x512xf32>,
    %c16_i32 = arith.constant 16 : i32
    %217 = tpu.dynamic_rotate %8 by %c16_i32 dim 1 : vector<4x512xf32>, i32 -> vector<4x512xf32>
    %c37 = arith.constant 37 : index
    %c0_126 = arith.constant 0 : index
    %218 = vector.load %arg2[%c37, %c0_126] : memref<82x512xf32, #tpu.memory_space<vmem>>, vector<1x512xf32>
    %219 = vector.broadcast %218 : vector<1x512xf32> to vector<4x512xf32>
    %220 = arith.mulf %217, %219 : vector<4x512xf32>
    %c40_127 = arith.constant 40 : index
    %c0_128 = arith.constant 0 : index
    %221 = vector.load %arg17[%c40_127, %c0_128] : memref<108x512xf32, #tpu.memory_space<vmem>>, vector<4x512xf32>
    tpu.vector_store %arg17[%c40_127, %c0_128], %220 {strides = array<i32>} : memref<108x512xf32, #tpu.memory_space<vmem>>, vector<4x512xf32>,
    %c14_i32 = arith.constant 14 : i32
    %222 = tpu.dynamic_rotate %8 by %c14_i32 dim 1 : vector<4x512xf32>, i32 -> vector<4x512xf32>
    %c38 = arith.constant 38 : index
    %c0_129 = arith.constant 0 : index
    %223 = vector.load %arg2[%c38, %c0_129] : memref<82x512xf32, #tpu.memory_space<vmem>>, vector<1x512xf32>
    %224 = vector.broadcast %223 : vector<1x512xf32> to vector<4x512xf32>
    %225 = arith.mulf %222, %224 : vector<4x512xf32>
    %c44_130 = arith.constant 44 : index
    %c0_131 = arith.constant 0 : index
    %226 = vector.load %arg17[%c44_130, %c0_131] : memref<108x512xf32, #tpu.memory_space<vmem>>, vector<4x512xf32>
    tpu.vector_store %arg17[%c44_130, %c0_131], %225 {strides = array<i32>} : memref<108x512xf32, #tpu.memory_space<vmem>>, vector<4x512xf32>,
    %c2_i32 = arith.constant 2 : i32
    %227 = tpu.dynamic_rotate %8 by %c2_i32 dim 1 : vector<4x512xf32>, i32 -> vector<4x512xf32>
    %c39 = arith.constant 39 : index
    %c0_132 = arith.constant 0 : index
    %228 = vector.load %arg2[%c39, %c0_132] : memref<82x512xf32, #tpu.memory_space<vmem>>, vector<1x512xf32>
    %229 = vector.broadcast %228 : vector<1x512xf32> to vector<4x512xf32>
    %230 = arith.mulf %227, %229 : vector<4x512xf32>
    %c48_133 = arith.constant 48 : index
    %c0_134 = arith.constant 0 : index
    %231 = vector.load %arg17[%c48_133, %c0_134] : memref<108x512xf32, #tpu.memory_space<vmem>>, vector<4x512xf32>
    tpu.vector_store %arg17[%c48_133, %c0_134], %230 {strides = array<i32>} : memref<108x512xf32, #tpu.memory_space<vmem>>, vector<4x512xf32>,
    %c52_135 = arith.constant 52 : index
    %c0_136 = arith.constant 0 : index
    %232 = vector.load %arg17[%c52_135, %c0_136] : memref<108x512xf32, #tpu.memory_space<vmem>>, vector<4x512xf32>
    tpu.vector_store %arg17[%c52_135, %c0_136], %8 {strides = array<i32>} : memref<108x512xf32, #tpu.memory_space<vmem>>, vector<4x512xf32>,
    %c510_i32 = arith.constant 510 : i32
    %233 = tpu.dynamic_rotate %8 by %c510_i32 dim 1 : vector<4x512xf32>, i32 -> vector<4x512xf32>
    %c41 = arith.constant 41 : index
    %c0_137 = arith.constant 0 : index
    %234 = vector.load %arg2[%c41, %c0_137] : memref<82x512xf32, #tpu.memory_space<vmem>>, vector<1x512xf32>
    %235 = vector.broadcast %234 : vector<1x512xf32> to vector<4x512xf32>
    %236 = arith.mulf %233, %235 : vector<4x512xf32>
    %c56_138 = arith.constant 56 : index
    %c0_139 = arith.constant 0 : index
    %237 = vector.load %arg17[%c56_138, %c0_139] : memref<108x512xf32, #tpu.memory_space<vmem>>, vector<4x512xf32>
    tpu.vector_store %arg17[%c56_138, %c0_139], %236 {strides = array<i32>} : memref<108x512xf32, #tpu.memory_space<vmem>>, vector<4x512xf32>,
    %c498_i32 = arith.constant 498 : i32
    %238 = tpu.dynamic_rotate %8 by %c498_i32 dim 1 : vector<4x512xf32>, i32 -> vector<4x512xf32>
    %c42 = arith.constant 42 : index
    %c0_140 = arith.constant 0 : index
    %239 = vector.load %arg2[%c42, %c0_140] : memref<82x512xf32, #tpu.memory_space<vmem>>, vector<1x512xf32>
    %240 = vector.broadcast %239 : vector<1x512xf32> to vector<4x512xf32>
    %241 = arith.mulf %238, %240 : vector<4x512xf32>
    %c60_141 = arith.constant 60 : index
    %c0_142 = arith.constant 0 : index
    %242 = vector.load %arg17[%c60_141, %c0_142] : memref<108x512xf32, #tpu.memory_space<vmem>>, vector<4x512xf32>
    tpu.vector_store %arg17[%c60_141, %c0_142], %241 {strides = array<i32>} : memref<108x512xf32, #tpu.memory_space<vmem>>, vector<4x512xf32>,
    %243 = vector.extract_strided_slice %163 {offsets = [0, 32], sizes = [4, 32], strides = [1, 1]} : vector<4x108xf32> to vector<4x32xf32>
    %c32_143 = arith.constant 32 : index
    %c0_144 = arith.constant 0 : index
    %244 = vector.load %arg17[%c32_143, %c0_144] : memref<108x512xf32, #tpu.memory_space<vmem>>, vector<32x512xf32>
    %cst_145 = arith.constant dense<0.000000e+00> : vector<4x512xf32>
    %245 = tpu.matmul %243, %244, %cst_145 {dimension_numbers = #tpu.dot_dimension_numbers<[1], [0], [0], [1], [0, 0, 1, 1], [], []>} : vector<4x32xf32>, vector<32x512xf32>, vector<4x512xf32> -> vector<4x512xf32>
    %246 = arith.addf %206, %245 : vector<4x512xf32>
    %c496_i32 = arith.constant 496 : i32
    %247 = tpu.dynamic_rotate %8 by %c496_i32 dim 1 : vector<4x512xf32>, i32 -> vector<4x512xf32>
    %c43 = arith.constant 43 : index
    %c0_146 = arith.constant 0 : index
    %248 = vector.load %arg2[%c43, %c0_146] : memref<82x512xf32, #tpu.memory_space<vmem>>, vector<1x512xf32>
    %249 = vector.broadcast %248 : vector<1x512xf32> to vector<4x512xf32>
    %250 = arith.mulf %247, %249 : vector<4x512xf32>
    %c64_147 = arith.constant 64 : index
    %c0_148 = arith.constant 0 : index
    %251 = vector.load %arg17[%c64_147, %c0_148] : memref<108x512xf32, #tpu.memory_space<vmem>>, vector<4x512xf32>
    tpu.vector_store %arg17[%c64_147, %c0_148], %250 {strides = array<i32>} : memref<108x512xf32, #tpu.memory_space<vmem>>, vector<4x512xf32>,
    %c494_i32 = arith.constant 494 : i32
    %252 = tpu.dynamic_rotate %8 by %c494_i32 dim 1 : vector<4x512xf32>, i32 -> vector<4x512xf32>
    %c44_149 = arith.constant 44 : index
    %c0_150 = arith.constant 0 : index
    %253 = vector.load %arg2[%c44_149, %c0_150] : memref<82x512xf32, #tpu.memory_space<vmem>>, vector<1x512xf32>
    %254 = vector.broadcast %253 : vector<1x512xf32> to vector<4x512xf32>
    %255 = arith.mulf %252, %254 : vector<4x512xf32>
    %c68_151 = arith.constant 68 : index
    %c0_152 = arith.constant 0 : index
    %256 = vector.load %arg17[%c68_151, %c0_152] : memref<108x512xf32, #tpu.memory_space<vmem>>, vector<4x512xf32>
    tpu.vector_store %arg17[%c68_151, %c0_152], %255 {strides = array<i32>} : memref<108x512xf32, #tpu.memory_space<vmem>>, vector<4x512xf32>,
    %c402_i32 = arith.constant 402 : i32
    %257 = tpu.dynamic_rotate %8 by %c402_i32 dim 1 : vector<4x512xf32>, i32 -> vector<4x512xf32>
    %c45 = arith.constant 45 : index
    %c0_153 = arith.constant 0 : index
    %258 = vector.load %arg2[%c45, %c0_153] : memref<82x512xf32, #tpu.memory_space<vmem>>, vector<1x512xf32>
    %259 = vector.broadcast %258 : vector<1x512xf32> to vector<4x512xf32>
    %260 = arith.mulf %257, %259 : vector<4x512xf32>
    %c72_154 = arith.constant 72 : index
    %c0_155 = arith.constant 0 : index
    %261 = vector.load %arg17[%c72_154, %c0_155] : memref<108x512xf32, #tpu.memory_space<vmem>>, vector<4x512xf32>
    tpu.vector_store %arg17[%c72_154, %c0_155], %260 {strides = array<i32>} : memref<108x512xf32, #tpu.memory_space<vmem>>, vector<4x512xf32>,
    %c400_i32 = arith.constant 400 : i32
    %262 = tpu.dynamic_rotate %8 by %c400_i32 dim 1 : vector<4x512xf32>, i32 -> vector<4x512xf32>
    %c46 = arith.constant 46 : index
    %c0_156 = arith.constant 0 : index
    %263 = vector.load %arg2[%c46, %c0_156] : memref<82x512xf32, #tpu.memory_space<vmem>>, vector<1x512xf32>
    %264 = vector.broadcast %263 : vector<1x512xf32> to vector<4x512xf32>
    %265 = arith.mulf %262, %264 : vector<4x512xf32>
    %c76_157 = arith.constant 76 : index
    %c0_158 = arith.constant 0 : index
    %266 = vector.load %arg17[%c76_157, %c0_158] : memref<108x512xf32, #tpu.memory_space<vmem>>, vector<4x512xf32>
    tpu.vector_store %arg17[%c76_157, %c0_158], %265 {strides = array<i32>} : memref<108x512xf32, #tpu.memory_space<vmem>>, vector<4x512xf32>,
    %c398_i32 = arith.constant 398 : i32
    %267 = tpu.dynamic_rotate %8 by %c398_i32 dim 1 : vector<4x512xf32>, i32 -> vector<4x512xf32>
    %c47 = arith.constant 47 : index
    %c0_159 = arith.constant 0 : index
    %268 = vector.load %arg2[%c47, %c0_159] : memref<82x512xf32, #tpu.memory_space<vmem>>, vector<1x512xf32>
    %269 = vector.broadcast %268 : vector<1x512xf32> to vector<4x512xf32>
    %270 = arith.mulf %267, %269 : vector<4x512xf32>
    %c80_160 = arith.constant 80 : index
    %c0_161 = arith.constant 0 : index
    %271 = vector.load %arg17[%c80_160, %c0_161] : memref<108x512xf32, #tpu.memory_space<vmem>>, vector<4x512xf32>
    tpu.vector_store %arg17[%c80_160, %c0_161], %270 {strides = array<i32>} : memref<108x512xf32, #tpu.memory_space<vmem>>, vector<4x512xf32>,
    %c386_i32 = arith.constant 386 : i32
    %272 = tpu.dynamic_rotate %8 by %c386_i32 dim 1 : vector<4x512xf32>, i32 -> vector<4x512xf32>
    %c48_162 = arith.constant 48 : index
    %c0_163 = arith.constant 0 : index
    %273 = vector.load %arg2[%c48_162, %c0_163] : memref<82x512xf32, #tpu.memory_space<vmem>>, vector<1x512xf32>
    %274 = vector.broadcast %273 : vector<1x512xf32> to vector<4x512xf32>
    %275 = arith.mulf %272, %274 : vector<4x512xf32>
    %c84_164 = arith.constant 84 : index
    %c0_165 = arith.constant 0 : index
    %276 = vector.load %arg17[%c84_164, %c0_165] : memref<108x512xf32, #tpu.memory_space<vmem>>, vector<4x512xf32>
    tpu.vector_store %arg17[%c84_164, %c0_165], %275 {strides = array<i32>} : memref<108x512xf32, #tpu.memory_space<vmem>>, vector<4x512xf32>,
    %c384_i32 = arith.constant 384 : i32
    %277 = tpu.dynamic_rotate %8 by %c384_i32 dim 1 : vector<4x512xf32>, i32 -> vector<4x512xf32>
    %c49 = arith.constant 49 : index
    %c0_166 = arith.constant 0 : index
    %278 = vector.load %arg2[%c49, %c0_166] : memref<82x512xf32, #tpu.memory_space<vmem>>, vector<1x512xf32>
    %279 = vector.broadcast %278 : vector<1x512xf32> to vector<4x512xf32>
    %280 = arith.mulf %277, %279 : vector<4x512xf32>
    %c88_167 = arith.constant 88 : index
    %c0_168 = arith.constant 0 : index
    %281 = vector.load %arg17[%c88_167, %c0_168] : memref<108x512xf32, #tpu.memory_space<vmem>>, vector<4x512xf32>
    tpu.vector_store %arg17[%c88_167, %c0_168], %280 {strides = array<i32>} : memref<108x512xf32, #tpu.memory_space<vmem>>, vector<4x512xf32>,
    %c382_i32 = arith.constant 382 : i32
    %282 = tpu.dynamic_rotate %8 by %c382_i32 dim 1 : vector<4x512xf32>, i32 -> vector<4x512xf32>
    %c50 = arith.constant 50 : index
    %c0_169 = arith.constant 0 : index
    %283 = vector.load %arg2[%c50, %c0_169] : memref<82x512xf32, #tpu.memory_space<vmem>>, vector<1x512xf32>
    %284 = vector.broadcast %283 : vector<1x512xf32> to vector<4x512xf32>
    %285 = arith.mulf %282, %284 : vector<4x512xf32>
    %c92_170 = arith.constant 92 : index
    %c0_171 = arith.constant 0 : index
    %286 = vector.load %arg17[%c92_170, %c0_171] : memref<108x512xf32, #tpu.memory_space<vmem>>, vector<4x512xf32>
    tpu.vector_store %arg17[%c92_170, %c0_171], %285 {strides = array<i32>} : memref<108x512xf32, #tpu.memory_space<vmem>>, vector<4x512xf32>,
    %287 = vector.extract_strided_slice %163 {offsets = [0, 64], sizes = [4, 32], strides = [1, 1]} : vector<4x108xf32> to vector<4x32xf32>
    %c64_172 = arith.constant 64 : index
    %c0_173 = arith.constant 0 : index
    %288 = vector.load %arg17[%c64_172, %c0_173] : memref<108x512xf32, #tpu.memory_space<vmem>>, vector<32x512xf32>
    %cst_174 = arith.constant dense<0.000000e+00> : vector<4x512xf32>
    %289 = tpu.matmul %287, %288, %cst_174 {dimension_numbers = #tpu.dot_dimension_numbers<[1], [0], [0], [1], [0, 0, 1, 1], [], []>} : vector<4x32xf32>, vector<32x512xf32>, vector<4x512xf32> -> vector<4x512xf32>
    %290 = arith.addf %246, %289 : vector<4x512xf32>
    %c370_i32 = arith.constant 370 : i32
    %291 = tpu.dynamic_rotate %8 by %c370_i32 dim 1 : vector<4x512xf32>, i32 -> vector<4x512xf32>
    %c51 = arith.constant 51 : index
    %c0_175 = arith.constant 0 : index
    %292 = vector.load %arg2[%c51, %c0_175] : memref<82x512xf32, #tpu.memory_space<vmem>>, vector<1x512xf32>
    %293 = vector.broadcast %292 : vector<1x512xf32> to vector<4x512xf32>
    %294 = arith.mulf %291, %293 : vector<4x512xf32>
    %c96_176 = arith.constant 96 : index
    %c0_177 = arith.constant 0 : index
    %295 = vector.load %arg17[%c96_176, %c0_177] : memref<108x512xf32, #tpu.memory_space<vmem>>, vector<4x512xf32>
    tpu.vector_store %arg17[%c96_176, %c0_177], %294 {strides = array<i32>} : memref<108x512xf32, #tpu.memory_space<vmem>>, vector<4x512xf32>,
    %c368_i32 = arith.constant 368 : i32
    %296 = tpu.dynamic_rotate %8 by %c368_i32 dim 1 : vector<4x512xf32>, i32 -> vector<4x512xf32>
    %c52_178 = arith.constant 52 : index
    %c0_179 = arith.constant 0 : index
    %297 = vector.load %arg2[%c52_178, %c0_179] : memref<82x512xf32, #tpu.memory_space<vmem>>, vector<1x512xf32>
    %298 = vector.broadcast %297 : vector<1x512xf32> to vector<4x512xf32>
    %299 = arith.mulf %296, %298 : vector<4x512xf32>
    %c100_180 = arith.constant 100 : index
    %c0_181 = arith.constant 0 : index
    %300 = vector.load %arg17[%c100_180, %c0_181] : memref<108x512xf32, #tpu.memory_space<vmem>>, vector<4x512xf32>
    tpu.vector_store %arg17[%c100_180, %c0_181], %299 {strides = array<i32>} : memref<108x512xf32, #tpu.memory_space<vmem>>, vector<4x512xf32>,
    %c366_i32 = arith.constant 366 : i32
    %301 = tpu.dynamic_rotate %8 by %c366_i32 dim 1 : vector<4x512xf32>, i32 -> vector<4x512xf32>
    %c53 = arith.constant 53 : index
    %c0_182 = arith.constant 0 : index
    %302 = vector.load %arg2[%c53, %c0_182] : memref<82x512xf32, #tpu.memory_space<vmem>>, vector<1x512xf32>
    %303 = vector.broadcast %302 : vector<1x512xf32> to vector<4x512xf32>
    %304 = arith.mulf %301, %303 : vector<4x512xf32>
    %c104_183 = arith.constant 104 : index
    %c0_184 = arith.constant 0 : index
    %305 = vector.load %arg17[%c104_183, %c0_184] : memref<108x512xf32, #tpu.memory_space<vmem>>, vector<4x512xf32>
    tpu.vector_store %arg17[%c104_183, %c0_184], %304 {strides = array<i32>} : memref<108x512xf32, #tpu.memory_space<vmem>>, vector<4x512xf32>,
    %306 = vector.extract_strided_slice %163 {offsets = [0, 96], sizes = [4, 12], strides = [1, 1]} : vector<4x108xf32> to vector<4x12xf32>
    %c96_185 = arith.constant 96 : index
    %c0_186 = arith.constant 0 : index
    %307 = vector.load %arg17[%c96_185, %c0_186] : memref<108x512xf32, #tpu.memory_space<vmem>>, vector<12x512xf32>
    %cst_187 = arith.constant dense<0.000000e+00> : vector<4x512xf32>
    %308 = tpu.matmul %306, %307, %cst_187 {dimension_numbers = #tpu.dot_dimension_numbers<[1], [0], [0], [1], [0, 0, 1, 1], [], []>} : vector<4x12xf32>, vector<12x512xf32>, vector<4x512xf32> -> vector<4x512xf32>
    %309 = arith.addf %290, %308 : vector<4x512xf32>
    %310 = vector.broadcast %162 : vector<4x1xf32> to vector<4x512xf32>
    %311 = arith.addf %309, %310 : vector<4x512xf32>
    %c0_188 = arith.constant 0 : index
    %c0_189 = arith.constant 0 : index
    %312 = vector.load %arg10[%c0_188, %c0_189] : memref<8x4xf32, #tpu.memory_space<vmem>>, vector<8x4xf32>
    %cst_190 = arith.constant dense<0.000000e+00> : vector<8x512xf32>
    %313 = tpu.matmul %312, %160, %cst_190 {dimension_numbers = #tpu.dot_dimension_numbers<[1], [0], [0], [1], [0, 0, 1, 1], [], []>} : vector<8x4xf32>, vector<4x512xf32>, vector<8x512xf32> -> vector<8x512xf32>
    %c0_191 = arith.constant 0 : index
    %c0_192 = arith.constant 0 : index
    %314 = vector.load %arg11[%c0_191, %c0_192] : memref<8x4xf32, #tpu.memory_space<vmem>>, vector<8x4xf32>
    %cst_193 = arith.constant dense<0.000000e+00> : vector<8x512xf32>
    %315 = tpu.matmul %314, %311, %cst_193 {dimension_numbers = #tpu.dot_dimension_numbers<[1], [0], [0], [1], [0, 0, 1, 1], [], []>} : vector<8x4xf32>, vector<4x512xf32>, vector<8x512xf32> -> vector<8x512xf32>
    %316 = arith.addf %313, %315 : vector<8x512xf32>
    %c0_194 = arith.constant 0 : index
    %c0_195 = arith.constant 0 : index
    %317 = vector.load %arg12[%c0_194, %c0_195] : memref<8x1xf32, #tpu.memory_space<vmem>>, vector<8x1xf32>
    %318 = vector.broadcast %317 : vector<8x1xf32> to vector<8x512xf32>
    %319 = arith.addf %316, %318 : vector<8x512xf32>
    %cst_196 = arith.constant 0.000000e+00 : f32
    %320 = vector.broadcast %cst_196 : f32 to vector<8x512xf32>
    %321 = arith.maximumf %319, %320 : vector<8x512xf32>
    %c2_197 = arith.constant 2 : index
    %c0_198 = arith.constant 0 : index
    %c0_199 = arith.constant 0 : index
    %322 = vector.load %arg9[%c2_197, %c0_198, %c0_199] : memref<4x4x1xf32, #tpu.memory_space<vmem>>, vector<1x4x1xf32>
    %323 = vector.shape_cast %322 : vector<1x4x1xf32> to vector<4x1xf32>
    %c0_200 = arith.constant 0 : index
    %c0_201 = arith.constant 0 : index
    %324 = vector.load %arg7[%c0_200, %c0_201] : memref<4x108xf32, #tpu.memory_space<vmem>>, vector<4x108xf32>
    %c292_i32 = arith.constant 292 : i32
    %325 = tpu.dynamic_rotate %8 by %c292_i32 dim 1 : vector<4x512xf32>, i32 -> vector<4x512xf32>
    %c54 = arith.constant 54 : index
    %c0_202 = arith.constant 0 : index
    %326 = vector.load %arg2[%c54, %c0_202] : memref<82x512xf32, #tpu.memory_space<vmem>>, vector<1x512xf32>
    %327 = vector.broadcast %326 : vector<1x512xf32> to vector<4x512xf32>
    %328 = arith.mulf %325, %327 : vector<4x512xf32>
    %c0_203 = arith.constant 0 : index
    %c0_204 = arith.constant 0 : index
    %329 = vector.load %arg17[%c0_203, %c0_204] : memref<108x512xf32, #tpu.memory_space<vmem>>, vector<4x512xf32>
    tpu.vector_store %arg17[%c0_203, %c0_204], %328 {strides = array<i32>} : memref<108x512xf32, #tpu.memory_space<vmem>>, vector<4x512xf32>,
    %c288_i32 = arith.constant 288 : i32
    %330 = tpu.dynamic_rotate %8 by %c288_i32 dim 1 : vector<4x512xf32>, i32 -> vector<4x512xf32>
    %c55 = arith.constant 55 : index
    %c0_205 = arith.constant 0 : index
    %331 = vector.load %arg2[%c55, %c0_205] : memref<82x512xf32, #tpu.memory_space<vmem>>, vector<1x512xf32>
    %332 = vector.broadcast %331 : vector<1x512xf32> to vector<4x512xf32>
    %333 = arith.mulf %330, %332 : vector<4x512xf32>
    %c4_206 = arith.constant 4 : index
    %c0_207 = arith.constant 0 : index
    %334 = vector.load %arg17[%c4_206, %c0_207] : memref<108x512xf32, #tpu.memory_space<vmem>>, vector<4x512xf32>
    tpu.vector_store %arg17[%c4_206, %c0_207], %333 {strides = array<i32>} : memref<108x512xf32, #tpu.memory_space<vmem>>, vector<4x512xf32>,
    %c284_i32 = arith.constant 284 : i32
    %335 = tpu.dynamic_rotate %8 by %c284_i32 dim 1 : vector<4x512xf32>, i32 -> vector<4x512xf32>
    %c56_208 = arith.constant 56 : index
    %c0_209 = arith.constant 0 : index
    %336 = vector.load %arg2[%c56_208, %c0_209] : memref<82x512xf32, #tpu.memory_space<vmem>>, vector<1x512xf32>
    %337 = vector.broadcast %336 : vector<1x512xf32> to vector<4x512xf32>
    %338 = arith.mulf %335, %337 : vector<4x512xf32>
    %c8_210 = arith.constant 8 : index
    %c0_211 = arith.constant 0 : index
    %339 = vector.load %arg17[%c8_210, %c0_211] : memref<108x512xf32, #tpu.memory_space<vmem>>, vector<4x512xf32>
    tpu.vector_store %arg17[%c8_210, %c0_211], %338 {strides = array<i32>} : memref<108x512xf32, #tpu.memory_space<vmem>>, vector<4x512xf32>,
    %c260_i32 = arith.constant 260 : i32
    %340 = tpu.dynamic_rotate %8 by %c260_i32 dim 1 : vector<4x512xf32>, i32 -> vector<4x512xf32>
    %c57 = arith.constant 57 : index
    %c0_212 = arith.constant 0 : index
    %341 = vector.load %arg2[%c57, %c0_212] : memref<82x512xf32, #tpu.memory_space<vmem>>, vector<1x512xf32>
    %342 = vector.broadcast %341 : vector<1x512xf32> to vector<4x512xf32>
    %343 = arith.mulf %340, %342 : vector<4x512xf32>
    %c12_213 = arith.constant 12 : index
    %c0_214 = arith.constant 0 : index
    %344 = vector.load %arg17[%c12_213, %c0_214] : memref<108x512xf32, #tpu.memory_space<vmem>>, vector<4x512xf32>
    tpu.vector_store %arg17[%c12_213, %c0_214], %343 {strides = array<i32>} : memref<108x512xf32, #tpu.memory_space<vmem>>, vector<4x512xf32>,
    %c256_i32 = arith.constant 256 : i32
    %345 = tpu.dynamic_rotate %8 by %c256_i32 dim 1 : vector<4x512xf32>, i32 -> vector<4x512xf32>
    %c58 = arith.constant 58 : index
    %c0_215 = arith.constant 0 : index
    %346 = vector.load %arg2[%c58, %c0_215] : memref<82x512xf32, #tpu.memory_space<vmem>>, vector<1x512xf32>
    %347 = vector.broadcast %346 : vector<1x512xf32> to vector<4x512xf32>
    %348 = arith.mulf %345, %347 : vector<4x512xf32>
    %c16_216 = arith.constant 16 : index
    %c0_217 = arith.constant 0 : index
    %349 = vector.load %arg17[%c16_216, %c0_217] : memref<108x512xf32, #tpu.memory_space<vmem>>, vector<4x512xf32>
    tpu.vector_store %arg17[%c16_216, %c0_217], %348 {strides = array<i32>} : memref<108x512xf32, #tpu.memory_space<vmem>>, vector<4x512xf32>,
    %c252_i32 = arith.constant 252 : i32
    %350 = tpu.dynamic_rotate %8 by %c252_i32 dim 1 : vector<4x512xf32>, i32 -> vector<4x512xf32>
    %c59 = arith.constant 59 : index
    %c0_218 = arith.constant 0 : index
    %351 = vector.load %arg2[%c59, %c0_218] : memref<82x512xf32, #tpu.memory_space<vmem>>, vector<1x512xf32>
    %352 = vector.broadcast %351 : vector<1x512xf32> to vector<4x512xf32>
    %353 = arith.mulf %350, %352 : vector<4x512xf32>
    %c20_219 = arith.constant 20 : index
    %c0_220 = arith.constant 0 : index
    %354 = vector.load %arg17[%c20_219, %c0_220] : memref<108x512xf32, #tpu.memory_space<vmem>>, vector<4x512xf32>
    tpu.vector_store %arg17[%c20_219, %c0_220], %353 {strides = array<i32>} : memref<108x512xf32, #tpu.memory_space<vmem>>, vector<4x512xf32>,
    %c228_i32 = arith.constant 228 : i32
    %355 = tpu.dynamic_rotate %8 by %c228_i32 dim 1 : vector<4x512xf32>, i32 -> vector<4x512xf32>
    %c60_221 = arith.constant 60 : index
    %c0_222 = arith.constant 0 : index
    %356 = vector.load %arg2[%c60_221, %c0_222] : memref<82x512xf32, #tpu.memory_space<vmem>>, vector<1x512xf32>
    %357 = vector.broadcast %356 : vector<1x512xf32> to vector<4x512xf32>
    %358 = arith.mulf %355, %357 : vector<4x512xf32>
    %c24_223 = arith.constant 24 : index
    %c0_224 = arith.constant 0 : index
    %359 = vector.load %arg17[%c24_223, %c0_224] : memref<108x512xf32, #tpu.memory_space<vmem>>, vector<4x512xf32>
    tpu.vector_store %arg17[%c24_223, %c0_224], %358 {strides = array<i32>} : memref<108x512xf32, #tpu.memory_space<vmem>>, vector<4x512xf32>,
    %c224_i32 = arith.constant 224 : i32
    %360 = tpu.dynamic_rotate %8 by %c224_i32 dim 1 : vector<4x512xf32>, i32 -> vector<4x512xf32>
    %c61 = arith.constant 61 : index
    %c0_225 = arith.constant 0 : index
    %361 = vector.load %arg2[%c61, %c0_225] : memref<82x512xf32, #tpu.memory_space<vmem>>, vector<1x512xf32>
    %362 = vector.broadcast %361 : vector<1x512xf32> to vector<4x512xf32>
    %363 = arith.mulf %360, %362 : vector<4x512xf32>
    %c28_226 = arith.constant 28 : index
    %c0_227 = arith.constant 0 : index
    %364 = vector.load %arg17[%c28_226, %c0_227] : memref<108x512xf32, #tpu.memory_space<vmem>>, vector<4x512xf32>
    tpu.vector_store %arg17[%c28_226, %c0_227], %363 {strides = array<i32>} : memref<108x512xf32, #tpu.memory_space<vmem>>, vector<4x512xf32>,
    %365 = vector.extract_strided_slice %324 {offsets = [0, 0], sizes = [4, 32], strides = [1, 1]} : vector<4x108xf32> to vector<4x32xf32>
    %c0_228 = arith.constant 0 : index
    %c0_229 = arith.constant 0 : index
    %366 = vector.load %arg17[%c0_228, %c0_229] : memref<108x512xf32, #tpu.memory_space<vmem>>, vector<32x512xf32>
    %cst_230 = arith.constant dense<0.000000e+00> : vector<4x512xf32>
    %367 = tpu.matmul %365, %366, %cst_230 {dimension_numbers = #tpu.dot_dimension_numbers<[1], [0], [0], [1], [0, 0, 1, 1], [], []>} : vector<4x32xf32>, vector<32x512xf32>, vector<4x512xf32> -> vector<4x512xf32>
    %c220_i32 = arith.constant 220 : i32
    %368 = tpu.dynamic_rotate %8 by %c220_i32 dim 1 : vector<4x512xf32>, i32 -> vector<4x512xf32>
    %c62 = arith.constant 62 : index
    %c0_231 = arith.constant 0 : index
    %369 = vector.load %arg2[%c62, %c0_231] : memref<82x512xf32, #tpu.memory_space<vmem>>, vector<1x512xf32>
    %370 = vector.broadcast %369 : vector<1x512xf32> to vector<4x512xf32>
    %371 = arith.mulf %368, %370 : vector<4x512xf32>
    %c32_232 = arith.constant 32 : index
    %c0_233 = arith.constant 0 : index
    %372 = vector.load %arg17[%c32_232, %c0_233] : memref<108x512xf32, #tpu.memory_space<vmem>>, vector<4x512xf32>
    tpu.vector_store %arg17[%c32_232, %c0_233], %371 {strides = array<i32>} : memref<108x512xf32, #tpu.memory_space<vmem>>, vector<4x512xf32>,
    %c36_i32 = arith.constant 36 : i32
    %373 = tpu.dynamic_rotate %8 by %c36_i32 dim 1 : vector<4x512xf32>, i32 -> vector<4x512xf32>
    %c63 = arith.constant 63 : index
    %c0_234 = arith.constant 0 : index
    %374 = vector.load %arg2[%c63, %c0_234] : memref<82x512xf32, #tpu.memory_space<vmem>>, vector<1x512xf32>
    %375 = vector.broadcast %374 : vector<1x512xf32> to vector<4x512xf32>
    %376 = arith.mulf %373, %375 : vector<4x512xf32>
    %c36_235 = arith.constant 36 : index
    %c0_236 = arith.constant 0 : index
    %377 = vector.load %arg17[%c36_235, %c0_236] : memref<108x512xf32, #tpu.memory_space<vmem>>, vector<4x512xf32>
    tpu.vector_store %arg17[%c36_235, %c0_236], %376 {strides = array<i32>} : memref<108x512xf32, #tpu.memory_space<vmem>>, vector<4x512xf32>,
    %c32_i32 = arith.constant 32 : i32
    %378 = tpu.dynamic_rotate %8 by %c32_i32 dim 1 : vector<4x512xf32>, i32 -> vector<4x512xf32>
    %c64_237 = arith.constant 64 : index
    %c0_238 = arith.constant 0 : index
    %379 = vector.load %arg2[%c64_237, %c0_238] : memref<82x512xf32, #tpu.memory_space<vmem>>, vector<1x512xf32>
    %380 = vector.broadcast %379 : vector<1x512xf32> to vector<4x512xf32>
    %381 = arith.mulf %378, %380 : vector<4x512xf32>
    %c40_239 = arith.constant 40 : index
    %c0_240 = arith.constant 0 : index
    %382 = vector.load %arg17[%c40_239, %c0_240] : memref<108x512xf32, #tpu.memory_space<vmem>>, vector<4x512xf32>
    tpu.vector_store %arg17[%c40_239, %c0_240], %381 {strides = array<i32>} : memref<108x512xf32, #tpu.memory_space<vmem>>, vector<4x512xf32>,
    %c28_i32 = arith.constant 28 : i32
    %383 = tpu.dynamic_rotate %8 by %c28_i32 dim 1 : vector<4x512xf32>, i32 -> vector<4x512xf32>
    %c65 = arith.constant 65 : index
    %c0_241 = arith.constant 0 : index
    %384 = vector.load %arg2[%c65, %c0_241] : memref<82x512xf32, #tpu.memory_space<vmem>>, vector<1x512xf32>
    %385 = vector.broadcast %384 : vector<1x512xf32> to vector<4x512xf32>
    %386 = arith.mulf %383, %385 : vector<4x512xf32>
    %c44_242 = arith.constant 44 : index
    %c0_243 = arith.constant 0 : index
    %387 = vector.load %arg17[%c44_242, %c0_243] : memref<108x512xf32, #tpu.memory_space<vmem>>, vector<4x512xf32>
    tpu.vector_store %arg17[%c44_242, %c0_243], %386 {strides = array<i32>} : memref<108x512xf32, #tpu.memory_space<vmem>>, vector<4x512xf32>,
    %c4_i32 = arith.constant 4 : i32
    %388 = tpu.dynamic_rotate %8 by %c4_i32 dim 1 : vector<4x512xf32>, i32 -> vector<4x512xf32>
    %c66 = arith.constant 66 : index
    %c0_244 = arith.constant 0 : index
    %389 = vector.load %arg2[%c66, %c0_244] : memref<82x512xf32, #tpu.memory_space<vmem>>, vector<1x512xf32>
    %390 = vector.broadcast %389 : vector<1x512xf32> to vector<4x512xf32>
    %391 = arith.mulf %388, %390 : vector<4x512xf32>
    %c48_245 = arith.constant 48 : index
    %c0_246 = arith.constant 0 : index
    %392 = vector.load %arg17[%c48_245, %c0_246] : memref<108x512xf32, #tpu.memory_space<vmem>>, vector<4x512xf32>
    tpu.vector_store %arg17[%c48_245, %c0_246], %391 {strides = array<i32>} : memref<108x512xf32, #tpu.memory_space<vmem>>, vector<4x512xf32>,
    %c52_247 = arith.constant 52 : index
    %c0_248 = arith.constant 0 : index
    %393 = vector.load %arg17[%c52_247, %c0_248] : memref<108x512xf32, #tpu.memory_space<vmem>>, vector<4x512xf32>
    tpu.vector_store %arg17[%c52_247, %c0_248], %8 {strides = array<i32>} : memref<108x512xf32, #tpu.memory_space<vmem>>, vector<4x512xf32>,
    %c508_i32 = arith.constant 508 : i32
    %394 = tpu.dynamic_rotate %8 by %c508_i32 dim 1 : vector<4x512xf32>, i32 -> vector<4x512xf32>
    %c68_249 = arith.constant 68 : index
    %c0_250 = arith.constant 0 : index
    %395 = vector.load %arg2[%c68_249, %c0_250] : memref<82x512xf32, #tpu.memory_space<vmem>>, vector<1x512xf32>
    %396 = vector.broadcast %395 : vector<1x512xf32> to vector<4x512xf32>
    %397 = arith.mulf %394, %396 : vector<4x512xf32>
    %c56_251 = arith.constant 56 : index
    %c0_252 = arith.constant 0 : index
    %398 = vector.load %arg17[%c56_251, %c0_252] : memref<108x512xf32, #tpu.memory_space<vmem>>, vector<4x512xf32>
    tpu.vector_store %arg17[%c56_251, %c0_252], %397 {strides = array<i32>} : memref<108x512xf32, #tpu.memory_space<vmem>>, vector<4x512xf32>,
    %c484_i32 = arith.constant 484 : i32
    %399 = tpu.dynamic_rotate %8 by %c484_i32 dim 1 : vector<4x512xf32>, i32 -> vector<4x512xf32>
    %c69 = arith.constant 69 : index
    %c0_253 = arith.constant 0 : index
    %400 = vector.load %arg2[%c69, %c0_253] : memref<82x512xf32, #tpu.memory_space<vmem>>, vector<1x512xf32>
    %401 = vector.broadcast %400 : vector<1x512xf32> to vector<4x512xf32>
    %402 = arith.mulf %399, %401 : vector<4x512xf32>
    %c60_254 = arith.constant 60 : index
    %c0_255 = arith.constant 0 : index
    %403 = vector.load %arg17[%c60_254, %c0_255] : memref<108x512xf32, #tpu.memory_space<vmem>>, vector<4x512xf32>
    tpu.vector_store %arg17[%c60_254, %c0_255], %402 {strides = array<i32>} : memref<108x512xf32, #tpu.memory_space<vmem>>, vector<4x512xf32>,
    %404 = vector.extract_strided_slice %324 {offsets = [0, 32], sizes = [4, 32], strides = [1, 1]} : vector<4x108xf32> to vector<4x32xf32>
    %c32_256 = arith.constant 32 : index
    %c0_257 = arith.constant 0 : index
    %405 = vector.load %arg17[%c32_256, %c0_257] : memref<108x512xf32, #tpu.memory_space<vmem>>, vector<32x512xf32>
    %cst_258 = arith.constant dense<0.000000e+00> : vector<4x512xf32>
    %406 = tpu.matmul %404, %405, %cst_258 {dimension_numbers = #tpu.dot_dimension_numbers<[1], [0], [0], [1], [0, 0, 1, 1], [], []>} : vector<4x32xf32>, vector<32x512xf32>, vector<4x512xf32> -> vector<4x512xf32>
    %407 = arith.addf %367, %406 : vector<4x512xf32>
    %c480_i32 = arith.constant 480 : i32
    %408 = tpu.dynamic_rotate %8 by %c480_i32 dim 1 : vector<4x512xf32>, i32 -> vector<4x512xf32>
    %c70 = arith.constant 70 : index
    %c0_259 = arith.constant 0 : index
    %409 = vector.load %arg2[%c70, %c0_259] : memref<82x512xf32, #tpu.memory_space<vmem>>, vector<1x512xf32>
    %410 = vector.broadcast %409 : vector<1x512xf32> to vector<4x512xf32>
    %411 = arith.mulf %408, %410 : vector<4x512xf32>
    %c64_260 = arith.constant 64 : index
    %c0_261 = arith.constant 0 : index
    %412 = vector.load %arg17[%c64_260, %c0_261] : memref<108x512xf32, #tpu.memory_space<vmem>>, vector<4x512xf32>
    tpu.vector_store %arg17[%c64_260, %c0_261], %411 {strides = array<i32>} : memref<108x512xf32, #tpu.memory_space<vmem>>, vector<4x512xf32>,
    %c476_i32 = arith.constant 476 : i32
    %413 = tpu.dynamic_rotate %8 by %c476_i32 dim 1 : vector<4x512xf32>, i32 -> vector<4x512xf32>
    %c71 = arith.constant 71 : index
    %c0_262 = arith.constant 0 : index
    %414 = vector.load %arg2[%c71, %c0_262] : memref<82x512xf32, #tpu.memory_space<vmem>>, vector<1x512xf32>
    %415 = vector.broadcast %414 : vector<1x512xf32> to vector<4x512xf32>
    %416 = arith.mulf %413, %415 : vector<4x512xf32>
    %c68_263 = arith.constant 68 : index
    %c0_264 = arith.constant 0 : index
    %417 = vector.load %arg17[%c68_263, %c0_264] : memref<108x512xf32, #tpu.memory_space<vmem>>, vector<4x512xf32>
    tpu.vector_store %arg17[%c68_263, %c0_264], %416 {strides = array<i32>} : memref<108x512xf32, #tpu.memory_space<vmem>>, vector<4x512xf32>,
    %c292_i32_265 = arith.constant 292 : i32
    %418 = tpu.dynamic_rotate %8 by %c292_i32_265 dim 1 : vector<4x512xf32>, i32 -> vector<4x512xf32>
    %c72_266 = arith.constant 72 : index
    %c0_267 = arith.constant 0 : index
    %419 = vector.load %arg2[%c72_266, %c0_267] : memref<82x512xf32, #tpu.memory_space<vmem>>, vector<1x512xf32>
    %420 = vector.broadcast %419 : vector<1x512xf32> to vector<4x512xf32>
    %421 = arith.mulf %418, %420 : vector<4x512xf32>
    %c72_268 = arith.constant 72 : index
    %c0_269 = arith.constant 0 : index
    %422 = vector.load %arg17[%c72_268, %c0_269] : memref<108x512xf32, #tpu.memory_space<vmem>>, vector<4x512xf32>
    tpu.vector_store %arg17[%c72_268, %c0_269], %421 {strides = array<i32>} : memref<108x512xf32, #tpu.memory_space<vmem>>, vector<4x512xf32>,
    %c288_i32_270 = arith.constant 288 : i32
    %423 = tpu.dynamic_rotate %8 by %c288_i32_270 dim 1 : vector<4x512xf32>, i32 -> vector<4x512xf32>
    %c73 = arith.constant 73 : index
    %c0_271 = arith.constant 0 : index
    %424 = vector.load %arg2[%c73, %c0_271] : memref<82x512xf32, #tpu.memory_space<vmem>>, vector<1x512xf32>
    %425 = vector.broadcast %424 : vector<1x512xf32> to vector<4x512xf32>
    %426 = arith.mulf %423, %425 : vector<4x512xf32>
    %c76_272 = arith.constant 76 : index
    %c0_273 = arith.constant 0 : index
    %427 = vector.load %arg17[%c76_272, %c0_273] : memref<108x512xf32, #tpu.memory_space<vmem>>, vector<4x512xf32>
    tpu.vector_store %arg17[%c76_272, %c0_273], %426 {strides = array<i32>} : memref<108x512xf32, #tpu.memory_space<vmem>>, vector<4x512xf32>,
    %c284_i32_274 = arith.constant 284 : i32
    %428 = tpu.dynamic_rotate %8 by %c284_i32_274 dim 1 : vector<4x512xf32>, i32 -> vector<4x512xf32>
    %c74 = arith.constant 74 : index
    %c0_275 = arith.constant 0 : index
    %429 = vector.load %arg2[%c74, %c0_275] : memref<82x512xf32, #tpu.memory_space<vmem>>, vector<1x512xf32>
    %430 = vector.broadcast %429 : vector<1x512xf32> to vector<4x512xf32>
    %431 = arith.mulf %428, %430 : vector<4x512xf32>
    %c80_276 = arith.constant 80 : index
    %c0_277 = arith.constant 0 : index
    %432 = vector.load %arg17[%c80_276, %c0_277] : memref<108x512xf32, #tpu.memory_space<vmem>>, vector<4x512xf32>
    tpu.vector_store %arg17[%c80_276, %c0_277], %431 {strides = array<i32>} : memref<108x512xf32, #tpu.memory_space<vmem>>, vector<4x512xf32>,
    %c260_i32_278 = arith.constant 260 : i32
    %433 = tpu.dynamic_rotate %8 by %c260_i32_278 dim 1 : vector<4x512xf32>, i32 -> vector<4x512xf32>
    %c75 = arith.constant 75 : index
    %c0_279 = arith.constant 0 : index
    %434 = vector.load %arg2[%c75, %c0_279] : memref<82x512xf32, #tpu.memory_space<vmem>>, vector<1x512xf32>
    %435 = vector.broadcast %434 : vector<1x512xf32> to vector<4x512xf32>
    %436 = arith.mulf %433, %435 : vector<4x512xf32>
    %c84_280 = arith.constant 84 : index
    %c0_281 = arith.constant 0 : index
    %437 = vector.load %arg17[%c84_280, %c0_281] : memref<108x512xf32, #tpu.memory_space<vmem>>, vector<4x512xf32>
    tpu.vector_store %arg17[%c84_280, %c0_281], %436 {strides = array<i32>} : memref<108x512xf32, #tpu.memory_space<vmem>>, vector<4x512xf32>,
    %c256_i32_282 = arith.constant 256 : i32
    %438 = tpu.dynamic_rotate %8 by %c256_i32_282 dim 1 : vector<4x512xf32>, i32 -> vector<4x512xf32>
    %c76_283 = arith.constant 76 : index
    %c0_284 = arith.constant 0 : index
    %439 = vector.load %arg2[%c76_283, %c0_284] : memref<82x512xf32, #tpu.memory_space<vmem>>, vector<1x512xf32>
    %440 = vector.broadcast %439 : vector<1x512xf32> to vector<4x512xf32>
    %441 = arith.mulf %438, %440 : vector<4x512xf32>
    %c88_285 = arith.constant 88 : index
    %c0_286 = arith.constant 0 : index
    %442 = vector.load %arg17[%c88_285, %c0_286] : memref<108x512xf32, #tpu.memory_space<vmem>>, vector<4x512xf32>
    tpu.vector_store %arg17[%c88_285, %c0_286], %441 {strides = array<i32>} : memref<108x512xf32, #tpu.memory_space<vmem>>, vector<4x512xf32>,
    %c252_i32_287 = arith.constant 252 : i32
    %443 = tpu.dynamic_rotate %8 by %c252_i32_287 dim 1 : vector<4x512xf32>, i32 -> vector<4x512xf32>
    %c77 = arith.constant 77 : index
    %c0_288 = arith.constant 0 : index
    %444 = vector.load %arg2[%c77, %c0_288] : memref<82x512xf32, #tpu.memory_space<vmem>>, vector<1x512xf32>
    %445 = vector.broadcast %444 : vector<1x512xf32> to vector<4x512xf32>
    %446 = arith.mulf %443, %445 : vector<4x512xf32>
    %c92_289 = arith.constant 92 : index
    %c0_290 = arith.constant 0 : index
    %447 = vector.load %arg17[%c92_289, %c0_290] : memref<108x512xf32, #tpu.memory_space<vmem>>, vector<4x512xf32>
    tpu.vector_store %arg17[%c92_289, %c0_290], %446 {strides = array<i32>} : memref<108x512xf32, #tpu.memory_space<vmem>>, vector<4x512xf32>,
    %448 = vector.extract_strided_slice %324 {offsets = [0, 64], sizes = [4, 32], strides = [1, 1]} : vector<4x108xf32> to vector<4x32xf32>
    %c64_291 = arith.constant 64 : index
    %c0_292 = arith.constant 0 : index
    %449 = vector.load %arg17[%c64_291, %c0_292] : memref<108x512xf32, #tpu.memory_space<vmem>>, vector<32x512xf32>
    %cst_293 = arith.constant dense<0.000000e+00> : vector<4x512xf32>
    %450 = tpu.matmul %448, %449, %cst_293 {dimension_numbers = #tpu.dot_dimension_numbers<[1], [0], [0], [1], [0, 0, 1, 1], [], []>} : vector<4x32xf32>, vector<32x512xf32>, vector<4x512xf32> -> vector<4x512xf32>
    %451 = arith.addf %407, %450 : vector<4x512xf32>
    %c228_i32_294 = arith.constant 228 : i32
    %452 = tpu.dynamic_rotate %8 by %c228_i32_294 dim 1 : vector<4x512xf32>, i32 -> vector<4x512xf32>
    %c78 = arith.constant 78 : index
    %c0_295 = arith.constant 0 : index
    %453 = vector.load %arg2[%c78, %c0_295] : memref<82x512xf32, #tpu.memory_space<vmem>>, vector<1x512xf32>
    %454 = vector.broadcast %453 : vector<1x512xf32> to vector<4x512xf32>
    %455 = arith.mulf %452, %454 : vector<4x512xf32>
    %c96_296 = arith.constant 96 : index
    %c0_297 = arith.constant 0 : index
    %456 = vector.load %arg17[%c96_296, %c0_297] : memref<108x512xf32, #tpu.memory_space<vmem>>, vector<4x512xf32>
    tpu.vector_store %arg17[%c96_296, %c0_297], %455 {strides = array<i32>} : memref<108x512xf32, #tpu.memory_space<vmem>>, vector<4x512xf32>,
    %c224_i32_298 = arith.constant 224 : i32
    %457 = tpu.dynamic_rotate %8 by %c224_i32_298 dim 1 : vector<4x512xf32>, i32 -> vector<4x512xf32>
    %c79 = arith.constant 79 : index
    %c0_299 = arith.constant 0 : index
    %458 = vector.load %arg2[%c79, %c0_299] : memref<82x512xf32, #tpu.memory_space<vmem>>, vector<1x512xf32>
    %459 = vector.broadcast %458 : vector<1x512xf32> to vector<4x512xf32>
    %460 = arith.mulf %457, %459 : vector<4x512xf32>
    %c100_300 = arith.constant 100 : index
    %c0_301 = arith.constant 0 : index
    %461 = vector.load %arg17[%c100_300, %c0_301] : memref<108x512xf32, #tpu.memory_space<vmem>>, vector<4x512xf32>
    tpu.vector_store %arg17[%c100_300, %c0_301], %460 {strides = array<i32>} : memref<108x512xf32, #tpu.memory_space<vmem>>, vector<4x512xf32>,
    %c220_i32_302 = arith.constant 220 : i32
    %462 = tpu.dynamic_rotate %8 by %c220_i32_302 dim 1 : vector<4x512xf32>, i32 -> vector<4x512xf32>
    %c80_303 = arith.constant 80 : index
    %c0_304 = arith.constant 0 : index
    %463 = vector.load %arg2[%c80_303, %c0_304] : memref<82x512xf32, #tpu.memory_space<vmem>>, vector<1x512xf32>
    %464 = vector.broadcast %463 : vector<1x512xf32> to vector<4x512xf32>
    %465 = arith.mulf %462, %464 : vector<4x512xf32>
    %c104_305 = arith.constant 104 : index
    %c0_306 = arith.constant 0 : index
    %466 = vector.load %arg17[%c104_305, %c0_306] : memref<108x512xf32, #tpu.memory_space<vmem>>, vector<4x512xf32>
    tpu.vector_store %arg17[%c104_305, %c0_306], %465 {strides = array<i32>} : memref<108x512xf32, #tpu.memory_space<vmem>>, vector<4x512xf32>,
    %467 = vector.extract_strided_slice %324 {offsets = [0, 96], sizes = [4, 12], strides = [1, 1]} : vector<4x108xf32> to vector<4x12xf32>
    %c96_307 = arith.constant 96 : index
    %c0_308 = arith.constant 0 : index
    %468 = vector.load %arg17[%c96_307, %c0_308] : memref<108x512xf32, #tpu.memory_space<vmem>>, vector<12x512xf32>
    %cst_309 = arith.constant dense<0.000000e+00> : vector<4x512xf32>
    %469 = tpu.matmul %467, %468, %cst_309 {dimension_numbers = #tpu.dot_dimension_numbers<[1], [0], [0], [1], [0, 0, 1, 1], [], []>} : vector<4x12xf32>, vector<12x512xf32>, vector<4x512xf32> -> vector<4x512xf32>
    %470 = arith.addf %451, %469 : vector<4x512xf32>
    %471 = vector.broadcast %323 : vector<4x1xf32> to vector<4x512xf32>
    %472 = arith.addf %470, %471 : vector<4x512xf32>
    %c3_310 = arith.constant 3 : index
    %c0_311 = arith.constant 0 : index
    %c0_312 = arith.constant 0 : index
    %473 = vector.load %arg9[%c3_310, %c0_311, %c0_312] : memref<4x4x1xf32, #tpu.memory_space<vmem>>, vector<1x4x1xf32>
    %474 = vector.shape_cast %473 : vector<1x4x1xf32> to vector<4x1xf32>
    %c0_313 = arith.constant 0 : index
    %c0_314 = arith.constant 0 : index
    %475 = vector.load %arg8[%c0_313, %c0_314] : memref<4x4xf32, #tpu.memory_space<vmem>>, vector<4x4xf32>
    %c0_315 = arith.constant 0 : index
    %c0_316 = arith.constant 0 : index
    %476 = vector.load %arg17[%c0_315, %c0_316] : memref<108x512xf32, #tpu.memory_space<vmem>>, vector<4x512xf32>
    tpu.vector_store %arg17[%c0_315, %c0_316], %311 {strides = array<i32>} : memref<108x512xf32, #tpu.memory_space<vmem>>, vector<4x512xf32>,
    %c0_317 = arith.constant 0 : index
    %c0_318 = arith.constant 0 : index
    %477 = vector.load %arg17[%c0_317, %c0_318] : memref<108x512xf32, #tpu.memory_space<vmem>>, vector<4x512xf32>
    %cst_319 = arith.constant dense<0.000000e+00> : vector<4x512xf32>
    %478 = tpu.matmul %475, %477, %cst_319 {dimension_numbers = #tpu.dot_dimension_numbers<[1], [0], [0], [1], [0, 0, 1, 1], [], []>} : vector<4x4xf32>, vector<4x512xf32>, vector<4x512xf32> -> vector<4x512xf32>
    %479 = vector.broadcast %474 : vector<4x1xf32> to vector<4x512xf32>
    %480 = arith.addf %478, %479 : vector<4x512xf32>
    %481 = arith.addf %480, %9 : vector<4x512xf32>
    %c0_320 = arith.constant 0 : index
    %c0_321 = arith.constant 0 : index
    %482 = vector.load %arg10[%c0_320, %c0_321] : memref<8x4xf32, #tpu.memory_space<vmem>>, vector<8x4xf32>
    %cst_322 = arith.constant dense<0.000000e+00> : vector<8x512xf32>
    %483 = tpu.matmul %482, %472, %cst_322 {dimension_numbers = #tpu.dot_dimension_numbers<[1], [0], [0], [1], [0, 0, 1, 1], [], []>} : vector<8x4xf32>, vector<4x512xf32>, vector<8x512xf32> -> vector<8x512xf32>
    %c0_323 = arith.constant 0 : index
    %c0_324 = arith.constant 0 : index
    %484 = vector.load %arg11[%c0_323, %c0_324] : memref<8x4xf32, #tpu.memory_space<vmem>>, vector<8x4xf32>
    %cst_325 = arith.constant dense<0.000000e+00> : vector<8x512xf32>
    %485 = tpu.matmul %484, %481, %cst_325 {dimension_numbers = #tpu.dot_dimension_numbers<[1], [0], [0], [1], [0, 0, 1, 1], [], []>} : vector<8x4xf32>, vector<4x512xf32>, vector<8x512xf32> -> vector<8x512xf32>
    %486 = arith.addf %483, %485 : vector<8x512xf32>
    %c0_326 = arith.constant 0 : index
    %c0_327 = arith.constant 0 : index
    %487 = vector.load %arg12[%c0_326, %c0_327] : memref<8x1xf32, #tpu.memory_space<vmem>>, vector<8x1xf32>
    %488 = vector.broadcast %487 : vector<8x1xf32> to vector<8x512xf32>
    %489 = arith.addf %486, %488 : vector<8x512xf32>
    %cst_328 = arith.constant 0.000000e+00 : f32
    %490 = vector.broadcast %cst_328 : f32 to vector<8x512xf32>
    %491 = arith.maximumf %489, %490 : vector<8x512xf32>
    %c0_329 = arith.constant 0 : index
    %c0_330 = arith.constant 0 : index
    %492 = vector.load %arg13[%c0_329, %c0_330] : memref<16x8xf32, #tpu.memory_space<vmem>>, vector<16x8xf32>
    %cst_331 = arith.constant dense<0.000000e+00> : vector<16x512xf32>
    %493 = tpu.matmul %492, %321, %cst_331 {dimension_numbers = #tpu.dot_dimension_numbers<[1], [0], [0], [1], [0, 0, 1, 1], [], []>} : vector<16x8xf32>, vector<8x512xf32>, vector<16x512xf32> -> vector<16x512xf32>
    %c0_332 = arith.constant 0 : index
    %c0_333 = arith.constant 0 : index
    %494 = vector.load %arg14[%c0_332, %c0_333] : memref<16x8xf32, #tpu.memory_space<vmem>>, vector<16x8xf32>
    %cst_334 = arith.constant dense<0.000000e+00> : vector<16x512xf32>
    %495 = tpu.matmul %494, %491, %cst_334 {dimension_numbers = #tpu.dot_dimension_numbers<[1], [0], [0], [1], [0, 0, 1, 1], [], []>} : vector<16x8xf32>, vector<8x512xf32>, vector<16x512xf32> -> vector<16x512xf32>
    %496 = arith.addf %493, %495 : vector<16x512xf32>
    %c0_335 = arith.constant 0 : index
    %c0_336 = arith.constant 0 : index
    %497 = vector.load %arg15[%c0_335, %c0_336] : memref<16x1xf32, #tpu.memory_space<vmem>>, vector<16x1xf32>
    %498 = vector.broadcast %497 : vector<16x1xf32> to vector<16x512xf32>
    %499 = arith.addf %496, %498 : vector<16x512xf32>
    %cst_337 = arith.constant 0.000000e+00 : f32
    %500 = vector.broadcast %cst_337 : f32 to vector<16x512xf32>
    %501 = arith.maximumf %499, %500 : vector<16x512xf32>
    %c0_338 = arith.constant 0 : index
    %c0_339 = arith.constant 0 : index
    %c0_340 = arith.constant 0 : index
    %502 = vector.load %arg16[%c0_338, %c0_339, %c0_340] : memref<1x16x512xf32, #tpu.memory_space<vmem>>, vector<1x16x512xf32>
    %503 = vector.shape_cast %502 : vector<1x16x512xf32> to vector<16x512xf32>
    %504 = vector.shape_cast %501 : vector<16x512xf32> to vector<1x16x512xf32>
    tpu.vector_store %arg16[%c0_338, %c0_339, %c0_340], %504 {strides = array<i32>} : memref<1x16x512xf32, #tpu.memory_space<vmem>>, vector<1x16x512xf32>,
    return
  }
  func.func @transform_0(%arg0: i32) -> (i32, i32, i32) {
    %c0_i32 = arith.constant 0 : i32
    %c0_i32_0 = arith.constant 0 : i32
    %c0_i32_1 = arith.constant 0 : i32
    return %arg0, %c0_i32, %c0_i32_0 : i32, i32, i32
  }
  func.func @transform_1(%arg0: i32) -> (i32, i32) {
    %c0_i32 = arith.constant 0 : i32
    %c0_i32_0 = arith.constant 0 : i32
    %c0_i32_1 = arith.constant 0 : i32
    return %c0_i32, %c0_i32_0 : i32, i32
  }
  func.func @transform_2(%arg0: i32) -> (i32, i32) {
    %c0_i32 = arith.constant 0 : i32
    %c0_i32_0 = arith.constant 0 : i32
    %c0_i32_1 = arith.constant 0 : i32
    return %c0_i32, %c0_i32_0 : i32, i32
  }
  func.func @transform_3(%arg0: i32) -> (i32, i32) {
    %c0_i32 = arith.constant 0 : i32
    %c0_i32_0 = arith.constant 0 : i32
    %c0_i32_1 = arith.constant 0 : i32
    return %c0_i32, %c0_i32_0 : i32, i32
  }
  func.func @transform_4(%arg0: i32) -> (i32, i32) {
    %c0_i32 = arith.constant 0 : i32
    %c0_i32_0 = arith.constant 0 : i32
    %c0_i32_1 = arith.constant 0 : i32
    return %c0_i32, %c0_i32_0 : i32, i32
  }
  func.func @transform_5(%arg0: i32) -> (i32, i32) {
    %c0_i32 = arith.constant 0 : i32
    %c0_i32_0 = arith.constant 0 : i32
    %c0_i32_1 = arith.constant 0 : i32
    return %c0_i32, %c0_i32_0 : i32, i32
  }
  func.func @transform_6(%arg0: i32) -> (i32, i32) {
    %c0_i32 = arith.constant 0 : i32
    %c0_i32_0 = arith.constant 0 : i32
    %c0_i32_1 = arith.constant 0 : i32
    return %c0_i32, %c0_i32_0 : i32, i32
  }
  func.func @transform_7(%arg0: i32) -> (i32, i32) {
    %c0_i32 = arith.constant 0 : i32
    %c0_i32_0 = arith.constant 0 : i32
    %c0_i32_1 = arith.constant 0 : i32
    return %c0_i32, %c0_i32_0 : i32, i32
  }
  func.func @transform_8(%arg0: i32) -> (i32, i32, i32) {
    %c0_i32 = arith.constant 0 : i32
    %c0_i32_0 = arith.constant 0 : i32
    %c0_i32_1 = arith.constant 0 : i32
    %c0_i32_2 = arith.constant 0 : i32
    return %c0_i32, %c0_i32_0, %c0_i32_1 : i32, i32, i32
  }
  func.func @transform_9(%arg0: i32) -> (i32, i32) {
    %c0_i32 = arith.constant 0 : i32
    %c0_i32_0 = arith.constant 0 : i32
    %c0_i32_1 = arith.constant 0 : i32
    return %c0_i32, %c0_i32_0 : i32, i32
  }
  func.func @transform_10(%arg0: i32) -> (i32, i32) {
    %c0_i32 = arith.constant 0 : i32
    %c0_i32_0 = arith.constant 0 : i32
    %c0_i32_1 = arith.constant 0 : i32
    return %c0_i32, %c0_i32_0 : i32, i32
  }
  func.func @transform_11(%arg0: i32) -> (i32, i32) {
    %c0_i32 = arith.constant 0 : i32
    %c0_i32_0 = arith.constant 0 : i32
    %c0_i32_1 = arith.constant 0 : i32
    return %c0_i32, %c0_i32_0 : i32, i32
  }
  func.func @transform_12(%arg0: i32) -> (i32, i32) {
    %c0_i32 = arith.constant 0 : i32
    %c0_i32_0 = arith.constant 0 : i32
    %c0_i32_1 = arith.constant 0 : i32
    return %c0_i32, %c0_i32_0 : i32, i32
  }
  func.func @transform_13(%arg0: i32) -> (i32, i32) {
    %c0_i32 = arith.constant 0 : i32
    %c0_i32_0 = arith.constant 0 : i32
    %c0_i32_1 = arith.constant 0 : i32
    return %c0_i32, %c0_i32_0 : i32, i32
  }
  func.func @transform_14(%arg0: i32) -> (i32, i32) {
    %c0_i32 = arith.constant 0 : i32
    %c0_i32_0 = arith.constant 0 : i32
    %c0_i32_1 = arith.constant 0 : i32
    return %c0_i32, %c0_i32_0 : i32, i32
  }
  func.func @transform_15(%arg0: i32) -> (i32, i32, i32) {
    %c0_i32 = arith.constant 0 : i32
    %c0_i32_0 = arith.constant 0 : i32
    %c0_i32_1 = arith.constant 0 : i32
    return %arg0, %c0_i32, %c0_i32_0 : i32, i32, i32
  }
}

</mosaic_0001>

<bundles_post_ra>
// kernel: paspp_block.1
= control target key start
LH: loop header
LB: loop body
LE: loop exit
PB: predicated region body
PF: predicated region fallthrough
CT: control target
= control target key end

     0   :  { %s7577_s18 = smov 0   ;;  %s10836_s0 = inlined_call_operand.vmem [shape: f32[2,16,512], index: 0, kind: input, shape index: {}]   ;;  %s10837_s1 = inlined_call_operand.vmem [shape: f32[82,512], index: 1, kind: input, shape index: {}]   ;;  %s10838_s2 = inlined_call_operand.vmem [shape: f32[4,16], index: 2, kind: input, shape index: {}]   ;;  %s10839_s3 = inlined_call_operand.vmem [shape: f32[4,1], index: 3, kind: input, shape index: {}]   ;;  %s10840_s4 = inlined_call_operand.vmem [shape: f32[4,108], index: 4, kind: input, shape index: {}]   ;;  %s10841_s5 = inlined_call_operand.vmem [shape: f32[4,108], index: 5, kind: input, shape index: {}]   ;;  %s10842_s6 = inlined_call_operand.vmem [shape: f32[4,108], index: 6, kind: input, shape index: {}]   ;;  %s10843_s7 = inlined_call_operand.vmem [shape: f32[4,4], index: 7, kind: input, shape index: {}]   ;;  %s10844_s8 = inlined_call_operand.vmem [shape: f32[4,4,1], index: 8, kind: input, shape index: {}]   ;;  %s10845_s9 = inlined_call_operand.vmem [shape: f32[8,4], index: 9, kind: input, shape index: {}]   ;;  %s10846_s10 = inlined_call_operand.vmem [shape: f32[8,4], index: 10, kind: input, shape index: {}]   ;;  %s10847_s11 = inlined_call_operand.vmem [shape: f32[8,1], index: 11, kind: input, shape index: {}]   ;;  %s10848_s12 = inlined_call_operand.vmem [shape: f32[16,8], index: 12, kind: input, shape index: {}]   ;;  %s10849_s13 = inlined_call_operand.vmem [shape: f32[16,8], index: 13, kind: input, shape index: {}]   ;;  %s10850_s14 = inlined_call_operand.vmem [shape: f32[16,1], index: 14, kind: input, shape index: {}]   ;;  %s10851_s15 = inlined_call_operand.vmem [shape: f32[2,16,512], index: 15, kind: output, shape index: {}]  }
   0x1 LB: > { %s7237_s19 = sadd.s32 4294967295, %s7460_s18   ;;  %p7241_p0 = scmp.ge.s32.totalorder %s7460_s18, 1  ;;  %s7460_s18 = sphi %s7577_s18, %s25_s18  }
   0x2   : > { %p437_p1 = scmp.lt.s32.totalorder %s7460_s18, 3 }
   0x4   : > { %p438_p2 = pnand %p7241_p0, %p437_p1 }
   0x6   : > { %441 = sbr.rel (%p438_p2) target bundleno = 1505 (0x5e1), region = 80 }
   0xb   : > { %p485_p3 = scmp.lt.s32.totalorder %s7237_s19, 1  ;;  %v10869_v0 = vmov 0.0   ;;  %v504_v1 = vld [vmem:[%s10839_s3] sm:$0xf]  ;;  %v7463_v2 = vmov 0   ;;  %vm510_vm0 = vcmask 130048   ;;  %v10871_v45 = vlaneseq }
   0xc   : > { %578 = vmatprep.mubr.f32.mxu0 %v10869_v0  ;;  %649 = vmatprep.mubr.f32.mxu1 %v10869_v0  ;;  %v503_v11 = vld [vmem:[%s10838_s2] sm:$0xf]  ;;  %s10853_s30 = smov 96   ;;  %s7465_s16 = smov 121   ;;  %vm1462_vm13 = vcmask 261120  }
   0xd   : > { %s11335_s19 = smov (!%p485_p3, %s7237_s19), 1  ;;  %7449 = vset.pattern.permute.xlu0 %v7463_v2  ;;  %7450 = vset.pattern.permute.xlu1 %v7463_v2  ;;  %v7606_v12 = vld [vmem:[%s10840_s4] sm:$0xf]  ;;  %s7466_s17 = smov 127   ;;  %v684_v48 = vshrl.u32 %v10871_v45, 7 }
   0xe   : > { %507 = vperm.xlu0 %7449, %v504_v1   ;;  %s10852_s22 = sshll.u32 %s11335_s19, 6  ;;  %1460 = vrot.lane.b32.xlu1 %v7606_v12, %s10853_s30  ;;  %s7467_s20 = smov 119   ;;  %v7290_v55 = vld [vmem:[%s10837_s1 + $0x67] ss:$8 sm:$0xf] }
   0xf   : > { %s489_s25 = scalar_lea.vmem %s10836_s0, %s10852_s22  ;;  %s7468_s21 = smov 7   ;;  %v7825_v51 = vsub.s32 1, %v684_v48  ;;  %v7831_v54 = vsub.s32 3, %v684_v48  ;;  %v7836_v56 = vsub.s32 0, %v684_v48  ;;  %v7845_v58 = vsub.s32 2, %v684_v48 }
  0x10   : > { %v500_v3 = vld [vmem:[%s489_s25 + $0x28] sm:$0xff]  ;;  %v502_v4 = vld [vmem:[%s489_s25 + $0x38] sm:$0xff]  ;;  %v499_v5 = vld [vmem:[%s489_s25 + $0x20] sm:$0xff]  ;;  %s10861_s23 = smov 120   ;;  %s7470_s24 = smov 1  }
  0x11   : > { %542 = vmatprep.subr.mxu0 %v500_v3  ;;  %613 = vmatprep.subr.mxu1 %v502_v4  ;;  %v501_v6 = vld [vmem:[%s489_s25 + $0x30] sm:$0xff]  ;;  %v496_v7 = vld [vmem:[%s489_s25 + $0x8] sm:$0xff]  ;;  %v498_v8 = vld [vmem:[%s489_s25 + $0x18] sm:$0xff]  ;;  %s7472_s26 = smov 9   ;;  %s10855_s27 = smov 126   ;;  %v2738_v60 = vrot.slane %v7290_v55, %v7825_v51  ;;  %v2742_v63 = vrot.slane %v7290_v55, %v7845_v58  ;;  %v2746_v2 = vrot.slane %v7290_v55, %v7831_v54 }
  0x12   : > { %543 = vmatpush1.msra.mxu0 %v499_v5  ;;  %614 = vmatpush1.msra.mxu1 %v501_v6  ;;  %v495_v9 = vld [vmem:[%s489_s25] sm:$0xff]  ;;  %v497_v10 = vld [vmem:[%s489_s25 + $0x10] sm:$0xff]  ;;  %s10857_s25 = smov 114   ;;  %s7474_s28 = smov 8   ;;  %v2734_v6 = vrot.slane %v7290_v55, %v7836_v56 }
  0x13   : > { %544 = vmatprep.subr.mxu0 %v496_v7  ;;  %615 = vmatprep.subr.mxu1 %v498_v8  ;;  %s10859_s29 = smov 14   ;;  %s7476_s22 = smov 56   ;;  %v7311_v57 = vld [vmem:[%s10837_s1 + $0xc1] ss:$8 sm:$0xf] }
  0x14   : > { %545 = vmatpush1.msra.mxu0 %v495_v9  ;;  %616 = vmatpush1.msra.mxu1 %v497_v10  ;;  %s10863_s30 = smov 2   ;;  %v7341_v59 = vld [vmem:[%s10837_s1 + $0xe2] ss:$8 sm:$0xf]  ;;  %v3740_v1 = vrot.slane %v7311_v57, %v7825_v51  ;;  %v3748_v3 = vrot.slane %v7311_v57, %v7831_v54  ;;  %v3736_v5 = vrot.slane %v7311_v57, %v7836_v56 }
  0x15   : > { %7246 = vmatmul.mubr.msk.f32.vlgmr.msra.gmra.mxu0 %vm510_vm0, %v503_v11  ;;  %7247 = vmatmul.mubr.msk.f32.vlgmr.msra.gmra.mxu1 %vm510_vm0, %v503_v11  ;;  %v7362_v4 = vld [vmem:[%s10837_s1 + $0x124] ss:$8 sm:$0xf]  ;;  %v3744_v7 = vrot.slane %v7311_v57, %v7845_v58  ;;  %v4794_v8 = vrot.slane %v7341_v59, %v7836_v56  ;;  %v4798_v9 = vrot.slane %v7341_v59, %v7825_v51  ;;  %v7896_v55 = vld [vmem:[%s10837_s1 + $0x27] ss:$8 sm:$0xf] }
  0x16   : > { %1600 = vmatprep.mubr.f32.mxu1 %v10869_v0  ;;  %1529 = vmatprep.mubr.f32.mxu0 %v10869_v0  ;;  %v4806_v10 = vrot.slane %v7341_v59, %v7831_v54  ;;  %v4802_v11 = vrot.slane %v7341_v59, %v7845_v58  ;;  %v7901_v57 = vld [vmem:[%s10837_s1 + $0x26] ss:$8 sm:$0xf] }
  0x80   : > { %v7746_v30 = vpop.permute.xlu1 %1460 }
  0x81   : > { %10955 = vst [vmem:[#allocation10_spill] sm:$0xff] %v7746_v30 }
  0x89   : > { %v508_v13 = vpop.permute.xlu0 %507 }
  0xd5   : > { %v580_v14 = vpop.f32.mrf.mxu0  ;;  %v651_v15 = vpop.f32.mrf.mxu1 }
  0xd6   : > { %v581_v16 = vadd.f32 %v580_v14, %v508_v13  ;;  %v652_v17 = vadd.f32 %v651_v15, %v508_v13  ;;  %v5808_v14 = vrot.slane %v7362_v4, %v7831_v54  ;;  %v5796_v15 = vrot.slane %v7362_v4, %v7836_v56 }
  0xd7   : > { %v582_v18 = vpop.f32.mrf.mxu0  ;;  %v653_v19 = vpop.f32.mrf.mxu1 }
  0xd8   : > { %v7610_v20 = vmax.f32 %v581_v16, 0.0  ;;  %v7612_v21 = vmax.f32 %v652_v17, 0.0  ;;  %v583_v22 = vadd.f32 %v582_v18, %v508_v13  ;;  %v654_v23 = vadd.f32 %v653_v19, %v508_v13 }
  0xd9   : > { %v5800_v13 = vrot.slane %v7362_v4, %v7825_v51  ;;  %v5804_v16 = vrot.slane %v7362_v4, %v7845_v58 }
  0xda   : > { %10948 = vst [vmem:[#allocation3_spill] sm:$0xff] %v7610_v20  ;;  %10949 = vst [vmem:[#allocation4_spill] sm:$0xff] %v7612_v21  ;;  %v7614_v24 = vmax.f32 %v583_v22, 0.0  ;;  %v7616_v25 = vmax.f32 %v654_v23, 0.0  ;;  %1391 = vrot.lane.b32.xlu1 %v7612_v21, %s7465_s16  ;;  %1387 = vrot.lane.b32.xlu0 %v7610_v20, %s7465_s16  ;;  %v7623_v26 = vrot.slane %v7612_v21, 4  ;;  %v7626_v27 = vrot.slane %v7610_v20, 4 }
  0xdb   : > { %v7882_v19 = vmul.f32 %v3740_v1, %v7612_v21  ;;  %v7885_v22 = vmul.f32 %v2738_v60, %v7610_v20  ;;  %v7888_v23 = vmul.f32 %v2746_v2, %v7612_v21  ;;  %v7891_v48 = vmul.f32 %v3748_v3, %v7610_v20 }
  0xdc   : > { %10950 = vst [vmem:[#allocation5_spill] sm:$0xff] %v7614_v24  ;;  %10951 = vst [vmem:[#allocation6_spill] sm:$0xff] %v7616_v25  ;;  %v7629_v28 = vrot.slane %v7616_v25, 4  ;;  %v7633_v29 = vrot.slane %v7614_v24, 4  ;;  %v7904_v59 = vmul.f32 %v2742_v63, %v7614_v24  ;;  %v7907_v60 = vmul.f32 %v3736_v5, %v7614_v24 }
  0xdd   : > { %10952 = vst [vmem:[#allocation7_spill] sm:$0xff] %v7623_v26  ;;  %10953 = vst [vmem:[#allocation8_spill] sm:$0xff] %v7626_v27  ;;  %v7910_v1 = vmul.f32 %v2734_v6, %v7616_v25  ;;  %v7913_v2 = vmul.f32 %v3744_v7, %v7616_v25  ;;  %v7922_v63 = vld [vmem:[%s10837_s1 + $0x23] ss:$8 sm:$0xf]  ;;  %v7925_v3 = vmul.f32 %v4798_v9, %v7616_v25 }
  0xde   : > { %10954 = vst [vmem:[#allocation9_spill] sm:$0xff] %v7629_v28  ;;  %1341 = vst [vmem:[#allocation2 + $0x190] sm:$0xf0] %v7623_v26  ;;  %1343 = vrot.lane.b32.xlu1 %v7610_v20, %s7466_s17  ;;  %1795 = vrot.lane.b32.xlu0 %v7610_v20, %s7467_s20  ;;  %v7928_v4 = vmul.f32 %v4806_v10, %v7614_v24  ;;  %v7931_v5 = vmul.f32 %v4794_v8, %v7612_v21  ;;  %v7989_v8 = vld [vmem:[%s10837_s1 + $0x22] ss:$8 sm:$0xf] }
  0xdf   : > { %1339 = vst [vmem:[#allocation2 + $0xe8] sm:$0xf0] %v7626_v27  ;;  %1342 = vst [vmem:[#allocation2 + $0xb8] sm:$0xf0] %v7629_v28  ;;  %v7934_v6 = vmul.f32 %v4802_v11, %v7610_v20  ;;  %v7937_v7 = vmul.f32 %v5800_v13, %v7616_v25  ;;  %v7940_v0 = vmul.f32 %v5808_v14, %v7614_v24 }
  0xe0   : > { %1340 = vst [vmem:[#allocation2 + $0xf8] sm:$0xf0] %v7633_v29  ;;  %10967 = vst [vmem:[#allocation18_spill] sm:$0xff] %v7882_v19  ;;  %v7943_v45 = vmul.f32 %v5796_v15, %v7612_v21  ;;  %v7958_v13 = vld [vmem:[%s10837_s1 + $0x24] ss:$8 sm:$0xf]  ;;  %v7961_v14 = vmul.f32 %v5804_v16, %v7610_v20 }
  0xe1   : > { %10968 = vst [vmem:[#allocation19_spill] sm:$0xff] %v7885_v22  ;;  %10969 = vst [vmem:[#allocation20_spill] sm:$0xff] %v7888_v23  ;;  %v8002_v11 = vld [vmem:[%s10837_s1 + $0x7] ss:$8 sm:$0xf] }
  0xe2   : > { %1347 = vrot.lane.b32.xlu1 %v7612_v21, %s7466_s17  ;;  %1799 = vrot.lane.b32.xlu0 %v7612_v21, %s7467_s20  ;;  %10970 = vst [vmem:[#allocation21_spill] sm:$0xff] %v7891_v48  ;;  %10971 = vst [vmem:[#allocation22_spill] sm:$0xff] %v7904_v59  ;;  %v8032_v10 = vld [vmem:[%s10837_s1 + $0x20] ss:$8 sm:$0xf] }
  0xe3   : > { %10972 = vst [vmem:[#allocation23_spill] sm:$0xff] %v7907_v60  ;;  %10973 = vst [vmem:[#allocation24_spill] sm:$0xff] %v7910_v1  ;;  %v8085_v1 = vld [vmem:[%s10837_s1 + $0x5] ss:$8 sm:$0xf]  ;;  %v10998_v60 = vrot.slane %v7896_v55, %v7831_v54 }
  0xe4   : > { %10974 = vst [vmem:[#allocation25_spill] sm:$0xff] %v7913_v2  ;;  %10976 = vst [vmem:[#allocation26_spill] sm:$0xff] %v7925_v3  ;;  %v8108_v19 = vld [vmem:[%s10837_s1 + $0x40] ss:$8 sm:$0xf] }
  0xe5   : > { %10977 = vst [vmem:[#allocation27_spill] sm:$0xff] %v7928_v4  ;;  %10978 = vst [vmem:[#allocation28_spill] sm:$0xff] %v7931_v5  ;;  %v8007_v5 = vld [vmem:[%s10837_s1 + $0x61] ss:$8 sm:$0xf] }
  0xe6   : > { %1227 = vrot.lane.b32.xlu1 %v7610_v20, %s7468_s21  ;;  %1751 = vrot.lane.b32.xlu0 %v7610_v20, %s10861_s23  ;;  %10979 = vst [vmem:[#allocation29_spill] sm:$0xff] %v7934_v6  ;;  %10980 = vst [vmem:[#allocation30_spill] sm:$0xff] %v7937_v7  ;;  %v8047_v7 = vld [vmem:[%s10837_s1 + $0x62] ss:$8 sm:$0xf] }
  0xe7   : > { %10981 = vst [vmem:[#allocation31_spill] sm:$0xff] %v7940_v0  ;;  %10982 = vst [vmem:[#allocation32_spill] sm:$0xff] %v7943_v45  ;;  %v7974_v0 = vld [vmem:[%s10837_s1 + $0x21] ss:$8 sm:$0xf] }
  0xe8   : > { %10984 = vst [vmem:[#allocation34_spill] sm:$0xff] %v7961_v14  ;;  %v8052_v45 = vld [vmem:[%s10837_s1 + $0x41] ss:$8 sm:$0xf]  ;;  %10989 = vst [vmem:[#allocation37_spill] sm:$0xff] %v8108_v19 }
  0xe9   : > { %v8090_v6 = vld [vmem:[%s10837_s1 + $0x47] ss:$8 sm:$0xf]  ;;  %v8138_v23 = vld [vmem:[%s10837_s1 + $0x60] ss:$8 sm:$0xf] }
  0xea   : > { %1231 = vrot.lane.b32.xlu1 %v7612_v21, %s7468_s21  ;;  %1755 = vrot.lane.b32.xlu0 %v7612_v21, %s10861_s23  ;;  %s10865_s23 = smov 16   ;;  %10992 = vst [vmem:[#allocation40_spill] sm:$0xff] %v8138_v23  ;;  %v8167_v22 = vld [vmem:[%s10837_s1 + $0xa2] ss:$8 sm:$0xf] }
  0xeb   : > { %10995 = vst [vmem:[#allocation42_spill] sm:$0xff] %v8167_v22 }
  0xee   : > { %1283 = vrot.lane.b32.xlu1 %v7610_v20, %s7470_s24  ;;  %2815 = vrot.lane.b32.xlu0 %v7610_v20, %s10857_s25 }
  0xf2   : > { %1287 = vrot.lane.b32.xlu1 %v7612_v21, %s7470_s24  ;;  %2819 = vrot.lane.b32.xlu0 %v7612_v21, %s10857_s25  ;;  %s10867_s25 = smov 18  }
  0xf6   : > { %1127 = vrot.lane.b32.xlu1 %v7610_v20, %s7472_s26  ;;  %2759 = vrot.lane.b32.xlu0 %v7610_v20, %s10855_s27 }
  0xfa   : > { %1131 = vrot.lane.b32.xlu1 %v7612_v21, %s7472_s26  ;;  %2763 = vrot.lane.b32.xlu0 %v7612_v21, %s10855_s27  ;;  %s7478_s27 = smov 55  }
  0xfe   : > { %1183 = vrot.lane.b32.xlu1 %v7610_v20, %s7474_s28  ;;  %2628 = vrot.lane.b32.xlu0 %v7610_v20, %s10859_s29 }
 0x102   : > { %1187 = vrot.lane.b32.xlu1 %v7612_v21, %s7474_s28  ;;  %2632 = vrot.lane.b32.xlu0 %v7612_v21, %s10859_s29  ;;  %s7480_s29 = smov 63  }
 0x106   : > { %1011 = vrot.lane.b32.xlu1 %v7610_v20, %s7476_s22  ;;  %2672 = vrot.lane.b32.xlu0 %v7610_v20, %s10863_s30 }
 0x10a   : > { %1015 = vrot.lane.b32.xlu1 %v7612_v21, %s7476_s22  ;;  %2676 = vrot.lane.b32.xlu0 %v7612_v21, %s10863_s30  ;;  %s7482_s30 = smov 57  }
 0x10e   : > { %1083 = vrot.lane.b32.xlu1 %v7610_v20, %s7478_s27  ;;  %2528 = vrot.lane.b32.xlu0 %v7610_v20, %s10867_s25 }
 0x112   : > { %1087 = vrot.lane.b32.xlu1 %v7612_v21, %s7478_s27  ;;  %2532 = vrot.lane.b32.xlu0 %v7612_v21, %s10867_s25  ;;  %s7484_s25 = smov 64  }
 0x116   : > { %911 = vrot.lane.b32.xlu1 %v7610_v20, %s7480_s29  ;;  %2572 = vrot.lane.b32.xlu0 %v7610_v20, %s10865_s23  ;;  %s7483_s23 = smov 65  }
 0x11a   : > { %915 = vrot.lane.b32.xlu1 %v7612_v21, %s7480_s29  ;;  %1393 = vrot.lane.b32.xlu0 %v7616_v25, %s7465_s16 }
 0x11e   : > { %967 = vrot.lane.b32.xlu1 %v7610_v20, %s7482_s30  ;;  %1345 = vrot.lane.b32.xlu0 %v7614_v24, %s7466_s17 }
 0x122   : > { %971 = vrot.lane.b32.xlu1 %v7612_v21, %s7482_s30  ;;  %1349 = vrot.lane.b32.xlu0 %v7616_v25, %s7466_s17  ;;  %s7485_s17 = smov 72  }
 0x126   : > { %811 = vrot.lane.b32.xlu1 %v7610_v20, %s7483_s23  ;;  %1229 = vrot.lane.b32.xlu0 %v7614_v24, %s7468_s21 }
 0x12a   : > { %815 = vrot.lane.b32.xlu1 %v7612_v21, %s7483_s23  ;;  %1233 = vrot.lane.b32.xlu0 %v7616_v25, %s7468_s21  ;;  %s7486_s21 = smov 71  }
 0x12e   : > { %867 = vrot.lane.b32.xlu1 %v7610_v20, %s7484_s25  ;;  %1285 = vrot.lane.b32.xlu0 %v7614_v24, %s7470_s24 }
 0x132   : > { %871 = vrot.lane.b32.xlu1 %v7612_v21, %s7484_s25  ;;  %1289 = vrot.lane.b32.xlu0 %v7616_v25, %s7470_s24  ;;  %s7487_s24 = smov 73  }
 0x136   : > { %711 = vrot.lane.b32.xlu1 %v7610_v20, %s7485_s17  ;;  %1129 = vrot.lane.b32.xlu0 %v7614_v24, %s7472_s26 }
 0x13a   : > { %715 = vrot.lane.b32.xlu1 %v7612_v21, %s7485_s17  ;;  %1133 = vrot.lane.b32.xlu0 %v7616_v25, %s7472_s26  ;;  %s11333_s26 = sshll.u32 %s11335_s19, 6 }
 0x13e   : > { %767 = vrot.lane.b32.xlu1 %v7610_v20, %s7486_s21  ;;  %1185 = vrot.lane.b32.xlu0 %v7614_v24, %s7474_s28 }
 0x142   : > { %771 = vrot.lane.b32.xlu1 %v7612_v21, %s7486_s21  ;;  %1189 = vrot.lane.b32.xlu0 %v7616_v25, %s7474_s28  ;;  %s10964_s28 = smov 14  }
 0x146   : > { %666 = vrot.lane.b32.xlu1 %v7610_v20, %s7487_s24  ;;  %1013 = vrot.lane.b32.xlu0 %v7614_v24, %s7476_s22 }
 0x14a   : > { %670 = vrot.lane.b32.xlu1 %v7612_v21, %s7487_s24  ;;  %1017 = vrot.lane.b32.xlu0 %v7616_v25, %s7476_s22  ;;  %s10956_s22 = smov 120  }
 0x14c   : > { %v7752_v31 = vpop.permute.xlu1 %1391  ;;  %v7754_v32 = vpop.permute.xlu0 %1387 }
 0x14e   : > { %1389 = vrot.lane.b32.xlu1 %v7614_v24, %s7465_s16  ;;  %1085 = vrot.lane.b32.xlu0 %v7614_v24, %s7478_s27  ;;  %s10958_s16 = smov 114  }
 0x150   : > { %v7760_v33 = vpop.permute.xlu1 %1343  ;;  %v7762_v34 = vpop.permute.xlu0 %1795 }
 0x152   : > { %1797 = vrot.lane.b32.xlu1 %v7614_v24, %s7467_s20  ;;  %1089 = vrot.lane.b32.xlu0 %v7616_v25, %s7478_s27 }
 0x154   : > { %v7768_v35 = vpop.permute.xlu1 %1347  ;;  %v7770_v36 = vpop.permute.xlu0 %1799 }
 0x156   : > { %1801 = vrot.lane.b32.xlu1 %v7616_v25, %s7467_s20  ;;  %913 = vrot.lane.b32.xlu0 %v7614_v24, %s7480_s29  ;;  %s10961_s20 = smov 126  }
 0x158   : > { %v7776_v37 = vpop.permute.xlu1 %1227  ;;  %v7778_v38 = vpop.permute.xlu0 %1751 }
 0x15a   : > { %1753 = vrot.lane.b32.xlu1 %v7614_v24, %s10956_s22  ;;  %917 = vrot.lane.b32.xlu0 %v7616_v25, %s7480_s29  ;;  %s7488_s29 = smov 112  }
 0x15c   : > { %v7784_v39 = vpop.permute.xlu1 %1231  ;;  %v7786_v40 = vpop.permute.xlu0 %1755 }
 0x15e   : > { %1757 = vrot.lane.b32.xlu1 %v7616_v25, %s10956_s22  ;;  %969 = vrot.lane.b32.xlu0 %v7614_v24, %s7482_s30  ;;  %s7491_s22 = smov 100  }
 0x160   : > { %v7792_v41 = vpop.permute.xlu1 %1283  ;;  %v7794_v42 = vpop.permute.xlu0 %2815 }
 0x161   : > { %10957 = vst [vmem:[#allocation11_spill] sm:$0xff] %v7794_v42  ;;  %v10997_v42 = vrot.slane %v7896_v55, %v7845_v58 }
 0x162   : > { %2817 = vrot.lane.b32.xlu1 %v7614_v24, %s10958_s16  ;;  %973 = vrot.lane.b32.xlu0 %v7616_v25, %s7482_s30  ;;  %s7496_s30 = smov 92  }
 0x164   : > { %v7800_v43 = vpop.permute.xlu1 %1287  ;;  %v7802_v44 = vpop.permute.xlu0 %2819 }
 0x165   : > { %10959 = vst [vmem:[#allocation12_spill] sm:$0xff] %v7802_v44 }
 0x166   : > { %2821 = vrot.lane.b32.xlu1 %v7616_v25, %s10958_s16  ;;  %813 = vrot.lane.b32.xlu0 %v7614_v24, %s7483_s23  ;;  %s7494_s16 = smov 4  }
 0x168   : > { %v7808_v46 = vpop.permute.xlu1 %1127  ;;  %v7810_v47 = vpop.permute.xlu0 %2759 }
 0x169   : > { %10960 = vst [vmem:[#allocation13_spill] sm:$0xff] %v7810_v47 }
 0x16a   : > { %2761 = vrot.lane.b32.xlu1 %v7614_v24, %s10961_s20  ;;  %817 = vrot.lane.b32.xlu0 %v7616_v25, %s7483_s23  ;;  %s7493_s23 = smov 28  }
 0x16c   : > { %v7817_v49 = vpop.permute.xlu1 %1131  ;;  %v7819_v50 = vpop.permute.xlu0 %2763 }
 0x16d   : > { %10962 = vst [vmem:[#allocation14_spill] sm:$0xff] %v7819_v50 }
 0x16e   : > { %2765 = vrot.lane.b32.xlu1 %v7616_v25, %s10961_s20  ;;  %869 = vrot.lane.b32.xlu0 %v7614_v24, %s7484_s25  ;;  %s10986_s20 = smov 18  }
 0x170   : > { %v7827_v52 = vpop.permute.xlu1 %1183  ;;  %v7829_v53 = vpop.permute.xlu0 %2628 }
 0x171   : > { %10963 = vst [vmem:[#allocation15_spill] sm:$0xff] %v7829_v53  ;;  %v8188_v53 = vld [vmem:[%s10837_s1 + $0xc3] ss:$8 sm:$0xf] }
 0x172   : > { %2630 = vrot.lane.b32.xlu1 %v7614_v24, %s10964_s28  ;;  %873 = vrot.lane.b32.xlu0 %v7616_v25, %s7484_s25  ;;  %10996 = vst [vmem:[#allocation43_spill] sm:$0xff] %v8188_v53 }
 0x174   : > { %v7851_v61 = vpop.permute.xlu1 %1187  ;;  %v7853_v62 = vpop.permute.xlu0 %2632 }
 0x175   : > { %10965 = vst [vmem:[#allocation16_spill] sm:$0xff] %v7853_v62 }
 0x176   : > { %2634 = vrot.lane.b32.xlu1 %v7616_v25, %s10964_s28  ;;  %713 = vrot.lane.b32.xlu0 %v7614_v24, %s7485_s17  ;;  %s10975_s28 = smov 2  }
 0x178   : > { %v7877_v17 = vpop.permute.xlu1 %1011  ;;  %v7879_v18 = vpop.permute.xlu0 %2672 }
 0x179   : > { %10966 = vst [vmem:[#allocation17_spill] sm:$0xff] %v7879_v18 }
 0x17a   : > { %2674 = vrot.lane.b32.xlu1 %v7614_v24, %s10975_s28  ;;  %717 = vrot.lane.b32.xlu0 %v7616_v25, %s7485_s17  ;;  %s11025_s17 = smov 96  }
 0x17c   : > { %v7945_v9 = vpop.permute.xlu1 %1015  ;;  %v7947_v3 = vpop.permute.xlu0 %2676 }
 0x17d   : > { %10983 = vst [vmem:[#allocation33_spill] sm:$0xff] %v7947_v3 }
 0x17e   : > { %2678 = vrot.lane.b32.xlu1 %v7616_v25, %s10975_s28  ;;  %769 = vrot.lane.b32.xlu0 %v7614_v24, %s7486_s21  ;;  %s10994_s28 = smov 16  }
 0x180   : > { %v8009_v15 = vpop.permute.xlu1 %1083  ;;  %v8011_v4 = vpop.permute.xlu0 %2528 }
 0x181   : > { %10985 = vst [vmem:[#allocation35_spill] sm:$0xff] %v8011_v4  ;;  %v8133_v4 = vld [vmem:[%s10837_s1 + $0x6] ss:$8 sm:$0xf] }
 0x182   : > { %2530 = vrot.lane.b32.xlu1 %v7614_v24, %s10986_s20  ;;  %773 = vrot.lane.b32.xlu0 %v7616_v25, %s7486_s21  ;;  %10991 = vst [vmem:[#allocation39_spill] sm:$0xff] %v8133_v4  ;;  %s7490_s21 = smov 32  }
 0x184   : > { %v8062_v48 = vpop.permute.xlu1 %1087  ;;  %v8064_v2 = vpop.permute.xlu0 %2532 }
 0x185   : > { %10987 = vst [vmem:[#allocation36_spill] sm:$0xff] %v8064_v2  ;;  %v10988_v2 = vlaneseq }
 0x186   : > { %2534 = vrot.lane.b32.xlu1 %v7616_v25, %s10986_s20  ;;  %668 = vrot.lane.b32.xlu0 %v7614_v24, %s7487_s24  ;;  %s7495_s20 = smov 36  }
 0x187   : > { %v8097_v16 = vand.u32 127, %v10988_v2 }
 0x188   : > { %v8118_v59 = vpop.permute.xlu1 %911  ;;  %v8120_v14 = vpop.permute.xlu0 %2572 }
 0x189   : > { %10990 = vst [vmem:[#allocation38_spill] sm:$0xff] %v8120_v14  ;;  %v8151_v14 = vld [vmem:[%s10837_s1 + $0x81] ss:$8 sm:$0xf]  ;;  %vm1395_vm1 = vcmp.lt.s32.totalorder %v8097_v16, 121  ;;  %vm1351_vm2 = vcmp.lt.s32.totalorder %v8097_v16, 127 }
 0x18a   : > { %10993 = vst [vmem:[#allocation41_spill] sm:$0xff] %v8151_v14  ;;  %2574 = vrot.lane.b32.xlu1 %v7614_v24, %s10994_s28  ;;  %672 = vrot.lane.b32.xlu0 %v7616_v25, %s7487_s24  ;;  %v8257_v14 = vld [vmem:[%s10837_s1 + $0xa1] ss:$8 sm:$0xf]  ;;  %vm1235_vm3 = vcmp.lt.s32.totalorder %v8097_v16, 7  ;;  %vm1291_vm4 = vcmp.lt.s32.totalorder %v8097_v16, 1 }
 0x18b   : > { %11003 = vst [vmem:[#allocation48_spill] sm:$0xff] %v8257_v14  ;;  %v11012_v14 = vrot.slane %v7922_v63, %v7845_v58  ;;  %vm1135_vm5 = vcmp.lt.s32.totalorder %v8097_v16, 9  ;;  %vm1191_vm6 = vcmp.lt.s32.totalorder %v8097_v16, 8  ;;  %vm1019_vm7 = vcmp.lt.s32.totalorder %v8097_v16, 56 }
 0x18c   : > { %v8177_v62 = vpop.permute.xlu1 %915  ;;  %v1394_v2 = vpop.permute.xlu0 %1393  ;;  %vm1091_vm8 = vcmp.lt.s32.totalorder %v8097_v16, 55  ;;  %vm1803_vm9 = vcmp.lt.s32.totalorder %v8097_v16, 119  ;;  %vm919_vm10 = vcmp.lt.s32.totalorder %v8097_v16, 63  ;;  %vm1759_vm11 = vcmp.lt.s32.totalorder %v8097_v16, 120 }
 0x18d   : > { %v1396_v18 = vsel %vm1395_vm1, %v7752_v31, %v1394_v2  ;;  %v1399_v47 = vsel %vm1395_vm1, %v1394_v2, %v7754_v32  ;;  %vm975_vm12 = vcmp.lt.s32.totalorder %v8097_v16, 57  ;;  %vm2823_vm14 = vcmp.lt.s32.totalorder %v8097_v16, 114 }
 0x18e   : > { %v1425_v44 = vmul.f32 %v10997_v42, %v1396_v18  ;;  %v1426_v30 = vmul.f32 %v10998_v60, %v1399_v47  ;;  %2578 = vrot.lane.b32.xlu1 %v7616_v25, %s10994_s28  ;;  %2576 = vrot.lane.b32.xlu0 %v7612_v21, %s10994_s28  ;;  %v8226_v60 = vld [vmem:[%s10837_s1 + $0x3] ss:$8 sm:$0xf]  ;;  %v8237_v18 = vld [vmem:[%s10837_s1 + $0x45] ss:$8 sm:$0xf] }
 0x18f   : > { %10999 = vst [vmem:[#allocation44_spill] sm:$0xff] %v8226_v60  ;;  %11001 = vst [vmem:[#allocation46_spill] sm:$0xff] %v8237_v18  ;;  %v8252_v42 = vld [vmem:[%s10837_s1 + $0x80] ss:$8 sm:$0xf]  ;;  %s7489_s28 = smov 110   ;;  %v11014_v60 = vrot.slane %v7922_v63, %v7836_v56 }
 0x190   : > { %v1433_v50 = vrot.slane %v1425_v44, 4  ;;  %v1434_v4 = vrot.slane %v1426_v30, 4  ;;  %v8228_v2 = vpop.permute.xlu1 %967  ;;  %v1346_v19 = vpop.permute.xlu0 %1345  ;;  %11002 = vst [vmem:[#allocation47_spill] sm:$0xff] %v8252_v42  ;;  %v11005_v44 = vrot.slane %v7901_v57, %v7825_v51  ;;  %vm819_vm15 = vcmp.lt.s32.totalorder %v8097_v16, 65 }
 0x191   : > { %11000 = vst [vmem:[#allocation45_spill] sm:$0xff] %v8228_v2  ;;  %v1353_v47 = vsel %vm1351_vm2, %v1346_v19, %v7768_v35  ;;  %v1354_v30 = vsel %vm1351_vm2, %v7760_v33, %v1346_v19  ;;  %v11004_v19 = vrot.slane %v7901_v57, %v7836_v56  ;;  %vm2767_vm0 = vcmp.lt.s32.totalorder %v8097_v16, 126 }
 0x192   : > { %1441 = vst [vmem:[#allocation2 + $0x178] sm:$0xf0] %v1433_v50  ;;  %1442 = vst [vmem:[#allocation2 + $0xc8] sm:$0xf0] %v1434_v4  ;;  %v1380_v3 = vmul.f32 %v11005_v44, %v1353_v47  ;;  %2861 = vrot.lane.b32.xlu1 %v7614_v24, %s7488_s29  ;;  %2859 = vrot.lane.b32.xlu0 %v7610_v20, %s7488_s29  ;;  %v11008_v47 = vrot.slane %v7901_v57, %v7831_v54 }
 0x193   : > { %v1379_v23 = vmul.f32 %v11004_v19, %v1354_v30  ;;  %v8272_v50 = vld [vmem:[%s10837_s1 + $0xc2] ss:$8 sm:$0xf]  ;;  %v11007_v30 = vrot.slane %v7901_v57, %v7845_v58  ;;  %v11011_v4 = vrot.slane %v7922_v63, %v7825_v51 }
 0x194   : > { %11006 = vst [vmem:[#allocation49_spill] sm:$0xff] %v8272_v50  ;;  %1384 = vst [vmem:[#allocation2 + $0xc0] sm:$0xf] %v1380_v3  ;;  %v8282_v19 = vpop.permute.xlu1 %971  ;;  %v1350_v22 = vpop.permute.xlu0 %1349 }
 0x195   : > { %1383 = vst [vmem:[#allocation2 + $0x90] sm:$0xf] %v1379_v23  ;;  %v1352_v23 = vsel %vm1351_vm2, %v7768_v35, %v1350_v22  ;;  %v1355_v3 = vsel %vm1351_vm2, %v1350_v22, %v7760_v33  ;;  %v8359_v33 = vld [vmem:[%s10837_s1 + $0x86] ss:$8 sm:$0xf]  ;;  %vm2636_vm2 = vcmp.lt.s32.totalorder %v8097_v16, 14 }
 0x196   : > { %v1381_v44 = vmul.f32 %v11007_v30, %v1352_v23  ;;  %v1382_v53 = vmul.f32 %v11008_v47, %v1355_v3  ;;  %2865 = vrot.lane.b32.xlu1 %v7616_v25, %s7488_s29  ;;  %2863 = vrot.lane.b32.xlu0 %v7612_v21, %s7488_s29  ;;  %v8324_v47 = vld [vmem:[%s10837_s1 + $0x4] ss:$8 sm:$0xf]  ;;  %11010 = vst [vmem:[#allocation51_spill] sm:$0xff] %v8359_v33 }
 0x197   : > { %v8374_v35 = vld [vmem:[%s10837_s1 + $0xa7] ss:$8 sm:$0xf] }
 0x198   : > { %1385 = vst [vmem:[#allocation2 + $0x178] sm:$0xf] %v1381_v44  ;;  %1386 = vst [vmem:[#allocation2 + $0xc8] sm:$0xf] %v1382_v53  ;;  %v8326_v23 = vpop.permute.xlu1 %811  ;;  %v1230_v3 = vpop.permute.xlu0 %1229 }
 0x199   : > { %v8339_v44 = vld [vmem:[%s10837_s1 + $0x46] ss:$8 sm:$0xf]  ;;  %v8344_v53 = vld [vmem:[%s10837_s1 + $0x65] ss:$8 sm:$0xf]  ;;  %v1237_v22 = vsel %vm1235_vm3, %v1230_v3, %v7784_v39  ;;  %v1238_v30 = vsel %vm1235_vm3, %v7776_v37, %v1230_v3 }
 0x19a   : > { %11009 = vst [vmem:[#allocation50_spill] sm:$0xff] %v8344_v53  ;;  %v1264_v2 = vmul.f32 %v11011_v4, %v1238_v30  ;;  %v1265_v42 = vmul.f32 %v11012_v14, %v1237_v22  ;;  %2933 = vrot.lane.b32.xlu1 %v7614_v24, %s7489_s28  ;;  %2931 = vrot.lane.b32.xlu0 %v7610_v20, %s7489_s28  ;;  %11013 = vst [vmem:[#allocation52_spill] sm:$0xff] %v8374_v35 }
 0x19b   : > { %v11015_v22 = vrot.slane %v7922_v63, %v7831_v54 }
 0x19c   : > { %v1272_v57 = vrot.slane %v1264_v2, 4  ;;  %v1273_v50 = vrot.slane %v1265_v42, 4  ;;  %v8384_v3 = vpop.permute.xlu1 %815  ;;  %v1234_v18 = vpop.permute.xlu0 %1233  ;;  %v8453_v2 = vld [vmem:[%s10837_s1 + $0x87] ss:$8 sm:$0xf] }
 0x19d   : > { %v1236_v30 = vsel %vm1235_vm3, %v7784_v39, %v1234_v18  ;;  %v1239_v14 = vsel %vm1235_vm3, %v1234_v18, %v7776_v37  ;;  %11019 = vst [vmem:[#allocation56_spill] sm:$0xff] %v8453_v2  ;;  %v11027_v2 = vrot.slane %v7974_v0, %v7845_v58  ;;  %vm719_vm3 = vcmp.lt.s32.totalorder %v8097_v16, 72 }
 0x19e   : > { %1280 = vst [vmem:[#allocation2 + $0x1a8] sm:$0xf0] %v1272_v57  ;;  %1281 = vst [vmem:[#allocation2 + $0x1b8] sm:$0xf0] %v1273_v50  ;;  %v1263_v4 = vmul.f32 %v11014_v60, %v1239_v14  ;;  %v1266_v39 = vmul.f32 %v11015_v22, %v1236_v30  ;;  %2937 = vrot.lane.b32.xlu1 %v7616_v25, %s7489_s28  ;;  %2935 = vrot.lane.b32.xlu0 %v7612_v21, %s7489_s28  ;;  %s10823_s28 = scalar_lea.vmem %s10851_s15, %s11333_s26 }
 0x19f   : > { %v1458_v18 = vld [vmem:[#allocation2 + $0xc8] sm:$0xff]  ;;  %v1457_v57 = vld [vmem:[#allocation2 + $0x178] sm:$0xff] }
 0x1a0   : > { %v8422_v14 = vld [vmem:[%s10837_s1 + $0x1] ss:$8 sm:$0xf]  ;;  %v1271_v22 = vrot.slane %v1263_v4, 4  ;;  %v1274_v37 = vrot.slane %v1266_v39, 4  ;;  %v8424_v42 = vpop.permute.xlu1 %867  ;;  %1560 = vmatprep.subr.mxu1 %v1458_v18  ;;  %v1286_v50 = vpop.permute.xlu0 %1285  ;;  %v11021_v18 = vrot.slane %v7958_v13, %v7845_v58 }
 0x1a1   : > { %11016 = vst [vmem:[#allocation53_spill] sm:$0xff] %v8422_v14  ;;  %v8433_v30 = vld [vmem:[%s10837_s1 + $0x43] ss:$8 sm:$0xf]  ;;  %v1293_v4 = vsel %vm1291_vm4, %v1286_v50, %v7800_v43  ;;  %v1294_v39 = vsel %vm1291_vm4, %v7792_v41, %v1286_v50  ;;  %1561 = vmatpush1.msra.mxu1 %v1457_v57  ;;  %v11020_v57 = vrot.slane %v7958_v13, %v7825_v51 }
 0x1a2   : > { %11017 = vst [vmem:[#allocation54_spill] sm:$0xff] %v8433_v30  ;;  %v8448_v60 = vld [vmem:[%s10837_s1 + $0x66] ss:$8 sm:$0xf]  ;;  %1279 = vst [vmem:[#allocation2 + $0x80] sm:$0xf0] %v1271_v22  ;;  %v1321_v63 = vmul.f32 %v11021_v18, %v1293_v4  ;;  %2352 = vrot.lane.b32.xlu1 %v7606_v12, %s7490_s21  ;;  %2089 = vrot.lane.b32.xlu0 %v7606_v12, %s7484_s25  ;;  %v11024_v12 = vrot.slane %v7958_v13, %v7831_v54 }
 0x1a3   : > { %11018 = vst [vmem:[#allocation55_spill] sm:$0xff] %v8448_v60  ;;  %1282 = vst [vmem:[#allocation2 + $0x28] sm:$0xf0] %v1274_v37  ;;  %v1320_v50 = vmul.f32 %v11020_v57, %v1294_v39  ;;  %v8470_v37 = vld [vmem:[%s10837_s1 + $0xc0] ss:$8 sm:$0xf]  ;;  %v11023_v39 = vrot.slane %v7958_v13, %v7836_v56  ;;  %v11026_v4 = vrot.slane %v7974_v0, %v7825_v51 }
 0x1a4   : > { %11022 = vst [vmem:[#allocation57_spill] sm:$0xff] %v8470_v37  ;;  %v2527_v22 = vld [vmem:[%s10841_s5] sm:$0xf]  ;;  %1325 = vst [vmem:[#allocation2 + $0x190] sm:$0xf] %v1321_v63  ;;  %v8483_v57 = vpop.permute.xlu1 %871  ;;  %v1290_v33 = vpop.permute.xlu0 %1289 }
 0x1a5   : > { %1324 = vst [vmem:[#allocation2 + $0xf8] sm:$0xf] %v1320_v50  ;;  %v1292_v50 = vsel %vm1291_vm4, %v7800_v43, %v1290_v33  ;;  %v1295_v63 = vsel %vm1291_vm4, %v1290_v33, %v7792_v41  ;;  %v8560_v41 = vld [vmem:[%s10837_s1 + $0x84] ss:$8 sm:$0xf]  ;;  %vm2680_vm4 = vcmp.lt.s32.totalorder %v8097_v16, 2 }
 0x1a6   : > { %v1319_v18 = vmul.f32 %v11023_v39, %v1295_v63  ;;  %v1322_v35 = vmul.f32 %v11024_v12, %v1292_v50  ;;  %3820 = vrot.lane.b32.xlu1 %v2527_v22, %s7484_s25  ;;  %3218 = vrot.lane.b32.xlu0 %v2527_v22, %s11025_s17  ;;  %v8525_v12 = vld [vmem:[%s10837_s1 + $0x2] ss:$8 sm:$0xf]  ;;  %v8576_v43 = vld [vmem:[%s10837_s1 + $0xa5] ss:$8 sm:$0xf] }
 0x1a7   : > { %11028 = vst [vmem:[#allocation58_spill] sm:$0xff] %v8576_v43 }
 0x1a8   : > { %1323 = vst [vmem:[#allocation2 + $0xe8] sm:$0xf] %v1319_v18  ;;  %1326 = vst [vmem:[#allocation2 + $0xb8] sm:$0xf] %v1322_v35  ;;  %v8527_v50 = vpop.permute.xlu1 %711  ;;  %v1130_v63 = vpop.permute.xlu0 %1129 }
 0x1a9   : > { %v8540_v18 = vld [vmem:[%s10837_s1 + $0x44] ss:$8 sm:$0xf]  ;;  %v8545_v35 = vld [vmem:[%s10837_s1 + $0x63] ss:$8 sm:$0xf]  ;;  %v1137_v33 = vsel %vm1135_vm5, %v1130_v63, %v7817_v49  ;;  %v1138_v39 = vsel %vm1135_vm5, %v7808_v46, %v1130_v63 }
 0x1aa   : > { %v1164_v53 = vmul.f32 %v11026_v4, %v1138_v39  ;;  %v1165_v60 = vmul.f32 %v11027_v2, %v1137_v33  ;;  %4875 = vrot.lane.b32.xlu1 %v7610_v20, %s7491_s22  ;;  %4083 = vrot.lane.b32.xlu0 %v2527_v22, %s7490_s21  ;;  %v11029_v2 = vrot.slane %v7974_v0, %v7836_v56 }
 0x1ab   : > { %v1453_v13 = vld [vmem:[#allocation2 + $0x190] sm:$0xff] }
 0x1ac   : > { %v8578_v4 = vld [vmem:[#allocation2 + $0xf8] sm:$0xff]  ;;  %v1172_v63 = vrot.slane %v1164_v53, 4  ;;  %v1173_v37 = vrot.slane %v1165_v60, 4  ;;  %v8588_v30 = vpop.permute.xlu1 %715  ;;  %v1134_v14 = vpop.permute.xlu0 %1133  ;;  %3125 = vst [vmem:[#allocation2 + $0x190] sm:$0xf0] %v7623_v26  ;;  %v11030_v26 = vrot.slane %v7974_v0, %v7831_v54 }
 0x1ad   : > { %3124 = vst [vmem:[#allocation2 + $0xf8] sm:$0xf0] %v7633_v29  ;;  %v1136_v22 = vsel %vm1135_vm5, %v7817_v49, %v1134_v14  ;;  %v1139_v53 = vsel %vm1135_vm5, %v1134_v14, %v7808_v46  ;;  %v7285_v46 = vld [vmem:[%s10844_s8 + $0x4] sm:$0xf]  ;;  %vm775_vm5 = vcmp.lt.s32.totalorder %v8097_v16, 71 }
 0x1ae   : > { %1180 = vst [vmem:[#allocation2 + $0x188] sm:$0xf0] %v1172_v63  ;;  %1181 = vst [vmem:[#allocation2 + $0x138] sm:$0xf0] %v1173_v37  ;;  %v1163_v33 = vmul.f32 %v11029_v2, %v1139_v53  ;;  %v1166_v49 = vmul.f32 %v11030_v26, %v1136_v22  ;;  %4879 = vrot.lane.b32.xlu1 %v7612_v21, %s7491_s22  ;;  %4877 = vrot.lane.b32.xlu0 %v7614_v24, %s7491_s22 }
 0x1af   : > { %v1454_v37 = vld [vmem:[#allocation2 + $0xb8] sm:$0xff]  ;;  %v8622_v63 = vld [vmem:[#allocation2 + $0xe8] sm:$0xff] }
 0x1b0   : > { %v8635_v53 = vld [vmem:[%s10837_s1] ss:$8 sm:$0xf]  ;;  %v1171_v14 = vrot.slane %v1163_v33, 4  ;;  %v1174_v39 = vrot.slane %v1166_v49, 4  ;;  %v8637_v60 = vpop.permute.xlu1 %767  ;;  %1562 = vmatprep.subr.mxu1 %v1454_v37  ;;  %v1186_v0 = vpop.permute.xlu0 %1185  ;;  %v11036_v37 = vrot.slane %v7989_v8, %v7845_v58 }
 0x1b1   : > { %11031 = vst [vmem:[#allocation59_spill] sm:$0xff] %v8635_v53  ;;  %3126 = vst [vmem:[#allocation2 + $0xb8] sm:$0xf0] %v7629_v28  ;;  %v8648_v26 = vld [vmem:[%s10837_s1 + $0x42] ss:$8 sm:$0xf]  ;;  %v1193_v33 = vsel %vm1191_vm6, %v1186_v0, %v7851_v61  ;;  %v1194_v49 = vsel %vm1191_vm6, %v7827_v52, %v1186_v0  ;;  %1563 = vmatpush1.msra.mxu1 %v1453_v13  ;;  %v11035_v13 = vrot.slane %v7989_v8, %v7825_v51 }
 0x1b2   : > { %3123 = vst [vmem:[#allocation2 + $0xe8] sm:$0xf0] %v7626_v27  ;;  %11032 = vst [vmem:[#allocation60_spill] sm:$0xff] %v8648_v26  ;;  %v8663_v2 = vld [vmem:[%s10837_s1 + $0x64] ss:$8 sm:$0xf]  ;;  %v1221_v22 = vmul.f32 %v11036_v37, %v1193_v33  ;;  %4247 = vperm.xlu1 %7450, %v7285_v46   ;;  %4881 = vrot.lane.b32.xlu0 %v7616_v25, %s7491_s22  ;;  %v11038_v33 = vrot.slane %v7989_v8, %v7836_v56 }
 0x1b3   : > { %11033 = vst [vmem:[#allocation61_spill] sm:$0xff] %v8663_v2  ;;  %v8668_v27 = vld [vmem:[%s10837_s1 + $0x85] ss:$8 sm:$0xf]  ;;  %1179 = vst [vmem:[#allocation2 + $0xe0] sm:$0xf0] %v1171_v14  ;;  %v1220_v0 = vmul.f32 %v11035_v13, %v1194_v49  ;;  %v11039_v46 = vrot.slane %v7989_v8, %v7831_v54  ;;  %v11042_v28 = vrot.slane %v8002_v11, %v7845_v58 }
 0x1b4   : > { %11034 = vst [vmem:[#allocation62_spill] sm:$0xff] %v8668_v27  ;;  %1182 = vst [vmem:[#allocation2 + $0x140] sm:$0xf0] %v1174_v39  ;;  %v8684_v39 = vld [vmem:[%s10837_s1 + $0xa6] ss:$8 sm:$0xf]  ;;  %v8694_v37 = vpop.permute.xlu1 %771  ;;  %v1190_v13 = vpop.permute.xlu0 %1189  ;;  %v11043_v2 = vrot.slane %v8007_v5, %v7836_v56 }
 0x1b5   : > { %11037 = vst [vmem:[#allocation63_spill] sm:$0xff] %v8684_v39  ;;  %1224 = vst [vmem:[#allocation2 + $0x1a8] sm:$0xf] %v1220_v0  ;;  %v1192_v0 = vsel %vm1191_vm6, %v7851_v61, %v1190_v13  ;;  %s7492_s22 = smov 124  }
 0x1b6   : > { %1225 = vst [vmem:[#allocation2 + $0x1b8] sm:$0xf] %v1221_v22  ;;  %v1195_v22 = vsel %vm1191_vm6, %v1190_v13, %v7827_v52  ;;  %v1222_v43 = vmul.f32 %v11039_v46, %v1192_v0  ;;  %4821 = vrot.lane.b32.xlu1 %v7614_v24, %s7492_s22  ;;  %4819 = vrot.lane.b32.xlu0 %v7610_v20, %s7492_s22  ;;  %v8736_v13 = vld [vmem:[%s10837_s1 + $0x82] ss:$8 sm:$0xf]  ;;  %vm2536_vm6 = vcmp.lt.s32.totalorder %v8097_v16, 18 }
 0x1b7   : > { %v1219_v49 = vmul.f32 %v11038_v33, %v1195_v22  ;;  %v11041_v52 = vrot.slane %v8002_v11, %v7825_v51 }
 0x1b8   : > { %1226 = vst [vmem:[#allocation2 + $0x28] sm:$0xf] %v1222_v43  ;;  %v8738_v0 = vpop.permute.xlu1 %666  ;;  %v1014_v22 = vpop.permute.xlu0 %1013  ;;  %v8756_v43 = vld [vmem:[%s10837_s1 + $0xc4] ss:$8 sm:$0xf] }
 0x1b9   : > { %1223 = vst [vmem:[#allocation2 + $0x80] sm:$0xf] %v1219_v49  ;;  %11040 = vst [vmem:[#allocation64_spill] sm:$0xff] %v8738_v0  ;;  %v8751_v49 = vld [vmem:[%s10837_s1 + $0xa3] ss:$8 sm:$0xf]  ;;  %v1021_v33 = vsel %vm1019_vm7, %v1014_v22, %v7945_v9  ;;  %v1022_v8 = vsel %vm1019_vm7, %v7877_v17, %v1014_v22  ;;  %v11044_v22 = vrot.slane %v8007_v5, %v7825_v51 }
 0x1ba   : > { %v1048_v14 = vmul.f32 %v11041_v52, %v1022_v8  ;;  %v1049_v27 = vmul.f32 %v11042_v28, %v1021_v33  ;;  %v2293_v26 = vmul.f32 %v11043_v2, %v1022_v8  ;;  %4825 = vrot.lane.b32.xlu1 %v7616_v25, %s7492_s22  ;;  %4823 = vrot.lane.b32.xlu0 %v7612_v21, %s7492_s22  ;;  %v664_v52 = vld [vmem:[%s10844_s8] sm:$0xf] }
 0x1bb   : > { %v2294_v53 = vmul.f32 %v11044_v22, %v1021_v33 }
 0x1bc   : > { %v1056_v8 = vrot.slane %v1048_v14, 4  ;;  %v1057_v33 = vrot.slane %v1049_v27, 4  ;;  %v2301_v22 = vrot.slane %v2293_v26, 4  ;;  %v8791_v39 = vpop.permute.xlu1 %670  ;;  %v1018_v0 = vpop.permute.xlu0 %1017  ;;  %v11048_v27 = vrot.slane %v8007_v5, %v7831_v54 }
 0x1bd   : > { %v2302_v46 = vrot.slane %v2294_v53, 4  ;;  %v1020_v28 = vsel %vm1019_vm7, %v7945_v9, %v1018_v0  ;;  %v1023_v61 = vsel %vm1019_vm7, %v1018_v0, %v7877_v17  ;;  %v11045_v53 = vrot.slane %v8002_v11, %v7836_v56 }
 0x1be   : > { %1064 = vst [vmem:[#allocation2 + $0x150] sm:$0xf0] %v1056_v8  ;;  %1065 = vst [vmem:[#allocation2 + $0x108] sm:$0xf0] %v1057_v33  ;;  %v11046_v9 = vrot.slane %v8002_v11, %v7831_v54  ;;  %v11047_v17 = vrot.slane %v8007_v5, %v7845_v58  ;;  %v2296_v26 = vmul.f32 %v11048_v27, %v1023_v61  ;;  %4688 = vrot.lane.b32.xlu1 %v7610_v20, %s7493_s23 }
 0x1bf   : > { %2309 = vst [vmem:[#allocation2 + $0x128] sm:$0xf0] %v2301_v22  ;;  %2310 = vst [vmem:[#allocation2 + $0x38] sm:$0xf0] %v2302_v46  ;;  %v1047_v14 = vmul.f32 %v11045_v53, %v1023_v61  ;;  %2518 = vperm.xlu0 %7449, %v664_v52   ;;  %v1450_v46 = vld [vmem:[#allocation2 + $0x28] sm:$0xff]  ;;  %vm676_vm7 = vcmp.lt.s32.totalorder %v8097_v16, 73 }
 0x1c0   : > { %v1050_v2 = vmul.f32 %v11046_v9, %v1020_v28  ;;  %v2295_v0 = vmul.f32 %v11047_v17, %v1020_v28  ;;  %v2304_v27 = vrot.slane %v2296_v26, 4  ;;  %v1390_v53 = vpop.permute.xlu1 %1389  ;;  %1564 = vmatprep.subr.mxu1 %v1450_v46  ;;  %v1086_v52 = vpop.permute.xlu0 %1085  ;;  %v1449_v9 = vld [vmem:[#allocation2 + $0x1b8] sm:$0xff] }
 0x1c1   : > { %v1055_v61 = vrot.slane %v1047_v14, 4  ;;  %v1397_v17 = vsel %vm1395_vm1, %v1390_v53, %v7752_v31  ;;  %v1398_v8 = vsel %vm1395_vm1, %v7754_v32, %v1390_v53  ;;  %v1093_v5 = vsel %vm1091_vm8, %v1086_v52, %v8062_v48  ;;  %1565 = vmatpush1.msra.mxu1 %v1449_v9  ;;  %v8844_v26 = vld [vmem:[%s10837_s1 + $0x83] ss:$8 sm:$0xf] }
 0x1c2   : > { %v1058_v33 = vrot.slane %v1050_v2, 4  ;;  %v2303_v22 = vrot.slane %v2295_v0, 4  ;;  %v1094_v2 = vsel %vm1091_vm8, %v8009_v15, %v1086_v52  ;;  %v8849_v31 = vld [vmem:[%s10837_s1 + $0xa4] ss:$8 sm:$0xf]  ;;  %v11050_v32 = vrot.slane %v7896_v55, %v7836_v56  ;;  %4692 = vrot.lane.b32.xlu1 %v7612_v21, %s7493_s23 }
 0x1c3   : > { %11049 = vst [vmem:[#allocation65_spill] sm:$0xff] %v8849_v31  ;;  %1063 = vst [vmem:[#allocation2 + $0x120] sm:$0xf0] %v1055_v61  ;;  %v11051_v0 = vrot.slane %v7896_v55, %v7825_v51  ;;  %v11052_v53 = vrot.slane %v8032_v10, %v7825_v51  ;;  %v11053_v9 = vrot.slane %v8032_v10, %v7845_v58  ;;  %4690 = vrot.lane.b32.xlu0 %v7614_v24, %s7493_s23 }
 0x1c4   : > { %1066 = vst [vmem:[#allocation2 + $0x60] sm:$0xf0] %v1058_v33  ;;  %2311 = vst [vmem:[#allocation2 + $0x88] sm:$0xf0] %v2303_v22  ;;  %v1423_v14 = vmul.f32 %v11050_v32, %v1398_v8  ;;  %v11054_v8 = vrot.slane %v8047_v7, %v7836_v56  ;;  %v11055_v55 = vrot.slane %v8047_v7, %v7825_v51  ;;  %vm875_vm1 = vcmp.lt.s32.totalorder %v8097_v16, 64 }
 0x1c5   : > { %2312 = vst [vmem:[#allocation2 + $0x170] sm:$0xf0] %v2304_v27  ;;  %v1424_v46 = vmul.f32 %v11051_v0, %v1397_v17  ;;  %v1120_v52 = vmul.f32 %v11052_v53, %v1094_v2  ;;  %v1121_v28 = vmul.f32 %v11053_v9, %v1093_v5  ;;  %v1798_v0 = vpop.permute.xlu1 %1797  ;;  %v1090_v53 = vpop.permute.xlu0 %1089  ;;  %v8885_v9 = vld [vmem:[%s10837_s1 + $0xc5] ss:$8 sm:$0xf] }
 0x1c6   : > { %v2336_v61 = vmul.f32 %v11054_v8, %v1094_v2  ;;  %v2337_v33 = vmul.f32 %v11055_v55, %v1093_v5  ;;  %v1431_v17 = vrot.slane %v1423_v14, 4  ;;  %11056 = vst [vmem:[#allocation66_spill] sm:$0xff] %v8885_v9  ;;  %v1805_v14 = vsel %vm1803_vm9, %v1798_v0, %v7770_v36  ;;  %4732 = vrot.lane.b32.xlu1 %v7610_v20, %s7494_s16 }
 0x1c7   : > { %v1432_v32 = vrot.slane %v1424_v46, 4  ;;  %1124 = vst [vmem:[#allocation2 + $0x188] sm:$0xf] %v1120_v52  ;;  %1125 = vst [vmem:[#allocation2 + $0x138] sm:$0xf] %v1121_v28  ;;  %v1806_v28 = vsel %vm1803_vm9, %v7762_v34, %v1798_v0  ;;  %v1092_v46 = vsel %vm1091_vm8, %v8062_v48, %v1090_v53  ;;  %v1095_v52 = vsel %vm1091_vm8, %v1090_v53, %v8009_v15 }
 0x1c8   : > { %2340 = vst [vmem:[#allocation2 + $0x58] sm:$0xf] %v2336_v61  ;;  %2341 = vst [vmem:[#allocation2 + $0xf0] sm:$0xf] %v2337_v33  ;;  %v11057_v8 = vrot.slane %v8052_v45, %v7836_v56  ;;  %v11058_v55 = vrot.slane %v8052_v45, %v7825_v51  ;;  %v11059_v0 = vrot.slane %v8032_v10, %v7836_v56  ;;  %4694 = vrot.lane.b32.xlu0 %v7616_v25, %s7493_s23 }
 0x1c9   : > { %1439 = vst [vmem:[#allocation2 + $0x90] sm:$0xf0] %v1431_v17  ;;  %1440 = vst [vmem:[#allocation2 + $0xc0] sm:$0xf0] %v1432_v32  ;;  %v11060_v48 = vrot.slane %v8032_v10, %v7831_v54  ;;  %v11061_v15 = vrot.slane %v8047_v7, %v7845_v58  ;;  %v11062_v32 = vrot.slane %v8047_v7, %v7831_v54  ;;  %v11118_v10 = vld [vmem:[#allocation47_spill] sm:$0xff]  ;;  %vm2580_vm8 = vcmp.lt.s32.totalorder %v8097_v16, 16 }
 0x1ca   : > { %v1831_v61 = vmul.f32 %v11057_v8, %v1806_v28  ;;  %v1832_v33 = vmul.f32 %v11058_v55, %v1805_v14  ;;  %v1119_v5 = vmul.f32 %v11059_v0, %v1095_v52  ;;  %v914_v55 = vpop.permute.xlu0 %913  ;;  %4736 = vrot.lane.b32.xlu1 %v7612_v21, %s7494_s16  ;;  %v11119_v27 = vrot.slane %v11118_v10, %v7825_v51 }
 0x1cb   : > { %v1122_v2 = vmul.f32 %v11060_v48, %v1092_v46  ;;  %v2338_v17 = vmul.f32 %v11061_v15, %v1092_v46  ;;  %v2339_v53 = vmul.f32 %v11062_v32, %v1095_v52  ;;  %v1802_v46 = vpop.permute.xlu1 %1801  ;;  %v11066_v32 = vrot.slane %v8085_v1, %v7845_v58 }
 0x1cc   : > { %v1839_v28 = vrot.slane %v1831_v61, 4  ;;  %v1840_v8 = vrot.slane %v1832_v33, 4  ;;  %1123 = vst [vmem:[#allocation2 + $0xe0] sm:$0xf] %v1119_v5  ;;  %v1804_v0 = vsel %vm1803_vm9, %v7770_v36, %v1802_v46  ;;  %v1807_v61 = vsel %vm1803_vm9, %v1802_v46, %v7762_v34  ;;  %4734 = vrot.lane.b32.xlu0 %v7614_v24, %s7494_s16 }
 0x1cd   : > { %1126 = vst [vmem:[#allocation2 + $0x140] sm:$0xf] %v1122_v2  ;;  %2342 = vst [vmem:[#allocation2 + $0x30] sm:$0xf] %v2338_v17  ;;  %v921_v2 = vsel %vm919_vm10, %v914_v55, %v8177_v62  ;;  %v922_v5 = vsel %vm919_vm10, %v8118_v59, %v914_v55  ;;  %v11063_v33 = vrot.slane %v8052_v45, %v7845_v58  ;;  %vm2867_vm9 = vcmp.lt.s32.totalorder %v8097_v16, 112 }
 0x1ce   : > { %2343 = vst [vmem:[#allocation2 + $0x198] sm:$0xf] %v2339_v53  ;;  %1847 = vst [vmem:[#allocation2] sm:$0xf0] %v1839_v28  ;;  %v11064_v36 = vrot.slane %v8052_v45, %v7831_v54  ;;  %v11065_v34 = vrot.slane %v8085_v1, %v7825_v51  ;;  %v949_v53 = vmul.f32 %v11066_v32, %v921_v2  ;;  %v918_v52 = vpop.permute.xlu0 %917  ;;  %4588 = vrot.lane.b32.xlu1 %v7610_v20, %s7495_s20 }
 0x1cf   : > { %1848 = vst [vmem:[#allocation2 + $0x68] sm:$0xf0] %v1840_v8  ;;  %v1833_v48 = vmul.f32 %v11063_v33, %v1804_v0  ;;  %v11067_v28 = vrot.slane %v8090_v6, %v7836_v56  ;;  %v11068_v45 = vrot.slane %v8090_v6, %v7825_v51  ;;  %v1754_v32 = vpop.permute.xlu1 %1753 }
 0x1d0   : > { %v1834_v15 = vmul.f32 %v11064_v36, %v1807_v61  ;;  %v948_v17 = vmul.f32 %v11065_v34, %v922_v5  ;;  %v957_v34 = vrot.slane %v949_v53, 4  ;;  %v1456_v55 = vld [vmem:[#allocation2 + $0xc0] sm:$0xff]  ;;  %4738 = vrot.lane.b32.xlu0 %v7616_v25, %s7494_s16 }
 0x1d1   : > { %v2053_v8 = vmul.f32 %v11067_v28, %v922_v5  ;;  %v2054_v46 = vmul.f32 %v11068_v45, %v921_v2  ;;  %v1841_v61 = vrot.slane %v1833_v48, 4  ;;  %v1761_v2 = vsel %vm1759_vm11, %v1754_v32, %v7786_v40  ;;  %v11069_v48 = vld [vmem:[#allocation37_spill] sm:$0xff]  ;;  %1489 = vmatprep.subr.mxu0 %v1456_v55 }
 0x1d2   : > { %v1842_v33 = vrot.slane %v1834_v15, 4  ;;  %v956_v36 = vrot.slane %v948_v17, 4  ;;  %v1762_v45 = vsel %vm1759_vm11, %v7778_v38, %v1754_v32  ;;  %965 = vst [vmem:[#allocation2 + $0x118] sm:$0xf0] %v957_v34  ;;  %v11070_v15 = vrot.slane %v11069_v48, %v7836_v56  ;;  %4592 = vrot.lane.b32.xlu1 %v7612_v21, %s7495_s20 }
 0x1d3   : > { %v2061_v5 = vrot.slane %v2053_v8, 4  ;;  %v2062_v28 = vrot.slane %v2054_v46, 4  ;;  %1849 = vst [vmem:[#allocation2 + $0x148] sm:$0xf0] %v1841_v61  ;;  %v11071_v53 = vrot.slane %v11069_v48, %v7825_v51  ;;  %v920_v46 = vsel %vm919_vm10, %v8177_v62, %v918_v52  ;;  %v1455_v61 = vld [vmem:[#allocation2 + $0x90] sm:$0xff] }
 0x1d4   : > { %1850 = vst [vmem:[#allocation2 + $0x8] sm:$0xf0] %v1842_v33  ;;  %964 = vst [vmem:[#allocation2 + $0x110] sm:$0xf0] %v956_v36  ;;  %v1787_v17 = vmul.f32 %v11070_v15, %v1762_v45  ;;  %v923_v32 = vsel %vm919_vm10, %v918_v52, %v8118_v59  ;;  %v11072_v33 = vrot.slane %v8085_v1, %v7836_v56  ;;  %v970_v15 = vpop.permute.xlu0 %969  ;;  %1490 = vmatpush1.msra.mxu0 %v1455_v61 }
 0x1d5   : > { %v1788_v8 = vmul.f32 %v11071_v53, %v1761_v2  ;;  %2069 = vst [vmem:[#allocation2 + $0x70] sm:$0xf0] %v2061_v5  ;;  %2070 = vst [vmem:[#allocation2 + $0x78] sm:$0xf0] %v2062_v28  ;;  %v11073_v34 = vrot.slane %v8085_v1, %v7831_v54  ;;  %v11074_v62 = vrot.slane %v8090_v6, %v7845_v58  ;;  %v1446_v5 = vld [vmem:[#allocation2 + $0x140] sm:$0xff]  ;;  %v1758_v28 = vpop.permute.xlu1 %1757  ;;  %v1445_v1 = vld [vmem:[#allocation2 + $0x138] sm:$0xff]  ;;  %1491 = vmatprep.subr.mxu0 %v8578_v4 }
 0x1d6   : > { %v947_v36 = vmul.f32 %v11072_v33, %v923_v32  ;;  %v11075_v59 = vrot.slane %v8090_v6, %v7831_v54  ;;  %1791 = vst [vmem:[#allocation2] sm:$0xf] %v1787_v17  ;;  %1566 = vmatprep.subr.mxu1 %v1446_v5  ;;  %v1760_v55 = vsel %vm1759_vm11, %v7786_v40, %v1758_v28  ;;  %vm2939_vm10 = vcmp.lt.s32.totalorder %v8097_v16, 110 }
 0x1d7   : > { %v950_v2 = vmul.f32 %v11073_v34, %v920_v46  ;;  %v2055_v45 = vmul.f32 %v11074_v62, %v920_v46  ;;  %1792 = vst [vmem:[#allocation2 + $0x68] sm:$0xf] %v1788_v8  ;;  %1567 = vmatpush1.msra.mxu1 %v1445_v1  ;;  %v1763_v34 = vsel %vm1759_vm11, %v1758_v28, %v7778_v38  ;;  %v1444_v46 = vld [vmem:[#allocation2 + $0x188] sm:$0xff]  ;;  %vm2357_vm11 = vcmask 1043456  }
 0x1d8   : > { %v2056_v52 = vmul.f32 %v11075_v59, %v923_v32  ;;  %v955_v32 = vrot.slane %v947_v36, 4  ;;  %v977_v62 = vsel %vm975_vm12, %v970_v15, %v8282_v19  ;;  %v11076_v36 = vld [vmem:[#allocation45_spill] sm:$0xff]  ;;  %v11077_v40 = vrot.slane %v11069_v48, %v7845_v58  ;;  %1492 = vmatpush1.msra.mxu0 %v8622_v63  ;;  %4590 = vrot.lane.b32.xlu0 %v7614_v24, %s7495_s20 }
 0x1d9   : > { %v958_v33 = vrot.slane %v950_v2, 4  ;;  %v2063_v17 = vrot.slane %v2055_v45, 4  ;;  %v978_v2 = vsel %vm975_vm12, %v11076_v36, %v970_v15  ;;  %v11078_v38 = vrot.slane %v11069_v48, %v7831_v54  ;;  %v11079_v45 = vld [vmem:[#allocation39_spill] sm:$0xff]  ;;  %v11082_v15 = vld [vmem:[#allocation40_spill] sm:$0xff]  ;;  %4632 = vrot.lane.b32.xlu1 %v7610_v20, %s7490_s21 }
 0x1da   : > { %v2064_v8 = vrot.slane %v2056_v52, 4  ;;  %963 = vst [vmem:[#allocation2 + $0x180] sm:$0xf0] %v955_v32  ;;  %v1789_v61 = vmul.f32 %v11077_v40, %v1760_v55  ;;  %v11080_v59 = vrot.slane %v11079_v45, %v7825_v51  ;;  %v11081_v5 = vrot.slane %v11079_v45, %v7845_v58  ;;  %v1448_v48 = vld [vmem:[#allocation2 + $0x1a8] sm:$0xff]  ;;  %v974_v55 = vpop.permute.xlu0 %973 }
 0x1db   : > { %966 = vst [vmem:[#allocation2 + $0x98] sm:$0xf0] %v958_v33  ;;  %2071 = vst [vmem:[#allocation2 + $0xa0] sm:$0xf0] %v2063_v17  ;;  %v1790_v4 = vmul.f32 %v11078_v38, %v1763_v34  ;;  %v11083_v1 = vrot.slane %v11082_v15, %v7836_v56  ;;  %v11084_v33 = vrot.slane %v11082_v15, %v7825_v51  ;;  %1493 = vmatprep.subr.mxu0 %v1448_v48  ;;  %v11085_v34 = vld [vmem:[#allocation10_spill] sm:$0xff]  ;;  %v11087_v38 = vld [vmem:[#allocation11_spill] sm:$0xff] }
 0x1dc   : > { %2072 = vst [vmem:[#allocation2 + $0x158] sm:$0xf0] %v2064_v8  ;;  %v1004_v52 = vmul.f32 %v11080_v59, %v978_v2  ;;  %v1005_v28 = vmul.f32 %v11081_v5, %v977_v62  ;;  %v2818_v8 = vpop.permute.xlu1 %2817  ;;  %1793 = vst [vmem:[#allocation2 + $0x148] sm:$0xf] %v1789_v61  ;;  %7263 = vmatmul.mubr.msk.f32.vlgmr.msra.gmra.mxu1 %vm1462_vm13, %v11085_v34  ;;  %v976_v61 = vsel %vm975_vm12, %v8282_v19, %v974_v55 }
 0x1dd   : > { %v2262_v32 = vmul.f32 %v11083_v1, %v978_v2  ;;  %v2263_v17 = vmul.f32 %v11084_v33, %v977_v62  ;;  %1794 = vst [vmem:[#allocation2 + $0x8] sm:$0xf] %v1790_v4  ;;  %v1447_v62 = vld [vmem:[#allocation2 + $0x80] sm:$0xff]  ;;  %v11086_v2 = vld [vmem:[#allocation12_spill] sm:$0xff]  ;;  %v2826_v59 = vsel %vm2823_vm14, %v11087_v38, %v2818_v8  ;;  %v11088_v4 = vld [vmem:[#allocation41_spill] sm:$0xff]  ;;  %4594 = vrot.lane.b32.xlu0 %v7616_v25, %s7495_s20 }
 0x1de   : > { %1008 = vst [vmem:[#allocation2 + $0x150] sm:$0xf] %v1004_v52  ;;  %1009 = vst [vmem:[#allocation2 + $0x108] sm:$0xf] %v1005_v28  ;;  %v2825_v40 = vsel %vm2823_vm14, %v2818_v8, %v11086_v2  ;;  %1494 = vmatpush1.msra.mxu0 %v1447_v62  ;;  %v11089_v52 = vrot.slane %v11088_v4, %v7825_v51  ;;  %v11090_v28 = vrot.slane %v11088_v4, %v7845_v58  ;;  %v11091_v33 = vld [vmem:[#allocation42_spill] sm:$0xff] }
 0x1df   : > { %2266 = vst [vmem:[#allocation2 + $0x128] sm:$0xf] %v2262_v32  ;;  %2267 = vst [vmem:[#allocation2 + $0x38] sm:$0xf] %v2263_v17  ;;  %v11092_v48 = vrot.slane %v11091_v33, %v7836_v56  ;;  %v11093_v19 = vrot.slane %v11091_v33, %v7825_v51  ;;  %v11094_v32 = vld [vmem:[#allocation43_spill] sm:$0xff]  ;;  %1495 = vmatprep.subr.mxu0 %v1444_v46  ;;  %v11100_v46 = vrot.slane %v11082_v15, %v7831_v54 }
 0x1e0   : > { %v2852_v5 = vmul.f32 %v11089_v52, %v2826_v59  ;;  %v2853_v1 = vmul.f32 %v11090_v28, %v2825_v40  ;;  %v11095_v17 = vrot.slane %v11094_v32, %v7836_v56  ;;  %v11096_v52 = vrot.slane %v11094_v32, %v7831_v54  ;;  %4636 = vrot.lane.b32.xlu1 %v7612_v21, %s7490_s21 }
 0x1e1   : > { %v3181_v8 = vmul.f32 %v11092_v48, %v2826_v59  ;;  %v3182_v63 = vmul.f32 %v11093_v19, %v2825_v40  ;;  %v979_v28 = vsel %vm975_vm12, %v974_v55, %v11076_v36  ;;  %v11097_v48 = vrot.slane %v11079_v45, %v7831_v54  ;;  %v1443_v19 = vld [vmem:[#allocation2 + $0xe0] sm:$0xff]  ;;  %v2822_v36 = vpop.permute.xlu1 %2821  ;;  %v814_v55 = vpop.permute.xlu0 %813  ;;  %4634 = vrot.lane.b32.xlu0 %v7614_v24, %s7490_s21 }
 0x1e2   : > { %v9074_v62 = vmul.f32 %v11095_v17, %v2825_v40  ;;  %v9079_v6 = vmul.f32 %v11096_v52, %v2826_v59  ;;  %v11098_v40 = vrot.slane %v11079_v45, %v7836_v56  ;;  %v11099_v59 = vrot.slane %v11082_v15, %v7845_v58  ;;  %1496 = vmatpush1.msra.mxu0 %v1443_v19 }
 0x1e3   : > { %v1006_v53 = vmul.f32 %v11097_v48, %v976_v61  ;;  %v3189_v0 = vrot.slane %v3181_v8, 4  ;;  %v3190_v7 = vrot.slane %v3182_v63, 4  ;;  %v2265_v8 = vmul.f32 %v11100_v46, %v979_v28  ;;  %7262 = vmatmul.mubr.msk.f32.vlgmr.msra.gmra.mxu0 %vm1462_vm13, %v11085_v34 }
 0x1e4   : > { %v1003_v17 = vmul.f32 %v11098_v40, %v979_v28  ;;  %v2264_v52 = vmul.f32 %v11099_v59, %v976_v61  ;;  %v2824_v45 = vsel %vm2823_vm14, %v11086_v2, %v2822_v36  ;;  %v2827_v63 = vsel %vm2823_vm14, %v2822_v36, %v11087_v38  ;;  %v11108_v36 = vld [vmem:[#allocation44_spill] sm:$0xff]  ;;  %4919 = vrot.lane.b32.xlu1 %v7610_v20, %s11025_s17 }
 0x1e5   : > { %1010 = vst [vmem:[#allocation2 + $0x60] sm:$0xf] %v1006_v53  ;;  %3197 = vst [vmem:[#allocation2 + $0x90] sm:$0xf0] %v3189_v0  ;;  %v11101_v53 = vrot.slane %v11088_v4, %v7836_v56  ;;  %v11102_v34 = vrot.slane %v11088_v4, %v7831_v54  ;;  %v11103_v2 = vrot.slane %v11091_v33, %v7845_v58  ;;  %v11105_v28 = vmov 0.0   ;;  %4638 = vrot.lane.b32.xlu0 %v7616_v25, %s7490_s21 }
 0x1e6   : > { %3198 = vst [vmem:[#allocation2 + $0xc0] sm:$0xf0] %v3190_v7  ;;  %1007 = vst [vmem:[#allocation2 + $0x120] sm:$0xf] %v1003_v17  ;;  %v11104_v0 = vrot.slane %v11091_v33, %v7831_v54  ;;  %1673 = vmatprep.mubr.f32.mxu0 %v11105_v28  ;;  %v11106_v48 = vrot.slane %v11094_v32, %v7825_v51  ;;  %v11107_v4 = vrot.slane %v11094_v32, %v7845_v58  ;;  %vm2354_vm14 = vcmask 97280  }
 0x1e7   : > { %2268 = vst [vmem:[#allocation2 + $0x88] sm:$0xf] %v2264_v52  ;;  %v9112_v15 = vmul.f32 %v11101_v53, %v2827_v63  ;;  %v9117_v61 = vmul.f32 %v11102_v34, %v2824_v45  ;;  %v3183_v38 = vmul.f32 %v11103_v2, %v2824_v45  ;;  %2269 = vst [vmem:[#allocation2 + $0x170] sm:$0xf] %v2265_v8  ;;  %1744 = vmatprep.mubr.f32.mxu1 %v11105_v28  ;;  %v818_v53 = vpop.permute.xlu0 %817  ;;  %v1081_v34 = vld [vmem:[#allocation2 + $0x108] sm:$0xff]  ;;  %v11111_v2 = vld [vmem:[#allocation46_spill] sm:$0xff] }
 0x1e8   : > { %v3184_v7 = vmul.f32 %v11104_v0, %v2827_v63  ;;  %v3994_v19 = vmul.f32 %v11106_v48, %v2824_v45  ;;  %v9132_v40 = vmul.f32 %v11107_v4, %v2827_v63  ;;  %v821_v17 = vsel %vm819_vm15, %v814_v55, %v8384_v3  ;;  %v2762_v63 = vpop.permute.xlu1 %2761  ;;  %v11114_v4 = vld [vmem:[#allocation14_spill] sm:$0xff]  ;;  %2857 = vst [vmem:[#allocation2 + $0x108] sm:$0xf] %v2853_v1 }
 0x1e9   : > { %v822_v33 = vsel %vm819_vm15, %v8326_v23, %v814_v55  ;;  %v3191_v59 = vrot.slane %v3183_v38, 4  ;;  %v11109_v46 = vrot.slane %v11108_v36, %v7825_v51  ;;  %v11110_v8 = vrot.slane %v11108_v36, %v7845_v58  ;;  %v1080_v55 = vld [vmem:[#allocation2 + $0x150] sm:$0xff]  ;;  %4923 = vrot.lane.b32.xlu1 %v7612_v21, %s11025_s17  ;;  %4921 = vrot.lane.b32.xlu0 %v7614_v24, %s11025_s17 }
 0x1ea   : > { %v3192_v52 = vrot.slane %v3184_v7, 4  ;;  %v11112_v0 = vrot.slane %v11111_v2, %v7836_v56  ;;  %v11113_v7 = vrot.slane %v11111_v2, %v7825_v51  ;;  %2856 = vst [vmem:[#allocation2 + $0x150] sm:$0xf] %v2852_v5  ;;  %1633 = vmatprep.subr.mxu0 %v1080_v55  ;;  %v11124_v55 = vld [vmem:[#allocation49_spill] sm:$0xff]  ;;  %vm4883_vm12 = vcmp.lt.s32.totalorder %v8097_v16, 100 }
 0x1eb   : > { %v848_v32 = vmul.f32 %v11109_v46, %v822_v33  ;;  %v849_v45 = vmul.f32 %v11110_v8, %v821_v17  ;;  %v2769_v46 = vsel %vm2767_vm0, %v2762_v63, %v11114_v4  ;;  %v11115_v8 = vld [vmem:[#allocation13_spill] sm:$0xff]  ;;  %3199 = vst [vmem:[#allocation2 + $0x178] sm:$0xf0] %v3191_v59  ;;  %v11121_v59 = vld [vmem:[#allocation48_spill] sm:$0xff] }
 0x1ec   : > { %v1979_v38 = vmul.f32 %v11112_v0, %v822_v33  ;;  %v1980_v48 = vmul.f32 %v11113_v7, %v821_v17  ;;  %v2770_v14 = vsel %vm2767_vm0, %v11115_v8, %v2762_v63  ;;  %v9165_v33 = vld [vmem:[#allocation2 + $0x38] sm:$0xff]  ;;  %v9167_v0 = vld [vmem:[#allocation2 + $0x128] sm:$0xff]  ;;  %3200 = vst [vmem:[#allocation2 + $0xc8] sm:$0xf0] %v3192_v52  ;;  %v11120_v63 = vrot.slane %v11118_v10, %v7845_v58 }
 0x1ed   : > { %11116 = vst [vmem:[#allocation37_spill] sm:$0xff] %v9165_v33  ;;  %11117 = vst [vmem:[#allocation45_spill] sm:$0xff] %v9167_v0  ;;  %v856_v17 = vrot.slane %v848_v32, 4  ;;  %v857_v7 = vrot.slane %v849_v45, 4  ;;  %v9172_v22 = vmul.f32 %v11119_v27, %v2770_v14  ;;  %v11122_v52 = vrot.slane %v11121_v59, %v7836_v56  ;;  %4991 = vrot.lane.b32.xlu1 %v7610_v20, %s7496_s30 }
 0x1ee   : > { %v9177_v5 = vmul.f32 %v11120_v63, %v2769_v46  ;;  %3998 = vst [vmem:[#allocation2 + $0x38] sm:$0xf] %v3994_v19  ;;  %3997 = vst [vmem:[#allocation2 + $0x128] sm:$0xf] %v9074_v62  ;;  %v1987_v1 = vrot.slane %v1979_v38, 4  ;;  %v1988_v11 = vrot.slane %v1980_v48, 4  ;;  %v11123_v45 = vrot.slane %v11121_v59, %v7825_v51  ;;  %4925 = vrot.lane.b32.xlu0 %v7616_v25, %s11025_s17 }
 0x1ef   : > { %v3150_v32 = vmul.f32 %v11122_v52, %v2770_v14  ;;  %864 = vst [vmem:[#allocation2 + $0x168] sm:$0xf0] %v856_v17  ;;  %865 = vst [vmem:[#allocation2 + $0x130] sm:$0xf0] %v857_v7  ;;  %v11125_v19 = vrot.slane %v11124_v55, %v7836_v56  ;;  %v11126_v38 = vrot.slane %v11124_v55, %v7831_v54  ;;  %v2766_v52 = vpop.permute.xlu1 %2765  ;;  %v1082_v17 = vld [vmem:[#allocation2 + $0x60] sm:$0xff]  ;;  %v870_v7 = vpop.permute.xlu0 %869 }
 0x1f0   : > { %v3151_v27 = vmul.f32 %v11123_v45, %v2769_v46  ;;  %1995 = vst [vmem:[#allocation2 + $0x10] sm:$0xf0] %v1987_v1  ;;  %1996 = vst [vmem:[#allocation2 + $0x100] sm:$0xf0] %v1988_v11  ;;  %v823_v45 = vsel %vm819_vm15, %v818_v53, %v8326_v23  ;;  %v2771_v11 = vsel %vm2767_vm0, %v2766_v52, %v11115_v8  ;;  %v1079_v1 = vld [vmem:[#allocation2 + $0x120] sm:$0xff]  ;;  %1704 = vmatprep.subr.mxu1 %v1082_v17 }
 0x1f1   : > { %v9191_v62 = vmul.f32 %v11125_v19, %v2769_v46  ;;  %v9196_v48 = vmul.f32 %v11126_v38, %v2770_v14  ;;  %3154 = vst [vmem:[#allocation2 + $0x90] sm:$0xf] %v3150_v32  ;;  %v820_v46 = vsel %vm819_vm15, %v8384_v3, %v818_v53  ;;  %v2768_v14 = vsel %vm2767_vm0, %v11114_v4, %v2766_v52  ;;  %v9215_v32 = vld [vmem:[#allocation2 + $0x88] sm:$0xff]  ;;  %v9217_v3 = vld [vmem:[#allocation2 + $0x170] sm:$0xff] }
 0x1f2   : > { %3155 = vst [vmem:[#allocation2 + $0xc0] sm:$0xf] %v3151_v27  ;;  %2858 = vst [vmem:[#allocation2 + $0x60] sm:$0xf] %v9117_v61  ;;  %v11129_v27 = vrot.slane %v11108_v36, %v7836_v56  ;;  %v11130_v4 = vrot.slane %v11108_v36, %v7831_v54  ;;  %1634 = vmatpush1.msra.mxu0 %v1079_v1  ;;  %v11131_v61 = vrot.slane %v11111_v2, %v7845_v58 }
 0x1f3   : > { %11127 = vst [vmem:[#allocation39_spill] sm:$0xff] %v9215_v32  ;;  %11128 = vst [vmem:[#allocation40_spill] sm:$0xff] %v9217_v3  ;;  %v11132_v52 = vrot.slane %v11111_v2, %v7831_v54  ;;  %v11133_v36 = vrot.slane %v11118_v10, %v7836_v56  ;;  %1705 = vmatpush1.msra.mxu1 %v1081_v34  ;;  %v11154_v0 = vrot.slane %v8324_v47, %v7836_v56 }
 0x1f4   : > { %v847_v19 = vmul.f32 %v11129_v27, %v823_v45  ;;  %v850_v38 = vmul.f32 %v11130_v4, %v820_v46  ;;  %2855 = vst [vmem:[#allocation2 + $0x120] sm:$0xf] %v9112_v15  ;;  %3999 = vst [vmem:[#allocation2 + $0x88] sm:$0xf] %v9132_v40  ;;  %v1981_v8 = vmul.f32 %v11131_v61, %v820_v46  ;;  %v2631_v61 = vpop.permute.xlu1 %2630  ;;  %4995 = vrot.lane.b32.xlu1 %v7612_v21, %s7496_s30 }
 0x1f5   : > { %4000 = vst [vmem:[#allocation2 + $0x170] sm:$0xf] %v9079_v6  ;;  %v1982_v27 = vmul.f32 %v11132_v52, %v823_v45  ;;  %v9239_v4 = vmul.f32 %v11133_v36, %v2771_v11  ;;  %v11134_v15 = vrot.slane %v11118_v10, %v7831_v54  ;;  %v11135_v46 = vrot.slane %v11121_v59, %v7845_v58  ;;  %v874_v10 = vpop.permute.xlu0 %873 }
 0x1f6   : > { %v855_v6 = vrot.slane %v847_v19, 4  ;;  %v858_v40 = vrot.slane %v850_v38, 4  ;;  %v11136_v45 = vrot.slane %v11121_v59, %v7831_v54  ;;  %v1989_v52 = vrot.slane %v1981_v8, 4  ;;  %4993 = vrot.lane.b32.xlu0 %v7614_v24, %s7496_s30 }
 0x1f7   : > { %v9244_v17 = vmul.f32 %v11134_v15, %v2768_v14  ;;  %v3152_v2 = vmul.f32 %v11135_v46, %v2768_v14  ;;  %v1990_v36 = vrot.slane %v1982_v27, 4  ;;  %v11137_v59 = vrot.slane %v11124_v55, %v7825_v51 }
 0x1f8   : > { %v3153_v1 = vmul.f32 %v11136_v45, %v2771_v11  ;;  %863 = vst [vmem:[#allocation2 + $0x50] sm:$0xf0] %v855_v6  ;;  %866 = vst [vmem:[#allocation2 + $0x48] sm:$0xf0] %v858_v40  ;;  %v11138_v8 = vrot.slane %v11124_v55, %v7845_v58  ;;  %v877_v15 = vsel %vm875_vm1, %v870_v7, %v8483_v57  ;;  %v11177_v33 = vrot.slane %v9177_v5, 4 }
 0x1f9   : > { %3156 = vst [vmem:[#allocation2 + $0x178] sm:$0xf] %v3152_v2  ;;  %v9263_v38 = vmul.f32 %v11137_v59, %v2768_v14  ;;  %v878_v6 = vsel %vm875_vm1, %v8424_v42, %v870_v7  ;;  %1997 = vst [vmem:[#allocation2 + $0x160] sm:$0xf0] %v1989_v52  ;;  %v11139_v40 = vrot.slane %v8324_v47, %v7825_v51  ;;  %v11179_v28 = vrot.slane %v9191_v62, 4 }
 0x1fa   : > { %3157 = vst [vmem:[#allocation2 + $0xc8] sm:$0xf] %v3153_v1  ;;  %v9268_v27 = vmul.f32 %v11138_v8, %v2771_v11  ;;  %1998 = vst [vmem:[#allocation2 + $0x20] sm:$0xf0] %v1990_v36  ;;  %v11140_v46 = vrot.slane %v8324_v47, %v7845_v58  ;;  %v11141_v11 = vrot.slane %v8339_v44, %v7836_v56  ;;  %v11143_v36 = vld [vmem:[#allocation16_spill] sm:$0xff]  ;;  %v11144_v8 = vld [vmem:[#allocation15_spill] sm:$0xff]  ;;  %4997 = vrot.lane.b32.xlu0 %v7616_v25, %s7496_s30 }
 0x1fb   : > { %v904_v14 = vmul.f32 %v11139_v40, %v878_v6  ;;  %v11142_v45 = vrot.slane %v8339_v44, %v7825_v51  ;;  %v2638_v59 = vsel %vm2636_vm2, %v2631_v61, %v11143_v36  ;;  %v2639_v40 = vsel %vm2636_vm2, %v11144_v8, %v2631_v61  ;;  %v11148_v61 = vld [vmem:[#allocation51_spill] sm:$0xff] }
 0x1fc   : > { %v905_v55 = vmul.f32 %v11140_v46, %v877_v15  ;;  %v2022_v2 = vmul.f32 %v11141_v11, %v878_v6  ;;  %v2635_v6 = vpop.permute.xlu1 %2634  ;;  %v714_v46 = vpop.permute.xlu0 %713  ;;  %v11149_v19 = vrot.slane %v11148_v61, %v7825_v51  ;;  %vm4827_vm15 = vcmp.lt.s32.totalorder %v8097_v16, 124 }
 0x1fd   : > { %v2023_v1 = vmul.f32 %v11142_v45, %v877_v15  ;;  %908 = vst [vmem:[#allocation2 + $0x110] sm:$0xf] %v904_v14  ;;  %v11145_v15 = vld [vmem:[#allocation50_spill] sm:$0xff]  ;;  %v11150_v14 = vrot.slane %v11148_v61, %v7845_v58  ;;  %vm4696_vm0 = vcmp.lt.s32.totalorder %v8097_v16, 28 }
 0x1fe   : > { %909 = vst [vmem:[#allocation2 + $0x118] sm:$0xf] %v905_v55  ;;  %2026 = vst [vmem:[#allocation2 + $0x70] sm:$0xf] %v2022_v2  ;;  %v11146_v11 = vrot.slane %v11145_v15, %v7845_v58  ;;  %v11147_v53 = vrot.slane %v11145_v15, %v7831_v54  ;;  %v3073_v34 = vmul.f32 %v11149_v19, %v2639_v40  ;;  %v11151_v2 = vld [vmem:[#allocation52_spill] sm:$0xff] }
 0x1ff   : > { %2027 = vst [vmem:[#allocation2 + $0x78] sm:$0xf] %v2023_v1  ;;  %v3074_v55 = vmul.f32 %v11150_v14, %v2638_v59  ;;  %v11152_v1 = vrot.slane %v11151_v2, %v7836_v56  ;;  %v876_v19 = vsel %vm875_vm1, %v8483_v57, %v874_v10  ;;  %v879_v14 = vsel %vm875_vm1, %v874_v10, %v8424_v42 }
 0x200   : > { %v9301_v45 = vmul.f32 %v11146_v11, %v2639_v40  ;;  %v9306_v52 = vmul.f32 %v11147_v53, %v2638_v59  ;;  %v11153_v53 = vrot.slane %v11151_v2, %v7825_v51  ;;  %v3081_v23 = vrot.slane %v3073_v34, 4  ;;  %v9352_v10 = vpop.permute.xlu0 %717 }
 0x201   : > { %v9319_v11 = vmul.f32 %v11152_v1, %v2639_v40  ;;  %v3082_v63 = vrot.slane %v3074_v55, 4  ;;  %v903_v40 = vmul.f32 %v11154_v0, %v879_v14  ;;  %v11155_v1 = vrot.slane %v8324_v47, %v7831_v54  ;;  %v2675_v47 = vpop.permute.xlu1 %2674 }
 0x202   : > { %v9324_v7 = vmul.f32 %v11153_v53, %v2638_v59  ;;  %v11156_v59 = vrot.slane %v8339_v44, %v7845_v58  ;;  %v11157_v57 = vrot.slane %v8339_v44, %v7831_v54  ;;  %v2637_v42 = vsel %vm2636_vm2, %v11143_v36, %v2635_v6  ;;  %3089 = vst [vmem:[#allocation2 + $0x1a8] sm:$0xf0] %v3081_v23 }
 0x203   : > { %v906_v20 = vmul.f32 %v11155_v1, %v876_v19  ;;  %v2640_v0 = vsel %vm2636_vm2, %v2635_v6, %v11144_v8  ;;  %3090 = vst [vmem:[#allocation2 + $0x1b8] sm:$0xf0] %v3082_v63  ;;  %907 = vst [vmem:[#allocation2 + $0x180] sm:$0xf] %v903_v40  ;;  %v11158_v44 = vrot.slane %v11145_v15, %v7836_v56  ;;  %vm4740_vm1 = vcmp.lt.s32.totalorder %v8097_v16, 4 }
 0x204   : > { %v2024_v53 = vmul.f32 %v11156_v59, %v876_v19  ;;  %v2025_v32 = vmul.f32 %v11157_v57, %v879_v14  ;;  %v11159_v36 = vrot.slane %v11145_v15, %v7825_v51  ;;  %v11160_v8 = vrot.slane %v11148_v61, %v7836_v56  ;;  %v11164_v59 = vld [vmem:[#allocation53_spill] sm:$0xff]  ;;  %v9416_v3 = vpop.permute.xlu0 %769 }
 0x205   : > { %910 = vst [vmem:[#allocation2 + $0x98] sm:$0xf] %v906_v20  ;;  %v9357_v34 = vmul.f32 %v11158_v44, %v2637_v42  ;;  %v11161_v23 = vrot.slane %v11148_v61, %v7831_v54  ;;  %v11162_v20 = vrot.slane %v11151_v2, %v7845_v58  ;;  %v11163_v15 = vrot.slane %v11151_v2, %v7831_v54  ;;  %v1076_v44 = vld [vmem:[#allocation2 + $0x110] sm:$0xff]  ;;  %v2679_v24 = vpop.permute.xlu1 %2678 }
 0x206   : > { %v9362_v55 = vmul.f32 %v11159_v36, %v2640_v0  ;;  %v3072_v6 = vmul.f32 %v11160_v8, %v2640_v0  ;;  %2028 = vst [vmem:[#allocation2 + $0xa0] sm:$0xf] %v2024_v53  ;;  %2029 = vst [vmem:[#allocation2 + $0x158] sm:$0xf] %v2025_v32  ;;  %v721_v61 = vsel %vm719_vm3, %v714_v46, %v8588_v30  ;;  %v9400_v36 = vld [vmem:[#allocation2 + $0x118] sm:$0xff]  ;;  %1635 = vmatprep.subr.mxu0 %v1076_v44 }
 0x207   : > { %v3075_v63 = vmul.f32 %v11161_v23, %v2637_v42  ;;  %v9375_v19 = vmul.f32 %v11162_v20, %v2637_v42  ;;  %v9380_v14 = vmul.f32 %v11163_v15, %v2640_v0  ;;  %v722_v40 = vsel %vm719_vm3, %v8527_v50, %v714_v46  ;;  %v9398_v0 = vld [vmem:[%s10842_s6] sm:$0xf]  ;;  %v9402_v46 = vld [vmem:[#allocation2 + $0x70] sm:$0xff]  ;;  %v11168_v8 = vld [vmem:[#allocation54_spill] sm:$0xff]  ;;  %2813 = vst [vmem:[#allocation2 + $0x118] sm:$0xf0] %v11177_v33 }
 0x208   : > { %v3080_v32 = vrot.slane %v3072_v6, 4  ;;  %v11165_v53 = vrot.slane %v11164_v59, %v7825_v51  ;;  %v11166_v2 = vrot.slane %v11164_v59, %v7845_v58  ;;  %11167 = vst [vmem:[#allocation10_spill] sm:$0xff] %v9402_v46  ;;  %v11169_v6 = vrot.slane %v11168_v8, %v7836_v56  ;;  %v11171_v15 = vld [vmem:[#allocation33_spill] sm:$0xff]  ;;  %5278 = vrot.lane.b32.xlu1 %v9398_v0, %s11025_s17  ;;  %v11183_v33 = vld [vmem:[#allocation18_spill] sm:$0xff] }
 0x209   : > { %v3083_v1 = vrot.slane %v3075_v63, 4  ;;  %v11170_v63 = vrot.slane %v11168_v8, %v7825_v51  ;;  %3800 = vst [vmem:[#allocation2 + $0x70] sm:$0xf0] %v11179_v28  ;;  %v11184_v28 = vrot.slane %v9263_v38, 4  ;;  %5880 = vrot.lane.b32.xlu0 %v9398_v0, %s7484_s25  ;;  %vm4596_vm2 = vcmp.lt.s32.totalorder %v8097_v16, 36 }
 0x20a   : > { %v748_v57 = vmul.f32 %v11165_v53, %v722_v40  ;;  %v749_v42 = vmul.f32 %v11166_v2, %v721_v61  ;;  %v1905_v23 = vmul.f32 %v11169_v6, %v722_v40  ;;  %v2682_v53 = vsel %vm2680_vm4, %v2675_v47, %v11171_v15  ;;  %v11172_v2 = vld [vmem:[#allocation17_spill] sm:$0xff]  ;;  %v9421_v40 = vld [vmem:[#allocation2 + $0x78] sm:$0xff]  ;;  %v11174_v6 = vld [vmem:[#allocation19_spill] sm:$0xff]  ;;  %3088 = vst [vmem:[#allocation2 + $0x80] sm:$0xf0] %v3080_v32 }
 0x20b   : > { %v1906_v20 = vmul.f32 %v11170_v63, %v721_v61  ;;  %v2683_v21 = vsel %vm2680_vm4, %v11172_v2, %v2675_v47  ;;  %11173 = vst [vmem:[#allocation12_spill] sm:$0xff] %v9421_v40  ;;  %2756 = vst [vmem:[#allocation2 + $0x110] sm:$0xf] %v11174_v6  ;;  %v11175_v61 = vld [vmem:[#allocation22_spill] sm:$0xff]  ;;  %v11176_v63 = vrot.slane %v9172_v22, 4  ;;  %v11178_v47 = vld [vmem:[#allocation23_spill] sm:$0xff] }
 0x20c   : > { %2757 = vst [vmem:[#allocation2 + $0x118] sm:$0xf] %v11175_v61  ;;  %3757 = vst [vmem:[#allocation2 + $0x70] sm:$0xf] %v11178_v47  ;;  %v756_v46 = vrot.slane %v748_v57, 4  ;;  %v757_v9 = vrot.slane %v749_v42, 4  ;;  %6143 = vrot.lane.b32.xlu1 %v9398_v0, %s7490_s21 }
 0x20d   : > { %2812 = vst [vmem:[#allocation2 + $0x110] sm:$0xf0] %v11176_v63  ;;  %3091 = vst [vmem:[#allocation2 + $0x28] sm:$0xf0] %v3083_v1  ;;  %v11180_v40 = vld [vmem:[#allocation55_spill] sm:$0xff]  ;;  %v1913_v5 = vrot.slane %v1905_v23, 4 }
 0x20e   : > { %v11181_v6 = vrot.slane %v11180_v40, %v7845_v58  ;;  %v11182_v22 = vrot.slane %v11180_v40, %v7831_v54  ;;  %3758 = vst [vmem:[#allocation2 + $0x78] sm:$0xf] %v11183_v33  ;;  %3801 = vst [vmem:[#allocation2 + $0x78] sm:$0xf0] %v11184_v28  ;;  %v1914_v62 = vrot.slane %v1906_v20, 4  ;;  %v11185_v32 = vld [vmem:[#allocation56_spill] sm:$0xff] }
 0x20f   : > { %v11186_v1 = vrot.slane %v11185_v32, %v7825_v51  ;;  %v11187_v42 = vrot.slane %v11185_v32, %v7845_v58  ;;  %764 = vst [vmem:[#allocation2 + $0x1b0] sm:$0xf0] %v756_v46  ;;  %765 = vst [vmem:[#allocation2 + $0xd8] sm:$0xf0] %v757_v9  ;;  %v1075_v33 = vld [vmem:[#allocation2 + $0x180] sm:$0xff]  ;;  %v1078_v28 = vld [vmem:[#allocation2 + $0x98] sm:$0xff]  ;;  %v720_v9 = vsel %vm719_vm3, %v8588_v30, %v9352_v10 }
 0x210   : > { %v9435_v31 = vmul.f32 %v11181_v6, %v2683_v21  ;;  %v9440_v61 = vmul.f32 %v11182_v22, %v2682_v53  ;;  %v11188_v6 = vld [vmem:[#allocation57_spill] sm:$0xff]  ;;  %1921 = vst [vmem:[#allocation2 + $0x40] sm:$0xf0] %v1913_v5  ;;  %1922 = vst [vmem:[#allocation2 + $0xa8] sm:$0xf0] %v1914_v62  ;;  %v2681_v46 = vsel %vm2680_vm4, %v11171_v15, %v2679_v24  ;;  %v9479_v5 = vpop.permute.xlu1 %2530  ;;  %v9481_v62 = vpop.permute.xlu0 %773  ;;  %v9485_v30 = vld [vmem:[#allocation2 + $0xa0] sm:$0xff]  ;;  %1706 = vmatprep.subr.mxu1 %v1078_v28 }
 0x211   : > { %v3116_v57 = vmul.f32 %v11186_v1, %v2683_v21  ;;  %v3117_v63 = vmul.f32 %v11187_v42, %v2682_v53  ;;  %v11189_v38 = vrot.slane %v11188_v6, %v7836_v56  ;;  %v11190_v23 = vrot.slane %v11188_v6, %v7825_v51  ;;  %v9487_v1 = vld [vmem:[#allocation2 + $0x158] sm:$0xff]  ;;  %1636 = vmatpush1.msra.mxu0 %v1075_v33 }
 0x212   : > { %v11193_v15 = vrot.slane %v9239_v4, 4  ;;  %v11195_v42 = vrot.slane %v11164_v59, %v7836_v56  ;;  %v7336_v4 = vld [vmem:[%s10844_s8 + $0x8] sm:$0xf]  ;;  %v11202_v33 = vrot.slane %v11168_v8, %v7831_v54  ;;  %1707 = vmatpush1.msra.mxu1 %v9400_v36  ;;  %v11209_v0 = vrot.slane %v11188_v6, %v7845_v58  ;;  %v11219_v47 = vld [vmem:[#allocation30_spill] sm:$0xff] }
 0x213   : > { %v9458_v22 = vmul.f32 %v11189_v38, %v2683_v21  ;;  %v9463_v20 = vmul.f32 %v11190_v23, %v2682_v53  ;;  %3120 = vst [vmem:[#allocation2 + $0xf8] sm:$0xf] %v3116_v57  ;;  %3121 = vst [vmem:[#allocation2 + $0x190] sm:$0xf] %v3117_v63  ;;  %v723_v21 = vsel %vm719_vm3, %v9352_v10, %v8527_v50  ;;  %v11191_v50 = vld [vmem:[#allocation24_spill] sm:$0xff]  ;;  %6307 = vperm.xlu1 %7450, %v7336_v4   ;;  %v11222_v57 = vld [vmem:[#allocation35_spill] sm:$0xff] }
 0x214   : > { %v2684_v53 = vsel %vm2680_vm4, %v2679_v24, %v11172_v2  ;;  %2755 = vst [vmem:[#allocation2 + $0x180] sm:$0xf] %v11191_v50  ;;  %v11192_v10 = vld [vmem:[#allocation20_spill] sm:$0xff]  ;;  %2811 = vst [vmem:[#allocation2 + $0x180] sm:$0xf0] %v11193_v15  ;;  %v11194_v24 = vrot.slane %v9244_v17, 4  ;;  %v747_v63 = vmul.f32 %v11195_v42, %v723_v21  ;;  %v11196_v38 = vrot.slane %v11164_v59, %v7831_v54 }
 0x215   : > { %2758 = vst [vmem:[#allocation2 + $0x98] sm:$0xf] %v11192_v10  ;;  %v11197_v17 = vld [vmem:[#allocation25_spill] sm:$0xff]  ;;  %v11199_v10 = vrot.slane %v9268_v27, 4  ;;  %v11200_v15 = vrot.slane %v9196_v48, 4  ;;  %v11201_v59 = vrot.slane %v11168_v8, %v7845_v58  ;;  %v1908_v28 = vmul.f32 %v11202_v33, %v723_v21  ;;  %v9545_v33 = vpop.permute.xlu0 %668 }
 0x216   : > { %2814 = vst [vmem:[#allocation2 + $0x98] sm:$0xf0] %v11194_v24  ;;  %v750_v23 = vmul.f32 %v11196_v38, %v720_v9  ;;  %3759 = vst [vmem:[#allocation2 + $0xa0] sm:$0xf] %v11197_v17  ;;  %v11198_v50 = vld [vmem:[#allocation21_spill] sm:$0xff]  ;;  %v11203_v42 = vrot.slane %v11180_v40, %v7836_v56  ;;  %v11204_v27 = vrot.slane %v11180_v40, %v7825_v51  ;;  %v755_v48 = vrot.slane %v747_v63, 4 }
 0x217   : > { %3760 = vst [vmem:[#allocation2 + $0x158] sm:$0xf] %v11198_v50  ;;  %3802 = vst [vmem:[#allocation2 + $0xa0] sm:$0xf0] %v11199_v10  ;;  %v1907_v24 = vmul.f32 %v11201_v59, %v720_v9  ;;  %v11205_v8 = vrot.slane %v11185_v32, %v7836_v56  ;;  %v11206_v50 = vrot.slane %v11185_v32, %v7831_v54  ;;  %v7375_v40 = vld [vmem:[%s10844_s8 + $0xc] sm:$0xf]  ;;  %v9543_v59 = vpop.permute.xlu1 %2534 }
 0x218   : > { %3803 = vst [vmem:[#allocation2 + $0x158] sm:$0xf0] %v11200_v15  ;;  %v9521_v38 = vmul.f32 %v11203_v42, %v2681_v46  ;;  %v9526_v17 = vmul.f32 %v11204_v27, %v2684_v53  ;;  %v758_v9 = vrot.slane %v750_v23, 4  ;;  %v1916_v15 = vrot.slane %v1908_v28, 4  ;;  %v9548_v32 = vld [vmem:[#allocation2 + $0x110] sm:$0xff]  ;;  %v9550_v42 = vld [vmem:[#allocation2 + $0x118] sm:$0xff]  ;;  %6327 = vperm.xlu0 %7449, %v7375_v40  }
 0x219   : > { %v3115_v21 = vmul.f32 %v11205_v8, %v2684_v53  ;;  %v3118_v10 = vmul.f32 %v11206_v50, %v2681_v46  ;;  %v1915_v36 = vrot.slane %v1907_v24, 4  ;;  %11207 = vst [vmem:[#allocation11_spill] sm:$0xff] %v9548_v32  ;;  %11208 = vst [vmem:[#allocation41_spill] sm:$0xff] %v9550_v42  ;;  %v9555_v24 = vmul.f32 %v11209_v0, %v2681_v46  ;;  %v9572_v46 = vld [vmem:[#allocation2 + $0x78] sm:$0xff]  ;;  %v11221_v63 = vld [vmem:[#allocation36_spill] sm:$0xff] }
 0x21a   : > { %763 = vst [vmem:[#allocation2 + $0xb0] sm:$0xf0] %v755_v48  ;;  %766 = vst [vmem:[#allocation2 + $0x18] sm:$0xf0] %v758_v9  ;;  %v11210_v28 = vrot.slane %v11188_v6, %v7831_v54  ;;  %v777_v8 = vsel %vm775_vm5, %v9416_v3, %v8694_v37  ;;  %v778_v4 = vsel %vm775_vm5, %v8637_v60, %v9416_v3  ;;  %v11211_v48 = vld [vmem:[#allocation26_spill] sm:$0xff]  ;;  %v11212_v9 = vld [vmem:[#allocation29_spill] sm:$0xff] }
 0x21b   : > { %3119 = vst [vmem:[#allocation2 + $0xe8] sm:$0xf] %v3115_v21  ;;  %3122 = vst [vmem:[#allocation2 + $0xb8] sm:$0xf] %v3118_v10  ;;  %v9574_v21 = vld [vmem:[#allocation2 + $0x70] sm:$0xff]  ;;  %v4571_v6 = vld [vmem:[%s10847_s11] sm:$0xff]  ;;  %v11216_v3 = vrot.slane %v8525_v12, %v7845_v58  ;;  %v11217_v0 = vrot.slane %v8540_v18, %v7836_v56 }
 0x21c   : > { %v9560_v27 = vmul.f32 %v11210_v28, %v2684_v53  ;;  %4816 = vst [vmem:[#allocation2 + $0x110] sm:$0xf] %v11211_v48  ;;  %4817 = vst [vmem:[#allocation2 + $0x118] sm:$0xf] %v11212_v9  ;;  %v11215_v53 = vrot.slane %v8525_v12, %v7825_v51  ;;  %v11218_v48 = vrot.slane %v8540_v18, %v7825_v51  ;;  %v9634_v2 = vld [vmem:[#allocation2 + $0x180] sm:$0xff]  ;;  %4574 = vperm.xlu1 %7450, %v4571_v6  }
 0x21d   : > { %11213 = vst [vmem:[#allocation42_spill] sm:$0xff] %v9572_v46  ;;  %11214 = vst [vmem:[#allocation43_spill] sm:$0xff] %v9574_v21  ;;  %v805_v10 = vmul.f32 %v11216_v3, %v777_v8  ;;  %v1948_v28 = vmul.f32 %v11217_v0, %v778_v4  ;;  %v2538_v3 = vsel %vm2536_vm6, %v9479_v5, %v11221_v63  ;;  %v11235_v21 = vld [vmem:[#allocation28_spill] sm:$0xff]  ;;  %vm4640_vm3 = vcmp.lt.s32.totalorder %v8097_v16, 32 }
 0x21e   : > { %1923 = vst [vmem:[#allocation2 + $0xd0] sm:$0xf0] %v1915_v36  ;;  %1924 = vst [vmem:[#allocation2 + $0x1a0] sm:$0xf0] %v1916_v15  ;;  %v804_v50 = vmul.f32 %v11215_v53, %v778_v4  ;;  %v1949_v9 = vmul.f32 %v11218_v48, %v777_v8  ;;  %v11220_v36 = vld [vmem:[#allocation32_spill] sm:$0xff]  ;;  %v2539_v4 = vsel %vm2536_vm6, %v11222_v57, %v9479_v5  ;;  %v9603_v8 = vld [vmem:[#allocation2 + $0xf8] sm:$0xff] }
 0x21f   : > { %5818 = vst [vmem:[#allocation2 + $0x78] sm:$0xf] %v11219_v47  ;;  %5817 = vst [vmem:[#allocation2 + $0x70] sm:$0xf] %v11220_v36  ;;  %v9605_v47 = vld [vmem:[#allocation2 + $0x190] sm:$0xff]  ;;  %v11224_v0 = vrot.slane %v8545_v35, %v7845_v58  ;;  %v11225_v36 = vrot.slane %v8545_v35, %v7831_v54  ;;  %v11226_v5 = vrot.slane %v8560_v41, %v7825_v51  ;;  %v9632_v15 = vld [vmem:[#allocation2 + $0x98] sm:$0xff] }
 0x220   : > { %11223 = vst [vmem:[#allocation44_spill] sm:$0xff] %v9605_v47  ;;  %808 = vst [vmem:[#allocation2 + $0x168] sm:$0xf] %v804_v50  ;;  %v11227_v50 = vrot.slane %v8560_v41, %v7845_v58  ;;  %v779_v6 = vsel %vm775_vm5, %v9481_v62, %v8637_v60  ;;  %v11239_v60 = vrot.slane %v8525_v12, %v7831_v54  ;;  %vm4927_vm4 = vcmp.lt.s32.totalorder %v8097_v16, 96 }
 0x221   : > { %809 = vst [vmem:[#allocation2 + $0x130] sm:$0xf] %v805_v10  ;;  %1952 = vst [vmem:[#allocation2 + $0x10] sm:$0xf] %v1948_v28  ;;  %v9610_v48 = vmul.f32 %v11224_v0, %v2539_v4  ;;  %v9615_v53 = vmul.f32 %v11225_v36, %v2538_v3  ;;  %v2999_v40 = vmul.f32 %v11226_v5, %v2539_v4  ;;  %v6807_v28 = vld [vmem:[%s10847_s11] sm:$0xff]  ;;  %v9628_v0 = vpop.permute.xlu0 %672  ;;  %v11231_v5 = vld [vmem:[#allocation58_spill] sm:$0xff] }
 0x222   : > { %1953 = vst [vmem:[#allocation2 + $0x100] sm:$0xf] %v1949_v9  ;;  %v3000_v10 = vmul.f32 %v11227_v50, %v2538_v3  ;;  %v9626_v9 = vpop.permute.xlu1 %2574  ;;  %5184 = vst [vmem:[#allocation2 + $0xf8] sm:$0xf0] %v7633_v29  ;;  %v11228_v36 = vld [vmem:[#allocation7_spill] sm:$0xff]  ;;  %v11232_v50 = vrot.slane %v11231_v5, %v7836_v56  ;;  %v11233_v23 = vrot.slane %v11231_v5, %v7825_v51  ;;  %6810 = vperm.xlu0 %7449, %v6807_v28  }
 0x223   : > { %5185 = vst [vmem:[#allocation2 + $0x190] sm:$0xf0] %v11228_v36  ;;  %11229 = vst [vmem:[#allocation46_spill] sm:$0xff] %v9632_v15  ;;  %v776_v29 = vsel %vm775_vm5, %v8694_v37, %v9481_v62  ;;  %v11234_v36 = vld [vmem:[#allocation27_spill] sm:$0xff]  ;;  %v11238_v37 = vrot.slane %v8525_v12, %v7836_v56  ;;  %v2540_v12 = vsel %vm2536_vm6, %v9543_v59, %v11222_v57  ;;  %vm4999_vm5 = vcmp.lt.s32.totalorder %v8097_v16, 92 }
 0x224   : > { %11230 = vst [vmem:[#allocation14_spill] sm:$0xff] %v9634_v2  ;;  %v9639_v44 = vmul.f32 %v11232_v50, %v2539_v4  ;;  %v9644_v25 = vmul.f32 %v11233_v23, %v2538_v3  ;;  %4818 = vst [vmem:[#allocation2 + $0x98] sm:$0xf] %v11234_v36  ;;  %v9656_v4 = vld [vmem:[#allocation2 + $0x158] sm:$0xff]  ;;  %v9658_v50 = vld [vmem:[#allocation2 + $0xa0] sm:$0xff]  ;;  %v3007_v3 = vrot.slane %v2999_v40, 4  ;;  %v806_v62 = vmul.f32 %v11239_v60, %v776_v29 }
 0x225   : > { %4815 = vst [vmem:[#allocation2 + $0x180] sm:$0xf] %v11235_v21  ;;  %11236 = vst [vmem:[#allocation13_spill] sm:$0xff] %v9656_v4  ;;  %v7147_v23 = vld [vmem:[%s10850_s14 + $0x8] sm:$0xff]  ;;  %v3008_v46 = vrot.slane %v3000_v10, 4  ;;  %v803_v42 = vmul.f32 %v11238_v37, %v779_v6  ;;  %v11240_v36 = vld [vmem:[#allocation31_spill] sm:$0xff]  ;;  %v11243_v40 = vrot.slane %v8540_v18, %v7831_v54  ;;  %v2537_v37 = vsel %vm2536_vm6, %v11221_v63, %v9543_v59 }
 0x226   : > { %11237 = vst [vmem:[#allocation47_spill] sm:$0xff] %v9658_v50  ;;  %5820 = vst [vmem:[#allocation2 + $0x158] sm:$0xf] %v11240_v36  ;;  %v11241_v21 = vld [vmem:[#allocation34_spill] sm:$0xff]  ;;  %v11242_v50 = vrot.slane %v8540_v18, %v7845_v58  ;;  %v11244_v18 = vrot.slane %v8545_v35, %v7836_v56  ;;  %v11245_v63 = vrot.slane %v8545_v35, %v7825_v51  ;;  %v9709_v35 = vld [vmem:[#allocation2 + $0xe8] sm:$0xff]  ;;  %7155 = vperm.xlu1 %7450, %v7147_v23   ;;  %vm4256_vm6 = vcmask 31744  }
 0x227   : > { %5819 = vst [vmem:[#allocation2 + $0xa0] sm:$0xf] %v11241_v21  ;;  %v1951_v10 = vmul.f32 %v11243_v40, %v779_v6  ;;  %3015 = vst [vmem:[#allocation2 + $0x188] sm:$0xf0] %v3007_v3  ;;  %v11246_v57 = vrot.slane %v8560_v41, %v7836_v56  ;;  %v11247_v28 = vrot.slane %v8560_v41, %v7831_v54  ;;  %v9705_v3 = vpop.permute.xlu0 %2576  ;;  %v9707_v60 = vld [vmem:[#allocation2 + $0xb8] sm:$0xff]  ;;  %v11251_v23 = vld [vmem:[#allocation9_spill] sm:$0xff] }
 0x228   : > { %v1950_v4 = vmul.f32 %v11242_v50, %v776_v29  ;;  %3016 = vst [vmem:[#allocation2 + $0x138] sm:$0xf0] %v3008_v46  ;;  %807 = vst [vmem:[#allocation2 + $0x50] sm:$0xf] %v803_v42  ;;  %v9689_v29 = vmul.f32 %v11244_v18, %v2537_v37  ;;  %v9694_v6 = vmul.f32 %v11245_v63, %v2540_v12  ;;  %v7146_v42 = vld [vmem:[%s10850_s14] sm:$0xff]  ;;  %v2579_v50 = vpop.permute.xlu1 %2578  ;;  %v11250_v18 = vld [vmem:[#allocation64_spill] sm:$0xff] }
 0x229   : > { %810 = vst [vmem:[#allocation2 + $0x48] sm:$0xf] %v806_v62  ;;  %v2998_v59 = vmul.f32 %v11246_v57, %v2540_v12  ;;  %v3001_v46 = vmul.f32 %v11247_v28, %v2537_v37  ;;  %1955 = vst [vmem:[#allocation2 + $0x20] sm:$0xf] %v1951_v10  ;;  %v11248_v62 = vrot.slane %v11231_v5, %v7845_v58  ;;  %v11252_v10 = vld [vmem:[#allocation8_spill] sm:$0xff]  ;;  %v11253_v57 = vld [vmem:[#allocation59_spill] sm:$0xff]  ;;  %7150 = vperm.xlu0 %7449, %v7146_v42  }
 0x22a   : > { %1954 = vst [vmem:[#allocation2 + $0x160] sm:$0xf] %v1950_v4  ;;  %v11249_v41 = vrot.slane %v11231_v5, %v7831_v54  ;;  %v678_v40 = vsel %vm676_vm7, %v9545_v33, %v8791_v39  ;;  %v679_v4 = vsel %vm676_vm7, %v11250_v18, %v9545_v33  ;;  %5186 = vst [vmem:[#allocation2 + $0xb8] sm:$0xf0] %v11251_v23  ;;  %v9738_v2 = vld [vmem:[#allocation2 + $0x130] sm:$0xff]  ;;  %v11256_v23 = vld [vmem:[#allocation60_spill] sm:$0xff] }
 0x22b   : > { %v9714_v36 = vmul.f32 %v11248_v62, %v2537_v37  ;;  %5183 = vst [vmem:[#allocation2 + $0xe8] sm:$0xf0] %v11252_v10  ;;  %v3006_v37 = vrot.slane %v2998_v59, 4  ;;  %v3009_v63 = vrot.slane %v3001_v46, 4  ;;  %v11254_v5 = vrot.slane %v11253_v57, %v7825_v51  ;;  %v9740_v33 = vld [vmem:[#allocation2 + $0x10] sm:$0xff]  ;;  %v9756_v47 = vld [vmem:[#allocation2 + $0x100] sm:$0xff] }
 0x22c   : > { %v9719_v21 = vmul.f32 %v11249_v41, %v2540_v12  ;;  %v11255_v28 = vrot.slane %v11253_v57, %v7845_v58  ;;  %v1072_v41 = vld [vmem:[#allocation2 + $0x168] sm:$0xff]  ;;  %v11257_v10 = vrot.slane %v11256_v23, %v7836_v56  ;;  %v11258_v46 = vrot.slane %v11256_v23, %v7825_v51  ;;  %2670 = vst [vmem:[#allocation2 + $0x130] sm:$0xf] %v9301_v45  ;;  %v11265_v45 = vld [vmem:[#allocation62_spill] sm:$0xff] }
 0x22d   : > { %v704_v12 = vmul.f32 %v11254_v5, %v679_v4  ;;  %v11259_v5 = vld [vmem:[#allocation38_spill] sm:$0xff]  ;;  %v677_v32 = vsel %vm676_vm7, %v8791_v39, %v9628_v0  ;;  %2669 = vst [vmem:[#allocation2 + $0x168] sm:$0xf] %v9362_v55  ;;  %3683 = vst [vmem:[#allocation2 + $0x10] sm:$0xf] %v9319_v11  ;;  %v11263_v39 = vld [vmem:[#allocation61_spill] sm:$0xff]  ;;  %1637 = vmatprep.subr.mxu0 %v1072_v41 }
 0x22e   : > { %v705_v62 = vmul.f32 %v11255_v28, %v678_v40  ;;  %v1874_v59 = vmul.f32 %v11257_v10, %v679_v4  ;;  %v1875_v15 = vmul.f32 %v11258_v46, %v678_v40  ;;  %v2583_v28 = vsel %vm2580_vm8, %v11259_v5, %v9626_v9  ;;  %3014 = vst [vmem:[#allocation2 + $0xe0] sm:$0xf0] %v3006_v37  ;;  %v9784_v37 = vpop.permute.xlu1 %2861 }
 0x22f   : > { %v11260_v4 = vrot.slane %v9526_v17, 4  ;;  %v11261_v40 = vrot.slane %v9435_v31, 4  ;;  %v11262_v10 = vrot.slane %v9458_v22, 4  ;;  %3017 = vst [vmem:[#allocation2 + $0x140] sm:$0xf0] %v3009_v63  ;;  %v11264_v55 = vrot.slane %v11263_v39, %v7845_v58  ;;  %v11267_v31 = vld [vmem:[#allocation63_spill] sm:$0xff]  ;;  %v2860_v63 = vpop.permute.xlu0 %2859 }
 0x230   : > { %708 = vst [vmem:[#allocation2 + $0x1b0] sm:$0xf] %v704_v12  ;;  %709 = vst [vmem:[#allocation2 + $0xd8] sm:$0xf] %v705_v62  ;;  %v11266_v17 = vrot.slane %v11265_v45, %v7825_v51  ;;  %v680_v22 = vsel %vm676_vm7, %v9628_v0, %v11250_v18  ;;  %v11269_v12 = vrot.slane %v9463_v20, 4  ;;  %v11270_v62 = vrot.slane %v11253_v57, %v7836_v56 }
 0x231   : > { %2725 = vst [vmem:[#allocation2 + $0x168] sm:$0xf0] %v11260_v4  ;;  %2726 = vst [vmem:[#allocation2 + $0x130] sm:$0xf0] %v11261_v40  ;;  %v9770_v42 = vmul.f32 %v11264_v55, %v2583_v28  ;;  %v11268_v4 = vrot.slane %v11267_v31, %v7836_v56  ;;  %v11271_v40 = vrot.slane %v11253_v57, %v7831_v54  ;;  %v1071_v55 = vld [vmem:[#allocation2 + $0x50] sm:$0xff] }
 0x232   : > { %3726 = vst [vmem:[#allocation2 + $0x10] sm:$0xf0] %v11262_v10  ;;  %v3042_v46 = vmul.f32 %v11266_v17, %v2583_v28  ;;  %3684 = vst [vmem:[#allocation2 + $0x100] sm:$0xf] %v9324_v7  ;;  %v11272_v0 = vrot.slane %v11256_v23, %v7845_v58  ;;  %v11273_v7 = vrot.slane %v11256_v23, %v7831_v54  ;;  %v1074_v17 = vld [vmem:[#allocation2 + $0x48] sm:$0xff]  ;;  %1638 = vmatpush1.msra.mxu0 %v1071_v55 }
 0x233   : > { %v9778_v11 = vmul.f32 %v11268_v4, %v2583_v28  ;;  %3727 = vst [vmem:[#allocation2 + $0x100] sm:$0xf0] %v11269_v12  ;;  %1878 = vst [vmem:[#allocation2 + $0x40] sm:$0xf] %v1874_v59  ;;  %v703_v28 = vmul.f32 %v11270_v62, %v680_v22  ;;  %v706_v10 = vmul.f32 %v11271_v40, %v677_v32  ;;  %v2618_v20 = vrot.slane %v9770_v42, 4  ;;  %v9826_v12 = vld [vmem:[#allocation2 + $0x20] sm:$0xff] }
 0x234   : > { %1879 = vst [vmem:[#allocation2 + $0xa8] sm:$0xf] %v1875_v15  ;;  %v1876_v18 = vmul.f32 %v11272_v0, %v677_v32  ;;  %v1877_v41 = vmul.f32 %v11273_v7, %v680_v22  ;;  %3046 = vst [vmem:[#allocation2 + $0x1a8] sm:$0xf] %v3042_v46  ;;  %v2584_v59 = vsel %vm2580_vm8, %v2579_v50, %v11259_v5  ;;  %v9824_v22 = vld [vmem:[#allocation2 + $0x160] sm:$0xff]  ;;  %v11277_v62 = vrot.slane %v9521_v38, 4  ;;  %v2866_v0 = vpop.permute.xlu1 %2865 }
 0x235   : > { %v3644_v15 = vrot.slane %v9778_v11, 4  ;;  %v2581_v57 = vsel %vm2580_vm8, %v9705_v3, %v2579_v50  ;;  %707 = vst [vmem:[#allocation2 + $0xb0] sm:$0xf] %v703_v28  ;;  %710 = vst [vmem:[#allocation2 + $0x18] sm:$0xf] %v706_v10  ;;  %v11274_v32 = vrot.slane %v11263_v39, %v7825_v51  ;;  %v11275_v42 = vrot.slane %v11265_v45, %v7836_v56 }
 0x236   : > { %1880 = vst [vmem:[#allocation2 + $0xd0] sm:$0xf] %v1876_v18  ;;  %1881 = vst [vmem:[#allocation2 + $0x1a0] sm:$0xf] %v1877_v41  ;;  %v11276_v5 = vrot.slane %v11267_v31, %v7831_v54  ;;  %v2582_v50 = vsel %vm2580_vm8, %v9626_v9, %v9705_v3  ;;  %v11278_v28 = vrot.slane %v9440_v61, 4  ;;  %1708 = vmatprep.subr.mxu1 %v1074_v17  ;;  %v2864_v18 = vpop.permute.xlu0 %2863  ;;  %v11283_v7 = vrot.slane %v9555_v24, 4 }
 0x237   : > { %v2609_v23 = vmul.f32 %v11274_v32, %v2584_v59  ;;  %v3041_v46 = vmul.f32 %v11275_v42, %v2584_v59  ;;  %2668 = vst [vmem:[#allocation2 + $0x50] sm:$0xf] %v9357_v34  ;;  %2671 = vst [vmem:[#allocation2 + $0x48] sm:$0xf] %v9306_v52  ;;  %v11279_v40 = vrot.slane %v11263_v39, %v7836_v56  ;;  %1709 = vmatpush1.msra.mxu1 %v9738_v2  ;;  %v1068_v42 = vld [vmem:[#allocation2 + $0x1b0] sm:$0xff] }
 0x238   : > { %v9818_v4 = vmul.f32 %v11276_v5, %v2584_v59  ;;  %2724 = vst [vmem:[#allocation2 + $0x50] sm:$0xf0] %v11277_v62  ;;  %2727 = vst [vmem:[#allocation2 + $0x48] sm:$0xf0] %v11278_v28  ;;  %v11280_v9 = vrot.slane %v11263_v39, %v7831_v54  ;;  %v11281_v52 = vrot.slane %v11265_v45, %v7845_v58  ;;  %v11284_v39 = vrot.slane %v9560_v27, 4 }
 0x239   : > { %v9837_v10 = vmul.f32 %v11279_v40, %v2581_v57  ;;  %v11282_v38 = vrot.slane %v11265_v45, %v7831_v54  ;;  %3685 = vst [vmem:[#allocation2 + $0x160] sm:$0xf] %v9375_v19  ;;  %3686 = vst [vmem:[#allocation2 + $0x20] sm:$0xf] %v9380_v14  ;;  %v2617_v41 = vrot.slane %v2609_v23, 4  ;;  %v11285_v45 = vrot.slane %v11267_v31, %v7825_v51 }
 0x23a   : > { %v9842_v3 = vmul.f32 %v11280_v9, %v2582_v50  ;;  %v3043_v34 = vmul.f32 %v11281_v52, %v2582_v50  ;;  %3728 = vst [vmem:[#allocation2 + $0x160] sm:$0xf0] %v11283_v7  ;;  %3729 = vst [vmem:[#allocation2 + $0x20] sm:$0xf0] %v11284_v39  ;;  %v3647_v59 = vrot.slane %v9818_v4, 4  ;;  %v11286_v32 = vrot.slane %v11267_v31, %v7845_v58 }
 0x23b   : > { %v3044_v61 = vmul.f32 %v11282_v38, %v2581_v57  ;;  %3045 = vst [vmem:[#allocation2 + $0x80] sm:$0xf] %v3041_v46  ;;  %v3637_v17 = vmul.f32 %v11285_v45, %v2582_v50  ;;  %v2616_v14 = vrot.slane %v9837_v10, 4  ;;  %v2870_v27 = vsel %vm2867_vm9, %v2860_v63, %v9784_v37  ;;  %v1069_v46 = vld [vmem:[#allocation2 + $0xd8] sm:$0xff]  ;;  %v9877_v50 = vld [vmem:[#allocation2 + $0x40] sm:$0xff]  ;;  %v9879_v62 = vld [vmem:[#allocation2 + $0xa8] sm:$0xff]  ;;  %1639 = vmatprep.subr.mxu0 %v1068_v42 }
 0x23c   : > { %v3638_v19 = vmul.f32 %v11286_v32, %v2581_v57  ;;  %v2619_v24 = vrot.slane %v9842_v3, 4  ;;  %3047 = vst [vmem:[#allocation2 + $0x1b8] sm:$0xf] %v3043_v34  ;;  %v2871_v23 = vsel %vm2867_vm9, %v2866_v0, %v2860_v63  ;;  %v11287_v2 = vrot.slane %v8736_v13, %v7825_v51  ;;  %2569 = vst [vmem:[#allocation2 + $0x1b0] sm:$0xf] %v9694_v6  ;;  %v9897_v34 = vld [vmem:[#allocation2] sm:$0xff] }
 0x23d   : > { %3048 = vst [vmem:[#allocation2 + $0x28] sm:$0xf] %v3044_v61  ;;  %v3645_v31 = vrot.slane %v3637_v17, 4  ;;  %v11288_v5 = vrot.slane %v8751_v49, %v7836_v56  ;;  %2570 = vst [vmem:[#allocation2 + $0xd8] sm:$0xf] %v9610_v48  ;;  %v11289_v63 = vrot.slane %v8756_v43, %v7831_v54  ;;  %v11290_v40 = vrot.slane %v8736_v13, %v7836_v56  ;;  %v9895_v48 = vpop.permute.xlu1 %2933  ;;  %v9913_v11 = vld [vmem:[#allocation2 + $0xd0] sm:$0xff] }
 0x23e   : > { %v3646_v57 = vrot.slane %v3638_v19, 4  ;;  %v2896_v55 = vmul.f32 %v11287_v2, %v2870_v27  ;;  %2626 = vst [vmem:[#allocation2 + $0xd8] sm:$0xf0] %v2618_v20  ;;  %2625 = vst [vmem:[#allocation2 + $0x1b0] sm:$0xf0] %v2617_v41  ;;  %v11291_v9 = vrot.slane %v8751_v49, %v7831_v54  ;;  %v11292_v6 = vrot.slane %v8756_v43, %v7845_v58  ;;  %v2932_v20 = vpop.permute.xlu0 %2931  ;;  %v9911_v41 = vld [vmem:[#allocation2 + $0x8] sm:$0xff] }
 0x23f   : > { %v3531_v4 = vmul.f32 %v11288_v5, %v2870_v27  ;;  %v4027_v28 = vmul.f32 %v11289_v63, %v2870_v27  ;;  %v2895_v10 = vmul.f32 %v11290_v40, %v2871_v23  ;;  %3609 = vst [vmem:[#allocation2 + $0x40] sm:$0xf] %v9639_v44  ;;  %3610 = vst [vmem:[#allocation2 + $0xa8] sm:$0xf] %v9644_v25  ;;  %v1067_v25 = vld [vmem:[#allocation2 + $0xb0] sm:$0xff]  ;;  %v1070_v44 = vld [vmem:[#allocation2 + $0x18] sm:$0xff] }
 0x240   : > { %v3534_v3 = vmul.f32 %v11291_v9, %v2871_v23  ;;  %v4026_v52 = vmul.f32 %v11292_v6, %v2871_v23  ;;  %3652 = vst [vmem:[#allocation2 + $0x40] sm:$0xf0] %v3644_v15  ;;  %3653 = vst [vmem:[#allocation2 + $0xa8] sm:$0xf0] %v3645_v31  ;;  %v2904_v38 = vrot.slane %v2896_v55, 4  ;;  %v2868_v61 = vsel %vm2867_vm9, %v2864_v18, %v2866_v0  ;;  %v2074_v5 = vld [vmem:[#allocation2 + $0x68] sm:$0xff] }
 0x241   : > { %v2869_v7 = vsel %vm2867_vm9, %v9784_v37, %v2864_v18  ;;  %v2942_v39 = vsel %vm2939_vm10, %v2932_v20, %v9895_v48  ;;  %3535 = vst [vmem:[#allocation2] sm:$0xf] %v3531_v4  ;;  %v4035_v15 = vrot.slane %v4027_v28, 4  ;;  %v2903_v45 = vrot.slane %v2895_v10, 4  ;;  %v9918_v37 = vld [vmem:[#allocation2 + $0x1a0] sm:$0xff]  ;;  %1710 = vmatprep.subr.mxu1 %v1070_v44  ;;  %1640 = vmatpush1.msra.mxu0 %v1067_v25  ;;  %v9945_v4 = vld [vmem:[#allocation2 + $0x148] sm:$0xff] }
 0x242   : > { %v4034_v17 = vrot.slane %v4026_v52, 4  ;;  %v11293_v0 = vrot.slane %v8736_v13, %v7845_v58  ;;  %3538 = vst [vmem:[#allocation2 + $0x8] sm:$0xf] %v3534_v3  ;;  %2568 = vst [vmem:[#allocation2 + $0xb0] sm:$0xf] %v9689_v29  ;;  %v11294_v18 = vrot.slane %v8736_v13, %v7831_v54  ;;  %v11295_v27 = vrot.slane %v8751_v49, %v7825_v51  ;;  %v11303_v40 = vld [vmem:[#allocation66_spill] sm:$0xff] }
 0x243   : > { %2571 = vst [vmem:[#allocation2 + $0x18] sm:$0xf] %v9615_v53  ;;  %3611 = vst [vmem:[#allocation2 + $0xd0] sm:$0xf] %v9714_v36  ;;  %v11296_v29 = vrot.slane %v8751_v49, %v7845_v58  ;;  %v11297_v53 = vrot.slane %v8756_v43, %v7836_v56  ;;  %v11298_v13 = vrot.slane %v8756_v43, %v7825_v51  ;;  %1711 = vmatpush1.msra.mxu1 %v1069_v46  ;;  %v7451_v43 = vld [vmem:[%s10840_s4] sm:$0xf] }
 0x244   : > { %v2897_v32 = vmul.f32 %v11293_v0, %v2869_v7  ;;  %2624 = vst [vmem:[#allocation2 + $0xb0] sm:$0xf0] %v2616_v14  ;;  %2627 = vst [vmem:[#allocation2 + $0x18] sm:$0xf0] %v2619_v24  ;;  %v2898_v19 = vmul.f32 %v11294_v18, %v2868_v61  ;;  %v3532_v23 = vmul.f32 %v11295_v27, %v2869_v7  ;;  %7264 = vmatmul.mubr.msk.f32.vlgmr.msra.gmra.mxu0 %vm1462_vm13, %v7451_v43  ;;  %v11302_v46 = vld [vmem:[#allocation12_spill] sm:$0xff]  ;;  %v11305_v52 = vld [vmem:[#allocation10_spill] sm:$0xff] }
 0x245   : > { %3654 = vst [vmem:[#allocation2 + $0xd0] sm:$0xf0] %v3646_v57  ;;  %2912 = vst [vmem:[#allocation2 + $0x150] sm:$0xf0] %v2904_v38  ;;  %v3533_v42 = vmul.f32 %v11296_v29, %v2868_v61  ;;  %v4024_v36 = vmul.f32 %v11297_v53, %v2869_v7  ;;  %v4025_v24 = vmul.f32 %v11298_v13, %v2868_v61  ;;  %v11300_v57 = vld [vmem:[#allocation65_spill] sm:$0xff]  ;;  %2117 = vmatprep.subr.mxu0 %v11302_v46 }
 0x246   : > { %3612 = vst [vmem:[#allocation2 + $0x1a0] sm:$0xf] %v9719_v21  ;;  %3655 = vst [vmem:[#allocation2 + $0x1a0] sm:$0xf0] %v3647_v59  ;;  %v2905_v14 = vrot.slane %v2897_v32, 4  ;;  %v11299_v49 = vrot.slane %v8844_v26, %v7825_v51  ;;  %v11301_v2 = vrot.slane %v11300_v57, %v7836_v56  ;;  %v2938_v21 = vpop.permute.xlu1 %2937  ;;  %v2936_v59 = vpop.permute.xlu0 %2935  ;;  %v2906_v63 = vrot.slane %v2898_v19, 4  ;;  %7265 = vmatmul.mubr.msk.f32.vlgmr.msra.gmra.mxu1 %vm1462_vm13, %v7451_v43 }
 0x247   : > { %4043 = vst [vmem:[#allocation2 + $0x170] sm:$0xf0] %v4035_v15  ;;  %2911 = vst [vmem:[#allocation2 + $0x120] sm:$0xf0] %v2903_v45  ;;  %v4032_v28 = vrot.slane %v4024_v36, 4  ;;  %v11304_v10 = vrot.slane %v11303_v40, %v7831_v54  ;;  %v2943_v3 = vsel %vm2939_vm10, %v2938_v21, %v2932_v20  ;;  %v4033_v6 = vrot.slane %v4025_v24, 4  ;;  %2118 = vmatpush1.msra.mxu0 %v11305_v52 }
 0x248   : > { %v2968_v31 = vmul.f32 %v11299_v49, %v2942_v39  ;;  %v3562_v55 = vmul.f32 %v11301_v2, %v2942_v39  ;;  %4042 = vst [vmem:[#allocation2 + $0x88] sm:$0xf0] %v4034_v17  ;;  %3536 = vst [vmem:[#allocation2 + $0x68] sm:$0xf] %v3532_v23  ;;  %v11306_v61 = vrot.slane %v8844_v26, %v7836_v56  ;;  %v2351_v44 = vld [vmem:[#allocation2 + $0x198] sm:$0xf]  ;;  %2188 = vmatprep.subr.mxu1 %v9487_v1 }
 0x249   : > { %v4070_v9 = vmul.f32 %v11304_v10, %v2942_v39  ;;  %3537 = vst [vmem:[#allocation2 + $0x148] sm:$0xf] %v3533_v42  ;;  %2913 = vst [vmem:[#allocation2 + $0x108] sm:$0xf0] %v2905_v14  ;;  %v11307_v39 = vrot.slane %v11300_v57, %v7831_v54  ;;  %2119 = vmatprep.subr.mxu0 %v9756_v47  ;;  %v11308_v20 = vrot.slane %v11303_v40, %v7845_v58  ;;  %v2350_v23 = vld [vmem:[#allocation2 + $0x30] sm:$0xf] }
 0x24a   : > { %2972 = vst [vmem:[#allocation2 + $0x188] sm:$0xf] %v2968_v31  ;;  %v3570_v38 = vrot.slane %v3562_v55, 4  ;;  %v2967_v7 = vmul.f32 %v11306_v61, %v2943_v3  ;;  %2914 = vst [vmem:[#allocation2 + $0x60] sm:$0xf0] %v2906_v63  ;;  %v2940_v45 = vsel %vm2939_vm10, %v2936_v59, %v2938_v21  ;;  %v2941_v17 = vsel %vm2939_vm10, %v9895_v48, %v2936_v59  ;;  %v9986_v27 = vpop.permute.xlu1 %2352  ;;  %v11316_v2 = vld [vmem:[#allocation37_spill] sm:$0xff] }
 0x24b   : > { %v3565_v25 = vmul.f32 %v11307_v39, %v2943_v3  ;;  %v4069_v15 = vmul.f32 %v11308_v20, %v2943_v3  ;;  %4074 = vst [vmem:[#allocation2 + $0x198] sm:$0xf] %v4070_v9  ;;  %4040 = vst [vmem:[#allocation2 + $0x128] sm:$0xf0] %v4032_v28  ;;  %2189 = vmatpush1.msra.mxu1 %v9485_v30  ;;  %2120 = vmatpush1.msra.mxu0 %v9740_v33  ;;  %v2090_v30 = vpop.permute.xlu0 %2089  ;;  %v2348_v14 = vld [vmem:[#allocation2 + $0x58] sm:$0xf] }
 0x24c   : > { %2971 = vst [vmem:[#allocation2 + $0xe0] sm:$0xf] %v2967_v7  ;;  %v11309_v47 = vrot.slane %v8844_v26, %v7845_v58  ;;  %v11310_v32 = vrot.slane %v8844_v26, %v7831_v54  ;;  %v11311_v19 = vrot.slane %v11300_v57, %v7825_v51  ;;  %3578 = vst [vmem:[#allocation2] sm:$0xf0] %v3570_v38  ;;  %2190 = vmatprep.subr.mxu1 %v9826_v12  ;;  %v11317_v55 = vld [vmem:[#allocation40_spill] sm:$0xff]  ;;  %v11319_v63 = vld [vmem:[#allocation39_spill] sm:$0xff] }
 0x24d   : > { %v3573_v1 = vrot.slane %v3565_v25, 4  ;;  %4041 = vst [vmem:[#allocation2 + $0x38] sm:$0xf0] %v4033_v6  ;;  %2121 = vmatprep.subr.mxu0 %v9879_v62  ;;  %v11312_v33 = vrot.slane %v11300_v57, %v7845_v58  ;;  %v11313_v26 = vrot.slane %v11303_v40, %v7836_v56  ;;  %v11314_v53 = vrot.slane %v11303_v40, %v7825_v51  ;;  %v2349_v62 = vld [vmem:[#allocation2 + $0xf0] sm:$0xf]  ;;  %v3216_v28 = vld [vmem:[#allocation2 + $0xc8] sm:$0xff] }
 0x24e   : > { %v2969_v0 = vmul.f32 %v11309_v47, %v2941_v17  ;;  %v2970_v18 = vmul.f32 %v11310_v32, %v2940_v45  ;;  %v3563_v48 = vmul.f32 %v11311_v19, %v2941_v17  ;;  %4073 = vst [vmem:[#allocation2 + $0x30] sm:$0xf] %v4069_v15  ;;  %2191 = vmatpush1.msra.mxu1 %v9824_v22  ;;  %v10004_v22 = vpop.permute.xlu1 %3820  ;;  %v3214_v10 = vld [vmem:[#allocation2 + $0xc0] sm:$0xff]  ;;  %v3213_v25 = vld [vmem:[#allocation2 + $0x90] sm:$0xff] }
 0x24f   : > { %v3564_v29 = vmul.f32 %v11312_v33, %v2940_v45  ;;  %v4067_v42 = vmul.f32 %v11313_v26, %v2941_v17  ;;  %v4068_v36 = vmul.f32 %v11314_v53, %v2940_v45  ;;  %2122 = vmatpush1.msra.mxu0 %v9877_v50  ;;  %3581 = vst [vmem:[#allocation2 + $0x8] sm:$0xf0] %v3573_v1  ;;  %v10006_v50 = vpop.permute.xlu0 %3218  ;;  %v3206_v33 = vld [vmem:[#allocation2 + $0x1a8] sm:$0xff]  ;;  %v3205_v26 = vld [vmem:[#allocation2 + $0x80] sm:$0xff]  ;;  %v2928_v53 = vld [vmem:[#allocation2 + $0x150] sm:$0xff] }
 0x250   : > { %2973 = vst [vmem:[#allocation2 + $0x138] sm:$0xf] %v2969_v0  ;;  %2974 = vst [vmem:[#allocation2 + $0x140] sm:$0xf] %v2970_v18  ;;  %v3571_v12 = vrot.slane %v3563_v48, 4  ;;  %2192 = vmatprep.subr.mxu1 %v9918_v37  ;;  %2123 = vmatprep.subr.mxu0 %v2074_v5  ;;  %v11315_v37 = vmov 0.0  }
 0x251   : > { %v3572_v13 = vrot.slane %v3564_v29, 4  ;;  %4072 = vst [vmem:[#allocation2 + $0xf0] sm:$0xf] %v4068_v36  ;;  %4071 = vst [vmem:[#allocation2 + $0x58] sm:$0xf] %v4067_v42  ;;  %2193 = vmatpush1.msra.mxu1 %v9913_v11  ;;  %2124 = vmatpush1.msra.mxu0 %v9897_v34  ;;  %v2930_v17 = vld [vmem:[#allocation2 + $0x60] sm:$0xff] }
 0x252   : > { %3579 = vst [vmem:[#allocation2 + $0x68] sm:$0xf0] %v3571_v12  ;;  %2194 = vmatprep.subr.mxu1 %v9911_v41  ;;  %7279 = vmatprep.subr.msk.mxu0 %vm2357_vm11, %v2349_v62  ;;  %v10015_v11 = vld [vmem:[%s10837_s1 + $0xe4] ss:$8 sm:$0xf]  ;;  %v4876_v24 = vpop.permute.xlu1 %4875 }
 0x253   : > { %3580 = vst [vmem:[#allocation2 + $0x148] sm:$0xf0] %v3572_v13  ;;  %2195 = vmatpush1.msra.mxu1 %v9945_v4  ;;  %2228 = vmatprep.mubr.f32.mxu1 %v11315_v37  ;;  %v10022_v34 = vld [vmem:[%s10837_s1 + $0x105] ss:$8 sm:$0xf]  ;;  %v10031_v49 = vpop.permute.xlu0 %4083  ;;  %v4902_v31 = vrot.slane %v10015_v11, %v7845_v58  ;;  %v4906_v57 = vrot.slane %v10015_v11, %v7831_v54 }
 0x254   : > { %7282 = vmatprep.subr.msk.mxu1 %vm2357_vm11, %v2351_v44  ;;  %2157 = vmatprep.mubr.f32.mxu0 %v11315_v37  ;;  %v10027_v41 = vld [vmem:[%s10837_s1 + $0x126] ss:$8 sm:$0xf]  ;;  %v5224_v5 = vrot.slane %v10022_v34, %v7836_v56  ;;  %v5228_v21 = vrot.slane %v10022_v34, %v7825_v51  ;;  %v4894_v46 = vrot.slane %v10015_v11, %v7836_v56 }
 0x255   : > { %7274 = vmatmul.mubr.msk.f32.vlgmr.msra.gmra.mxu0 %vm1462_vm13, %v2090_v30  ;;  %7275 = vmatmul.mubr.msk.f32.vlgmr.msra.gmra.mxu1 %vm1462_vm13, %v2090_v30  ;;  %v6044_v59 = vrot.slane %v10027_v41, %v7845_v58  ;;  %v11318_v4 = vld [vmem:[#allocation45_spill] sm:$0xff]  ;;  %v6048_v43 = vrot.slane %v10027_v41, %v7831_v54  ;;  %v4898_v40 = vrot.slane %v10015_v11, %v7825_v51  ;;  %v3215_v44 = vld [vmem:[#allocation2 + $0x178] sm:$0xff]  ;;  %v10074_v32 = vld [vmem:[#allocation2 + $0x108] sm:$0xff] }
 0x256   : > { %7280 = vmatpush1.msk.msra.mxu0 %vm2357_vm11, %v2348_v14  ;;  %7283 = vmatpush1.msk.msra.mxu1 %vm2357_vm11, %v2350_v23  ;;  %v4880_v9 = vpop.permute.xlu1 %4879  ;;  %v5232_v6 = vrot.slane %v10022_v34, %v7845_v58  ;;  %v5236_v52 = vrot.slane %v10022_v34, %v7831_v54  ;;  %v6036_v38 = vrot.slane %v10027_v41, %v7836_v56  ;;  %v10078_v48 = vld [vmem:[#allocation2 + $0x170] sm:$0xff]  ;;  %v11320_v30 = vld [vmem:[#allocation44_spill] sm:$0xff]  ;;  %v3207_v42 = vld [vmem:[#allocation2 + $0x1b8] sm:$0xff] }
 0x257   : > { %2400 = vmatprep.subr.mxu0 %v11316_v2  ;;  %2471 = vmatprep.subr.mxu1 %v11317_v55  ;;  %v4878_v3 = vpop.permute.xlu0 %4877  ;;  %v6040_v39 = vrot.slane %v10027_v41, %v7825_v51  ;;  %v3208_v23 = vld [vmem:[#allocation2 + $0x28] sm:$0xff]  ;;  %v3204_v14 = vld [vmem:[#allocation2 + $0x140] sm:$0xff]  ;;  %v10093_v2 = vld [vmem:[#allocation2 + $0x38] sm:$0xff] }
 0x258   : > { %2401 = vmatpush1.msra.mxu0 %v11318_v4  ;;  %2472 = vmatpush1.msra.mxu1 %v11319_v63  ;;  %v4885_v61 = vsel %vm4883_vm12, %v4878_v3, %v4880_v9  ;;  %v4886_v7 = vsel %vm4883_vm12, %v4876_v24, %v4878_v3  ;;  %v3202_v62 = vld [vmem:[#allocation2 + $0x188] sm:$0xff]  ;;  %v2927_v13 = vld [vmem:[#allocation2 + $0x120] sm:$0xff] }
 0x259   : > { %2505 = vmatprep.mubr.f32.mxu1 %v11315_v37  ;;  %3317 = vmatprep.subr.mxu1 %v3216_v28  ;;  %v4913_v20 = vmul.f32 %v4902_v31, %v4886_v7  ;;  %v4914_v15 = vmul.f32 %v4906_v57, %v4885_v61  ;;  %v5241_v45 = vmul.f32 %v5224_v5, %v4886_v7  ;;  %v3201_v31 = vld [vmem:[#allocation2 + $0xe0] sm:$0xff]  ;;  %v10095_v55 = vld [vmem:[#allocation2 + $0x128] sm:$0xff]  ;;  %v3203_v5 = vld [vmem:[#allocation2 + $0x138] sm:$0xff] }
 0x25a   : > { %2434 = vmatprep.mubr.f32.mxu0 %v11315_v37  ;;  %3246 = vmatprep.subr.mxu0 %v3214_v10  ;;  %v5242_v1 = vmul.f32 %v5228_v21, %v4885_v61  ;;  %v6055_v47 = vmul.f32 %v6044_v59, %v4886_v7  ;;  %v6056_v0 = vmul.f32 %v6048_v43, %v4885_v61  ;;  %v10101_v59 = vld [vmem:[%s10837_s1 + $0x104] ss:$8 sm:$0xf]  ;;  %v10107_v4 = vld [vmem:[%s10837_s1 + $0x125] ss:$8 sm:$0xf] }
 0x25b   : > { %7281 = vmatmul.mubr.msk.f32.vlgmr.msra.gmra.mxu0 %vm2354_vm14, %v9986_v27  ;;  %7284 = vmatmul.mubr.msk.f32.vlgmr.msra.gmra.mxu1 %vm2354_vm14, %v9986_v27  ;;  %4918 = vst [vmem:[#allocation2 + $0x60] sm:$0xf] %v4914_v15  ;;  %v5249_v18 = vrot.slane %v5241_v45, 4  ;;  %4917 = vst [vmem:[#allocation2 + $0x108] sm:$0xf] %v4913_v20  ;;  %v4882_v19 = vpop.permute.xlu0 %4881  ;;  %v10080_v27 = vld [vmem:[#allocation2 + $0x88] sm:$0xff]  ;;  %v5197_v10 = vrot.slane %v10101_v59, %v7825_v51 }
 0x25c   : > { %3247 = vmatpush1.msra.mxu0 %v3213_v25  ;;  %3318 = vmatpush1.msra.mxu1 %v3215_v44  ;;  %v5250_v29 = vrot.slane %v5242_v1, 4  ;;  %6060 = vst [vmem:[#allocation2 + $0x170] sm:$0xf] %v6056_v0  ;;  %6059 = vst [vmem:[#allocation2 + $0x88] sm:$0xf] %v6055_v47  ;;  %v11323_v44 = vld [vmem:[#allocation14_spill] sm:$0xff]  ;;  %v5827_v1 = vrot.slane %v10107_v4, %v7836_v56  ;;  %v5831_v47 = vrot.slane %v10107_v4, %v7825_v51 }
 0x25d   : > { %3248 = vmatprep.subr.mxu0 %v9603_v8  ;;  %3319 = vmatprep.subr.mxu1 %v9707_v60  ;;  %v4884_v8 = vsel %vm4883_vm12, %v4880_v9, %v4882_v19  ;;  %v4887_v60 = vsel %vm4883_vm12, %v4882_v19, %v4876_v24  ;;  %5257 = vst [vmem:[#allocation2 + $0x90] sm:$0xf0] %v5249_v18  ;;  %v10091_v24 = vld [vmem:[%s10837_s1 + $0xe3] ss:$8 sm:$0xf] }
 0x25e   : > { %3249 = vmatpush1.msra.mxu0 %v9709_v35  ;;  %3320 = vmatpush1.msra.mxu1 %v11320_v30  ;;  %v4911_v35 = vmul.f32 %v4894_v46, %v4884_v8  ;;  %v4912_v36 = vmul.f32 %v4898_v40, %v4887_v60  ;;  %v5243_v12 = vmul.f32 %v5232_v6, %v4884_v8  ;;  %v10122_v40 = vpop.permute.xlu1 %4247  ;;  %v10133_v3 = vld [vmem:[%s10837_s1 + $0xe0] ss:$8 sm:$0xf]  ;;  %v10138_v6 = vld [vmem:[%s10837_s1 + $0x101] ss:$8 sm:$0xf] }
 0x25f   : > { %3321 = vmatprep.subr.mxu1 %v3208_v23  ;;  %3250 = vmatprep.subr.mxu0 %v3206_v33  ;;  %5258 = vst [vmem:[#allocation2 + $0xc0] sm:$0xf0] %v5250_v29  ;;  %v5244_v11 = vmul.f32 %v5236_v52, %v4887_v60  ;;  %v6053_v34 = vmul.f32 %v6036_v38, %v4884_v8  ;;  %v10111_v63 = vpop.permute.xlu0 %4819  ;;  %v11321_v52 = vld [vmem:[#allocation11_spill] sm:$0xff]  ;;  %v11322_v38 = vld [vmem:[#allocation46_spill] sm:$0xff]  ;;  %v11324_v20 = vld [vmem:[#allocation41_spill] sm:$0xff] }
 0x260   : > { %3251 = vmatpush1.msra.mxu0 %v3205_v26  ;;  %3322 = vmatpush1.msra.mxu1 %v3207_v42  ;;  %v6054_v41 = vmul.f32 %v6040_v39, %v4887_v60  ;;  %4915 = vst [vmem:[#allocation2 + $0x120] sm:$0xf] %v4911_v35  ;;  %4916 = vst [vmem:[#allocation2 + $0x150] sm:$0xf] %v4912_v36  ;;  %v5251_v57 = vrot.slane %v5243_v12, 4  ;;  %v4846_v28 = vrot.slane %v10091_v24, %v7845_v58  ;;  %v2922_v15 = vld [vmem:[#allocation2 + $0x48] sm:$0xff] }
 0x261   : > { %3252 = vmatprep.subr.mxu0 %v3202_v62  ;;  %3323 = vmatprep.subr.mxu1 %v3204_v14  ;;  %v5252_v21 = vrot.slane %v5244_v11, 4  ;;  %6057 = vst [vmem:[#allocation2 + $0x128] sm:$0xf] %v6053_v34  ;;  %v4850_v43 = vrot.slane %v10091_v24, %v7831_v54  ;;  %v5193_v46 = vrot.slane %v10101_v59, %v7836_v56  ;;  %v10151_v25 = vld [vmem:[%s10837_s1 + $0x122] ss:$8 sm:$0xf] }
 0x262   : > { %3253 = vmatpush1.msra.mxu0 %v3201_v31  ;;  %3286 = vmatprep.mubr.f32.mxu0 %v11315_v37  ;;  %6058 = vst [vmem:[#allocation2 + $0x38] sm:$0xf] %v6054_v41  ;;  %5259 = vst [vmem:[#allocation2 + $0x178] sm:$0xf0] %v5251_v57  ;;  %v5839_v9 = vrot.slane %v10107_v4, %v7831_v54  ;;  %v4838_v61 = vrot.slane %v10091_v24, %v7836_v56  ;;  %v2920_v45 = vld [vmem:[#allocation2 + $0x168] sm:$0xff]  ;;  %v2919_v0 = vld [vmem:[#allocation2 + $0x50] sm:$0xff]  ;;  %v4822_v8 = vpop.permute.xlu1 %4821 }
 0x263   : > { %3324 = vmatpush1.msra.mxu1 %v3203_v5  ;;  %3357 = vmatprep.mubr.f32.mxu1 %v11315_v37  ;;  %5260 = vst [vmem:[#allocation2 + $0xc8] sm:$0xf0] %v5252_v21  ;;  %v4842_v7 = vrot.slane %v10091_v24, %v7825_v51  ;;  %v5201_v39 = vrot.slane %v10101_v59, %v7845_v58  ;;  %v2916_v23 = vld [vmem:[#allocation2 + $0x1b0] sm:$0xff]  ;;  %v2918_v33 = vld [vmem:[#allocation2 + $0x18] sm:$0xff]  ;;  %v4824_v29 = vpop.permute.xlu0 %4823  ;;  %v7452_v57 = vld [vmem:[%s10841_s5] sm:$0xf] }
 0x264   : > { %7302 = vmatmul.mubr.msk.f32.vlgmr.msra.gmra.mxu1 %vm1462_vm13, %v10006_v50  ;;  %3461 = vmatprep.subr.mxu1 %v2930_v17  ;;  %v5205_v17 = vrot.slane %v10101_v59, %v7831_v54  ;;  %v4707_v18 = vrot.slane %v10133_v3, %v7836_v56  ;;  %v4719_v19 = vrot.slane %v10133_v3, %v7831_v54  ;;  %v2917_v62 = vld [vmem:[#allocation2 + $0xd8] sm:$0xff] }
 0x265   : > { %7301 = vmatmul.mubr.msk.f32.vlgmr.msra.gmra.mxu0 %vm1462_vm13, %v10006_v50  ;;  %3390 = vmatprep.subr.mxu0 %v2928_v53  ;;  %v5835_v50 = vrot.slane %v10107_v4, %v7845_v58  ;;  %v5119_v30 = vrot.slane %v10138_v6, %v7825_v51  ;;  %v5123_v60 = vrot.slane %v10138_v6, %v7845_v58  ;;  %v2915_v53 = vld [vmem:[#allocation2 + $0xb0] sm:$0xff] }
 0x266   : > { %3391 = vmatpush1.msra.mxu0 %v2927_v13  ;;  %3462 = vmatpush1.msra.mxu1 %v10074_v32  ;;  %v2921_v32 = vld [vmem:[#allocation2 + $0x130] sm:$0xff]  ;;  %v5722_v26 = vrot.slane %v10151_v25, %v7836_v56  ;;  %v5734_v42 = vrot.slane %v10151_v25, %v7831_v54  ;;  %v4829_v35 = vsel %vm4827_vm15, %v4822_v8, %v4824_v29 }
 0x267   : > { %3392 = vmatprep.subr.mxu0 %v11321_v52  ;;  %3463 = vmatprep.subr.mxu1 %v11322_v38  ;;  %v4830_v36 = vsel %vm4827_vm15, %v10111_v63, %v4822_v8  ;;  %v4711_v12 = vrot.slane %v10133_v3, %v7825_v51  ;;  %v4858_v13 = vmul.f32 %v4850_v43, %v4829_v35  ;;  %v3812_v8 = vld [vmem:[#allocation2 + $0x10] sm:$0xff] }
 0x268   : > { %3393 = vmatpush1.msra.mxu0 %v11323_v44  ;;  %3464 = vmatpush1.msra.mxu1 %v11324_v20  ;;  %v4857_v14 = vmul.f32 %v4846_v28, %v4830_v36  ;;  %v5210_v11 = vmul.f32 %v5193_v46, %v4830_v36  ;;  %v5211_v34 = vmul.f32 %v5197_v10, %v4829_v35  ;;  %v4826_v28 = vpop.permute.xlu1 %4825  ;;  %v11325_v10 = vld [vmem:[#allocation42_spill] sm:$0xff] }
 0x269   : > { %3465 = vmatprep.subr.mxu1 %v2922_v15  ;;  %3394 = vmatprep.subr.mxu0 %v2920_v45  ;;  %v5846_v41 = vmul.f32 %v5835_v50, %v4830_v36  ;;  %v5847_v31 = vmul.f32 %v5839_v9, %v4829_v35  ;;  %v4866_v21 = vrot.slane %v4858_v13, 4  ;;  %v4715_v43 = vrot.slane %v10133_v3, %v7845_v58  ;;  %v11326_v50 = vld [vmem:[#allocation13_spill] sm:$0xff]  ;;  %v11327_v15 = vld [vmem:[#allocation43_spill] sm:$0xff]  ;;  %v3809_v35 = vld [vmem:[#allocation2 + $0xa8] sm:$0xff] }
 0x26a   : > { %3395 = vmatpush1.msra.mxu0 %v2919_v0  ;;  %3466 = vmatpush1.msra.mxu1 %v2921_v32  ;;  %v4865_v5 = vrot.slane %v4857_v14, 4  ;;  %5214 = vst [vmem:[#allocation2 + $0x90] sm:$0xf] %v5210_v11  ;;  %v5115_v46 = vrot.slane %v10138_v6, %v7836_v56  ;;  %5215 = vst [vmem:[#allocation2 + $0xc0] sm:$0xf] %v5211_v34  ;;  %v4828_v38 = vsel %vm4827_vm15, %v4824_v29, %v4826_v28  ;;  %v11328_v45 = vld [vmem:[#allocation47_spill] sm:$0xff]  ;;  %v10240_v34 = vpop.permute.xlu0 %2518 }
 0x26b   : > { %3396 = vmatprep.subr.mxu0 %v2916_v23  ;;  %3467 = vmatprep.subr.mxu1 %v2918_v33  ;;  %v5854_v9 = vrot.slane %v5846_v41, 4  ;;  %v5855_v52 = vrot.slane %v5847_v31, 4  ;;  %v4831_v44 = vsel %vm4827_vm15, %v4826_v28, %v10111_v63  ;;  %v10202_v20 = vld [vmem:[%s10837_s1 + $0xe1] ss:$8 sm:$0xf]  ;;  %v4855_v23 = vmul.f32 %v4838_v61, %v4828_v38 }
 0x26c   : > { %3397 = vmatpush1.msra.mxu0 %v2915_v53  ;;  %3430 = vmatprep.mubr.f32.mxu0 %v11315_v37  ;;  %v3813_v0 = vld [vmem:[#allocation2 + $0x100] sm:$0xff]  ;;  %4873 = vst [vmem:[#allocation2 + $0x118] sm:$0xf0] %v4865_v5  ;;  %4874 = vst [vmem:[#allocation2 + $0x98] sm:$0xf0] %v4866_v21  ;;  %v4856_v63 = vmul.f32 %v4842_v7, %v4831_v44  ;;  %v5212_v33 = vmul.f32 %v5201_v39, %v4828_v38  ;;  %v3810_v14 = vld [vmem:[#allocation2 + $0xd0] sm:$0xff] }
 0x26d   : > { %3468 = vmatpush1.msra.mxu1 %v2917_v62  ;;  %3501 = vmatprep.mubr.f32.mxu1 %v11315_v37  ;;  %v3815_v32 = vld [vmem:[#allocation2 + $0x20] sm:$0xff]  ;;  %5862 = vst [vmem:[#allocation2 + $0xa0] sm:$0xf0] %v5854_v9  ;;  %5863 = vst [vmem:[#allocation2 + $0x158] sm:$0xf0] %v5855_v52  ;;  %v5213_v24 = vmul.f32 %v5205_v17, %v4831_v44  ;;  %v5844_v61 = vmul.f32 %v5827_v1, %v4828_v38  ;;  %v4863_v62 = vrot.slane %v4855_v23, 4  ;;  %v10234_v17 = vpop.permute.xlu1 %4688 }
 0x26e   : > { %7304 = vmatmul.mubr.msk.f32.vlgmr.msra.gmra.mxu1 %vm1462_vm13, %v7452_v57  ;;  %7303 = vmatmul.mubr.msk.f32.vlgmr.msra.gmra.mxu0 %vm1462_vm13, %v7452_v57  ;;  %v10218_v29 = vld [vmem:[%s10837_s1 + $0x102] ss:$8 sm:$0xf]  ;;  %v5845_v7 = vmul.f32 %v5831_v47, %v4831_v44  ;;  %v10232_v39 = vld [vmem:[%s10837_s1 + $0x123] ss:$8 sm:$0xf]  ;;  %v5127_v1 = vrot.slane %v10138_v6, %v7831_v54  ;;  %v5726_v4 = vrot.slane %v10151_v25, %v7825_v51 }
 0x26f   : > { %3848 = vmatprep.subr.mxu0 %v11325_v10  ;;  %3919 = vmatprep.subr.mxu1 %v11326_v50  ;;  %v3814_v53 = vld [vmem:[#allocation2 + $0x160] sm:$0xff]  ;;  %v4864_v59 = vrot.slane %v4856_v63, 4  ;;  %5216 = vst [vmem:[#allocation2 + $0x178] sm:$0xf] %v5212_v33  ;;  %5217 = vst [vmem:[#allocation2 + $0xc8] sm:$0xf] %v5213_v24  ;;  %v5730_v41 = vrot.slane %v10151_v25, %v7845_v58  ;;  %v4751_v31 = vrot.slane %v10202_v20, %v7836_v56  ;;  %v4691_v63 = vpop.permute.xlu0 %4690 }
 0x270   : > { %3849 = vmatpush1.msra.mxu0 %v11327_v15  ;;  %3920 = vmatpush1.msra.mxu1 %v11328_v45  ;;  %v3811_v36 = vld [vmem:[#allocation2 + $0x1a0] sm:$0xff]  ;;  %v5852_v13 = vrot.slane %v5844_v61, 4  ;;  %v5853_v11 = vrot.slane %v5845_v7, 4  ;;  %v3805_v57 = vld [vmem:[#allocation2 + $0x68] sm:$0xff]  ;;  %4871 = vst [vmem:[#allocation2 + $0x180] sm:$0xf0] %v4863_v62  ;;  %v4763_v21 = vrot.slane %v10202_v20, %v7831_v54  ;;  %v5162_v28 = vrot.slane %v10218_v29, %v7825_v51 }
 0x271   : > { %3850 = vmatprep.subr.mxu0 %v3813_v0  ;;  %3921 = vmatprep.subr.mxu1 %v3815_v32  ;;  %v3808_v47 = vld [vmem:[#allocation2 + $0x40] sm:$0xff]  ;;  %v3807_v5 = vld [vmem:[#allocation2 + $0x8] sm:$0xff]  ;;  %4872 = vst [vmem:[#allocation2 + $0x110] sm:$0xf0] %v4864_v59  ;;  %v5166_v10 = vrot.slane %v10218_v29, %v7845_v58  ;;  %v5753_v52 = vrot.slane %v10232_v39, %v7836_v56  ;;  %v4693_v45 = vpop.permute.xlu1 %4692  ;;  %v4080_v7 = vld [vmem:[#allocation2 + $0xf0] sm:$0xf] }
 0x272   : > { %3851 = vmatpush1.msra.mxu0 %v3812_v8  ;;  %3922 = vmatpush1.msra.mxu1 %v3814_v53  ;;  %v10255_v50 = vld [vmem:[%s10837_s1 + $0xc6] ss:$8 sm:$0xf]  ;;  %5860 = vst [vmem:[#allocation2 + $0x70] sm:$0xf0] %v5852_v13  ;;  %v5765_v38 = vrot.slane %v10232_v39, %v7831_v54  ;;  %v4755_v44 = vrot.slane %v10202_v20, %v7825_v51 }
 0x273   : > { %3852 = vmatprep.subr.mxu0 %v3809_v35  ;;  %3923 = vmatprep.subr.mxu1 %v3811_v36  ;;  %v3804_v9 = vld [vmem:[#allocation2] sm:$0xff]  ;;  %5861 = vst [vmem:[#allocation2 + $0x78] sm:$0xf0] %v5853_v11  ;;  %v3806_v15 = vld [vmem:[#allocation2 + $0x148] sm:$0xff]  ;;  %v4759_v0 = vrot.slane %v10202_v20, %v7845_v58  ;;  %v5158_v32 = vrot.slane %v10218_v29, %v7836_v56  ;;  %v4082_v35 = vld [vmem:[#allocation2 + $0x198] sm:$0xf] }
 0x274   : > { %3853 = vmatpush1.msra.mxu0 %v3808_v47  ;;  %3924 = vmatpush1.msra.mxu1 %v3810_v14  ;;  %v5170_v23 = vrot.slane %v10218_v29, %v7831_v54  ;;  %v5757_v33 = vrot.slane %v10232_v39, %v7825_v51  ;;  %v5761_v8 = vrot.slane %v10232_v39, %v7845_v58  ;;  %v10281_v24 = vld [vmem:[%s10837_s1 + $0xe7] ss:$8 sm:$0xf]  ;;  %v10286_v61 = vld [vmem:[%s10837_s1 + $0x120] ss:$8 sm:$0xf] }
 0x275   : > { %3854 = vmatprep.subr.mxu0 %v3805_v57  ;;  %3925 = vmatprep.subr.mxu1 %v3807_v5  ;;  %v4607_v53 = vrot.slane %v10255_v50, %v7836_v56  ;;  %v4698_v36 = vsel %vm4696_vm0, %v4691_v63, %v4693_v45  ;;  %v4699_v62 = vsel %vm4696_vm0, %v10234_v17, %v4691_v63  ;;  %v4079_v47 = vld [vmem:[#allocation2 + $0x58] sm:$0xf]  ;;  %v4081_v14 = vld [vmem:[#allocation2 + $0x30] sm:$0xf]  ;;  %v10321_v5 = vpop.permute.xlu1 %4732 }
 0x276   : > { %3855 = vmatpush1.msra.mxu0 %v3804_v9  ;;  %3888 = vmatprep.mubr.f32.mxu0 %v11315_v37  ;;  %v4619_v59 = vrot.slane %v10255_v50, %v7831_v54  ;;  %v4727_v13 = vmul.f32 %v4719_v19, %v4699_v62  ;;  %v5133_v11 = vmul.f32 %v5119_v30, %v4699_v62  ;;  %v4695_v9 = vpop.permute.xlu0 %4694 }
 0x277   : > { %3926 = vmatpush1.msra.mxu1 %v3806_v15  ;;  %3959 = vmatprep.mubr.f32.mxu1 %v11315_v37  ;;  %v5134_v57 = vmul.f32 %v5123_v60, %v4698_v36  ;;  %v5742_v19 = vmul.f32 %v5734_v42, %v4699_v62  ;;  %v5045_v60 = vrot.slane %v10281_v24, %v7825_v51 }
 0x278   : > { %7313 = vmatmul.mubr.msk.f32.vlgmr.msra.gmra.mxu0 %vm1462_vm13, %v10004_v22  ;;  %7314 = vmatmul.mubr.msk.f32.vlgmr.msra.gmra.mxu1 %vm1462_vm13, %v10004_v22  ;;  %v4724_v22 = vmul.f32 %v4707_v18, %v4698_v36  ;;  %v5739_v18 = vmul.f32 %v5722_v26, %v4698_v36  ;;  %4731 = vst [vmem:[#allocation2 + $0x48] sm:$0xf] %v4727_v13  ;;  %v5141_v30 = vrot.slane %v5133_v11, 4  ;;  %v10384_v36 = vld [vmem:[%s10837_s1 + $0xc7] ss:$8 sm:$0xf] }
 0x279   : > { %7318 = vmatprep.subr.msk.mxu0 %vm2357_vm11, %v4080_v7  ;;  %7321 = vmatprep.subr.msk.mxu1 %vm2357_vm11, %v4082_v35  ;;  %v5049_v26 = vrot.slane %v10281_v24, %v7845_v58  ;;  %v5648_v15 = vrot.slane %v10286_v61, %v7836_v56  ;;  %5746 = vst [vmem:[#allocation2 + $0x20] sm:$0xf] %v5742_v19 }
 0x27a   : > { %7319 = vmatpush1.msk.msra.mxu0 %vm2357_vm11, %v4079_v47  ;;  %7322 = vmatpush1.msk.msra.mxu1 %vm2357_vm11, %v4081_v14  ;;  %4728 = vst [vmem:[#allocation2 + $0x50] sm:$0xf] %v4724_v22  ;;  %5743 = vst [vmem:[#allocation2 + $0x10] sm:$0xf] %v5739_v18  ;;  %v4700_v42 = vsel %vm4696_vm0, %v4695_v9, %v10234_v17  ;;  %v5660_v63 = vrot.slane %v10286_v61, %v7831_v54 }
 0x27b   : > { %4129 = vmatprep.subr.mxu0 %v10093_v2  ;;  %4200 = vmatprep.subr.mxu1 %v10078_v48  ;;  %v5142_v2 = vrot.slane %v5134_v57, 4  ;;  %v4697_v48 = vsel %vm4696_vm0, %v4693_v45, %v4695_v9  ;;  %5149 = vst [vmem:[#allocation2 + $0x1a8] sm:$0xf0] %v5141_v30  ;;  %v4726_v45 = vmul.f32 %v4715_v43, %v4700_v42  ;;  %v4737_v43 = vpop.permute.xlu1 %4736 }
 0x27c   : > { %4130 = vmatpush1.msra.mxu0 %v10095_v55  ;;  %4163 = vmatprep.mubr.f32.mxu0 %v11315_v37  ;;  %v4725_v55 = vmul.f32 %v4711_v12, %v4697_v48  ;;  %v5132_v17 = vmul.f32 %v5115_v46, %v4700_v42  ;;  %v5740_v3 = vmul.f32 %v5726_v4, %v4697_v48 }
 0x27d   : > { %4201 = vmatpush1.msra.mxu1 %v10080_v27  ;;  %4234 = vmatprep.mubr.f32.mxu1 %v11315_v37  ;;  %5150 = vst [vmem:[#allocation2 + $0x1b8] sm:$0xf0] %v5142_v2  ;;  %v5135_v27 = vmul.f32 %v5127_v1, %v4697_v48  ;;  %v5741_v12 = vmul.f32 %v5730_v41, %v4700_v42  ;;  %4730 = vst [vmem:[#allocation2 + $0x130] sm:$0xf] %v4726_v45 }
 0x27e   : > { %7320 = vmatmul.mubr.msk.f32.vlgmr.msra.gmra.mxu0 %vm2354_vm14, %v10031_v49  ;;  %7323 = vmatmul.mubr.msk.f32.vlgmr.msra.gmra.mxu1 %vm2354_vm14, %v10031_v49  ;;  %4729 = vst [vmem:[#allocation2 + $0x168] sm:$0xf] %v4725_v55  ;;  %v5140_v46 = vrot.slane %v5132_v17, 4  ;;  %v4735_v49 = vpop.permute.xlu0 %4734  ;;  %v4611_v7 = vrot.slane %v10255_v50, %v7825_v51  ;;  %v4615_v6 = vrot.slane %v10255_v50, %v7845_v58  ;;  %5744 = vst [vmem:[#allocation2 + $0x100] sm:$0xf] %v5740_v3 }
 0x27f   : > { %v5041_v1 = vrot.slane %v10281_v24, %v7836_v56  ;;  %4336 = vmatprep.mubr.f32.mxu0 %v11315_v37  ;;  %4407 = vmatprep.mubr.f32.mxu1 %v11315_v37  ;;  %v5143_v25 = vrot.slane %v5135_v27, 4  ;;  %5745 = vst [vmem:[#allocation2 + $0x160] sm:$0xf] %v5741_v12  ;;  %v4742_v4 = vsel %vm4740_vm1, %v4735_v49, %v4737_v43  ;;  %v10404_v11 = vpop.permute.xlu1 %4588  ;;  %v10427_v42 = vld [vmem:[%s10837_s1 + $0x121] ss:$8 sm:$0xf] }
 0x280   : > { %v4743_v41 = vsel %vm4740_vm1, %v10321_v5, %v4735_v49  ;;  %v5053_v35 = vrot.slane %v10281_v24, %v7831_v54  ;;  %5148 = vst [vmem:[#allocation2 + $0x80] sm:$0xf0] %v5140_v46  ;;  %v4768_v62 = vmul.f32 %v4751_v31, %v4742_v4  ;;  %v5177_v22 = vmul.f32 %v5166_v10, %v4742_v4 }
 0x281   : > { %v4771_v47 = vmul.f32 %v4763_v21, %v4743_v41  ;;  %v5176_v14 = vmul.f32 %v5162_v28, %v4743_v41  ;;  %5151 = vst [vmem:[#allocation2 + $0x28] sm:$0xf0] %v5143_v25  ;;  %v5770_v13 = vmul.f32 %v5753_v52, %v4742_v4  ;;  %v5773_v31 = vmul.f32 %v5765_v38, %v4743_v41  ;;  %v10417_v38 = vld [vmem:[%s10837_s1 + $0x100] ss:$8 sm:$0xf] }
 0x282   : > { %v5652_v21 = vrot.slane %v10286_v61, %v7825_v51  ;;  %v5656_v28 = vrot.slane %v10286_v61, %v7845_v58  ;;  %v4776_v57 = vrot.slane %v4768_v62, 4  ;;  %5181 = vst [vmem:[#allocation2 + $0x190] sm:$0xf] %v5177_v22  ;;  %v4739_v10 = vpop.permute.xlu0 %4738  ;;  %v4651_v52 = vrot.slane %v10384_v36, %v7836_v56 }
 0x283   : > { %v4779_v18 = vrot.slane %v4771_v47, 4  ;;  %5180 = vst [vmem:[#allocation2 + $0xf8] sm:$0xf] %v5176_v14  ;;  %v4663_v19 = vrot.slane %v10384_v36, %v7831_v54  ;;  %v5778_v30 = vrot.slane %v5770_v13, 4  ;;  %v5781_v9 = vrot.slane %v5773_v31, 4 }
 0x284   : > { %v4741_v2 = vsel %vm4740_vm1, %v4737_v43, %v4739_v10  ;;  %v4744_v48 = vsel %vm4740_vm1, %v4739_v10, %v10321_v5  ;;  %4784 = vst [vmem:[#allocation2 + $0x50] sm:$0xf0] %v4776_v57  ;;  %v5092_v29 = vrot.slane %v10417_v38, %v7845_v58  ;;  %v5679_v12 = vrot.slane %v10427_v42, %v7836_v56 }
 0x285   : > { %4787 = vst [vmem:[#allocation2 + $0x48] sm:$0xf0] %v4779_v18  ;;  %v4769_v55 = vmul.f32 %v4755_v44, %v4741_v2  ;;  %v4770_v45 = vmul.f32 %v4759_v0, %v4744_v48  ;;  %v5175_v17 = vmul.f32 %v5158_v32, %v4744_v48  ;;  %v5178_v5 = vmul.f32 %v5170_v23, %v4741_v2  ;;  %v4593_v0 = vpop.permute.xlu1 %4592 }
 0x286   : > { %5786 = vst [vmem:[#allocation2 + $0x10] sm:$0xf0] %v5778_v30  ;;  %5789 = vst [vmem:[#allocation2 + $0x20] sm:$0xf0] %v5781_v9  ;;  %v5771_v44 = vmul.f32 %v5757_v33, %v4741_v2  ;;  %v5772_v20 = vmul.f32 %v5761_v8, %v4744_v48  ;;  %v5088_v32 = vrot.slane %v10417_v38, %v7825_v51  ;;  %v4591_v3 = vpop.permute.xlu0 %4590 }
 0x287   : > { %v4777_v23 = vrot.slane %v4769_v55, 4  ;;  %v4778_v27 = vrot.slane %v4770_v45, 4  ;;  %5179 = vst [vmem:[#allocation2 + $0xe8] sm:$0xf] %v5175_v17  ;;  %5182 = vst [vmem:[#allocation2 + $0xb8] sm:$0xf] %v5178_v5  ;;  %v5691_v33 = vrot.slane %v10427_v42, %v7831_v54  ;;  %v4598_v43 = vsel %vm4596_vm2, %v4591_v3, %v4593_v0 }
 0x288   : > { %v5779_v39 = vrot.slane %v5771_v44, 4  ;;  %v5780_v8 = vrot.slane %v5772_v20, 4  ;;  %v4599_v46 = vsel %vm4596_vm2, %v10404_v11, %v4591_v3  ;;  %v4624_v49 = vmul.f32 %v4607_v53, %v4598_v43  ;;  %v10506_v30 = vld [vmem:[%s10837_s1 + $0x106] ss:$8 sm:$0xf] }
 0x289   : > { %4785 = vst [vmem:[#allocation2 + $0x168] sm:$0xf0] %v4777_v23  ;;  %4786 = vst [vmem:[#allocation2 + $0x130] sm:$0xf0] %v4778_v27  ;;  %v4627_v25 = vmul.f32 %v4619_v59, %v4599_v46  ;;  %v5059_v4 = vmul.f32 %v5045_v60, %v4599_v46  ;;  %v5060_v41 = vmul.f32 %v5049_v26, %v4598_v43  ;;  %v10479_v47 = vpop.permute.xlu1 %4632 }
 0x28a   : > { %5787 = vst [vmem:[#allocation2 + $0x100] sm:$0xf0] %v5779_v39  ;;  %5788 = vst [vmem:[#allocation2 + $0x160] sm:$0xf0] %v5780_v8  ;;  %v5665_v62 = vmul.f32 %v5648_v15, %v4598_v43  ;;  %v5668_v53 = vmul.f32 %v5660_v63, %v4599_v46  ;;  %v4655_v59 = vrot.slane %v10384_v36, %v7825_v51  ;;  %v4595_v22 = vpop.permute.xlu0 %4594 }
 0x28b   : > { %v4659_v60 = vrot.slane %v10384_v36, %v7845_v58  ;;  %4628 = vst [vmem:[#allocation2 + $0xb0] sm:$0xf] %v4624_v49  ;;  %4631 = vst [vmem:[#allocation2 + $0x18] sm:$0xf] %v4627_v25  ;;  %v5067_v26 = vrot.slane %v5059_v4, 4  ;;  %v5068_v14 = vrot.slane %v5060_v41, 4  ;;  %v5084_v15 = vrot.slane %v10417_v38, %v7836_v56 }
 0x28c   : > { %v5096_v13 = vrot.slane %v10417_v38, %v7831_v54  ;;  %v10492_v63 = vld [vmem:[%s10837_s1 + $0xe5] ss:$8 sm:$0xf]  ;;  %5669 = vst [vmem:[#allocation2 + $0x40] sm:$0xf] %v5665_v62  ;;  %v4597_v31 = vsel %vm4596_vm2, %v4593_v0, %v4595_v22  ;;  %v4600_v57 = vsel %vm4596_vm2, %v4595_v22, %v10404_v11  ;;  %v5683_v18 = vrot.slane %v10427_v42, %v7825_v51 }
 0x28d   : > { %5672 = vst [vmem:[#allocation2 + $0x1a0] sm:$0xf] %v5668_v53  ;;  %v5687_v10 = vrot.slane %v10427_v42, %v7845_v58  ;;  %5075 = vst [vmem:[#allocation2 + $0x188] sm:$0xf0] %v5067_v26  ;;  %v4625_v9 = vmul.f32 %v4611_v7, %v4597_v31  ;;  %v4626_v11 = vmul.f32 %v4615_v6, %v4600_v57  ;;  %v4637_v6 = vpop.permute.xlu1 %4636 }
 0x28e   : > { %5076 = vst [vmem:[#allocation2 + $0x138] sm:$0xf0] %v5068_v14  ;;  %v5058_v2 = vmul.f32 %v5041_v1, %v4600_v57  ;;  %v5061_v48 = vmul.f32 %v5053_v35, %v4597_v31  ;;  %v10524_v55 = vld [vmem:[%s10837_s1 + $0x127] ss:$8 sm:$0xf]  ;;  %v5666_v50 = vmul.f32 %v5652_v21, %v4597_v31  ;;  %v5667_v7 = vmul.f32 %v5656_v28, %v4600_v57  ;;  %v4635_v17 = vpop.permute.xlu0 %4634 }
 0x28f   : > { %v4946_v24 = vrot.slane %v10492_v63, %v7845_v58  ;;  %v4950_v1 = vrot.slane %v10492_v63, %v7831_v54  ;;  %4629 = vst [vmem:[#allocation2 + $0x1b0] sm:$0xf] %v4625_v9  ;;  %4630 = vst [vmem:[#allocation2 + $0xd8] sm:$0xf] %v4626_v11  ;;  %v5574_v5 = vrot.slane %v10506_v30, %v7836_v56 }
 0x290   : > { %v5066_v35 = vrot.slane %v5058_v2, 4  ;;  %v5069_v45 = vrot.slane %v5061_v48, 4  ;;  %v5578_v21 = vrot.slane %v10506_v30, %v7825_v51  ;;  %5670 = vst [vmem:[#allocation2 + $0xa8] sm:$0xf] %v5666_v50  ;;  %5671 = vst [vmem:[#allocation2 + $0xd0] sm:$0xf] %v5667_v7  ;;  %v4642_v61 = vsel %vm4640_vm3, %v4635_v17, %v4637_v6 }
 0x291   : > { %v4643_v28 = vsel %vm4640_vm3, %v10479_v47, %v4635_v17  ;;  %v6075_v44 = vrot.slane %v10524_v55, %v7845_v58  ;;  %v6079_v20 = vrot.slane %v10524_v55, %v7831_v54  ;;  %v4668_v0 = vmul.f32 %v4651_v52, %v4642_v61  ;;  %v10567_v8 = vpop.permute.xlu1 %4919  ;;  %v10585_v41 = vld [vmem:[%s10837_s1 + $0xe6] ss:$8 sm:$0xf]  ;;  %v10621_v2 = vld [vmem:[%s10837_s1 + $0x140] ss:$8 sm:$0xf] }
 0x292   : > { %5074 = vst [vmem:[#allocation2 + $0xe0] sm:$0xf0] %v5066_v35  ;;  %5077 = vst [vmem:[#allocation2 + $0x140] sm:$0xf0] %v5069_v45  ;;  %v4671_v23 = vmul.f32 %v4663_v19, %v4643_v28  ;;  %v5102_v27 = vmul.f32 %v5088_v32, %v4643_v28  ;;  %v5103_v3 = vmul.f32 %v5092_v29, %v4642_v61  ;;  %v4639_v29 = vpop.permute.xlu0 %4638 }
 0x293   : > { %v5696_v39 = vmul.f32 %v5679_v12, %v4642_v61  ;;  %v5699_v52 = vmul.f32 %v5691_v33, %v4643_v28  ;;  %v4938_v19 = vrot.slane %v10492_v63, %v7836_v56  ;;  %v4942_v32 = vrot.slane %v10492_v63, %v7825_v51 }
 0x294   : > { %v4676_v43 = vrot.slane %v4668_v0, 4  ;;  %v4679_v46 = vrot.slane %v4671_v23, 4  ;;  %5106 = vst [vmem:[#allocation2 + $0x1a8] sm:$0xf] %v5102_v27  ;;  %5107 = vst [vmem:[#allocation2 + $0x1b8] sm:$0xf] %v5103_v3  ;;  %v5582_v12 = vrot.slane %v10506_v30, %v7845_v58  ;;  %v5586_v42 = vrot.slane %v10506_v30, %v7831_v54 }
 0x295   : > { %v5704_v33 = vrot.slane %v5696_v39, 4  ;;  %v5707_v49 = vrot.slane %v5699_v52, 4  ;;  %v4641_v25 = vsel %vm4640_vm3, %v4637_v6, %v4639_v29  ;;  %v4644_v4 = vsel %vm4640_vm3, %v4639_v29, %v10479_v47  ;;  %v4924_v31 = vpop.permute.xlu1 %4923 }
 0x296   : > { %4684 = vst [vmem:[#allocation2 + $0xb0] sm:$0xf0] %v4676_v43  ;;  %4687 = vst [vmem:[#allocation2 + $0x18] sm:$0xf0] %v4679_v46  ;;  %v4669_v62 = vmul.f32 %v4655_v59, %v4641_v25  ;;  %v4670_v53 = vmul.f32 %v4659_v60, %v4644_v4  ;;  %v5101_v26 = vmul.f32 %v5084_v15, %v4644_v4  ;;  %v4922_v15 = vpop.permute.xlu0 %4921 }
 0x297   : > { %v5104_v47 = vmul.f32 %v5096_v13, %v4641_v25  ;;  %5712 = vst [vmem:[#allocation2 + $0x40] sm:$0xf0] %v5704_v33  ;;  %5715 = vst [vmem:[#allocation2 + $0x1a0] sm:$0xf0] %v5707_v49  ;;  %v5697_v14 = vmul.f32 %v5683_v18, %v4641_v25  ;;  %v5698_v22 = vmul.f32 %v5687_v10, %v4644_v4 }
 0x298   : > { %v6067_v59 = vrot.slane %v10524_v55, %v7836_v56  ;;  %v6071_v36 = vrot.slane %v10524_v55, %v7825_v51  ;;  %v4677_v60 = vrot.slane %v4669_v62, 4  ;;  %v4678_v57 = vrot.slane %v4670_v53, 4  ;;  %5105 = vst [vmem:[#allocation2 + $0x80] sm:$0xf] %v5101_v26 }
 0x299   : > { %5108 = vst [vmem:[#allocation2 + $0x28] sm:$0xf] %v5104_v47  ;;  %v5018_v38 = vrot.slane %v10585_v41, %v7845_v58  ;;  %v5022_v13 = vrot.slane %v10585_v41, %v7831_v54  ;;  %v10611_v18 = vld [vmem:[%s10837_s1 + $0x107] ss:$8 sm:$0xf]  ;;  %v5705_v10 = vrot.slane %v5697_v14, 4  ;;  %v4929_v9 = vsel %vm4927_vm4, %v4922_v15, %v4924_v31  ;;  %v4992_v45 = vpop.permute.xlu1 %4991 }
 0x29a   : > { %v5706_v30 = vrot.slane %v5698_v22, 4  ;;  %v4930_v11 = vsel %vm4927_vm4, %v10567_v8, %v4922_v15  ;;  %4685 = vst [vmem:[#allocation2 + $0x1b0] sm:$0xf0] %v4677_v60  ;;  %4686 = vst [vmem:[#allocation2 + $0xd8] sm:$0xf0] %v4678_v57  ;;  %v4958_v55 = vmul.f32 %v4950_v1, %v4929_v9  ;;  %v5592_v7 = vmul.f32 %v5578_v21, %v4929_v9 }
 0x29b   : > { %v4957_v48 = vmul.f32 %v4946_v24, %v4930_v11  ;;  %v5591_v50 = vmul.f32 %v5574_v5, %v4930_v11  ;;  %5713 = vst [vmem:[#allocation2 + $0xa8] sm:$0xf0] %v5705_v10  ;;  %v6086_v6 = vmul.f32 %v6075_v44, %v4930_v11  ;;  %v6087_v35 = vmul.f32 %v6079_v20, %v4929_v9  ;;  %v4926_v24 = vpop.permute.xlu0 %4925 }
 0x29c   : > { %5714 = vst [vmem:[#allocation2 + $0xd0] sm:$0xf0] %v5706_v30  ;;  %v5605_v17 = vrot.slane %v10611_v18, %v7836_v56  ;;  %v5609_v61 = vrot.slane %v10611_v18, %v7825_v51  ;;  %v4966_v0 = vrot.slane %v4958_v55, 4  ;;  %5596 = vst [vmem:[#allocation2 + $0x68] sm:$0xf] %v5592_v7  ;;  %v6118_v1 = vrot.slane %v10621_v2, %v7845_v58  ;;  %v1602_v9 = vpop.f32.mrf.mxu1 }
 0x29d   : > { %v4965_v28 = vrot.slane %v4957_v48, 4  ;;  %5595 = vst [vmem:[#allocation2] sm:$0xf] %v5591_v50  ;;  %v6122_v5 = vrot.slane %v10621_v2, %v7831_v54  ;;  %v6094_v21 = vrot.slane %v6086_v6, 4  ;;  %v6095_v44 = vrot.slane %v6087_v35, 4  ;;  %v4996_v29 = vpop.permute.xlu1 %4995 }
 0x29e   : > { %v4928_v20 = vsel %vm4927_vm4, %v4924_v31, %v4926_v24  ;;  %v4931_v23 = vsel %vm4927_vm4, %v4926_v24, %v10567_v8  ;;  %4974 = vst [vmem:[#allocation2 + $0x60] sm:$0xf0] %v4966_v0  ;;  %v5010_v8 = vrot.slane %v10585_v41, %v7836_v56  ;;  %v5014_v33 = vrot.slane %v10585_v41, %v7825_v51  ;;  %v1604_v16 = vpop.f32.mrf.mxu1 }
 0x29f   : > { %4973 = vst [vmem:[#allocation2 + $0x108] sm:$0xf0] %v4965_v28  ;;  %v4955_v27 = vmul.f32 %v4938_v19, %v4928_v20  ;;  %v4956_v3 = vmul.f32 %v4942_v32, %v4931_v23  ;;  %v5593_v39 = vmul.f32 %v5582_v12, %v4928_v20  ;;  %v5594_v52 = vmul.f32 %v5586_v42, %v4931_v23  ;;  %v4994_v19 = vpop.permute.xlu0 %4993 }
 0x2a0   : > { %6102 = vst [vmem:[#allocation2 + $0x88] sm:$0xf0] %v6094_v21  ;;  %6103 = vst [vmem:[#allocation2 + $0x170] sm:$0xf0] %v6095_v44  ;;  %v6084_v43 = vmul.f32 %v6067_v59, %v4928_v20  ;;  %v6085_v46 = vmul.f32 %v6071_v36, %v4931_v23  ;;  %v5613_v63 = vrot.slane %v10611_v18, %v7845_v58 }
 0x2a1   : > { %v4963_v49 = vrot.slane %v4955_v27, 4  ;;  %v4964_v25 = vrot.slane %v4956_v3, 4  ;;  %5597 = vst [vmem:[#allocation2 + $0x148] sm:$0xf] %v5593_v39  ;;  %5598 = vst [vmem:[#allocation2 + $0x8] sm:$0xf] %v5594_v52  ;;  %v5617_v32 = vrot.slane %v10611_v18, %v7831_v54  ;;  %v5001_v4 = vsel %vm4999_vm5, %v4994_v19, %v4996_v29 }
 0x2a2   : > { %v6092_v12 = vrot.slane %v6084_v43, 4  ;;  %v6093_v42 = vrot.slane %v6085_v46, 4  ;;  %v5002_v62 = vsel %vm4999_vm5, %v4992_v45, %v4994_v19  ;;  %v5030_v53 = vmul.f32 %v5022_v13, %v5001_v4 }
 0x2a3   : > { %4971 = vst [vmem:[#allocation2 + $0x120] sm:$0xf0] %v4963_v49  ;;  %4972 = vst [vmem:[#allocation2 + $0x150] sm:$0xf0] %v4964_v25  ;;  %v5029_v41 = vmul.f32 %v5018_v38, %v5002_v62  ;;  %v5622_v26 = vmul.f32 %v5605_v17, %v5002_v62  ;;  %v5623_v47 = vmul.f32 %v5609_v61, %v5001_v4  ;;  %v4998_v36 = vpop.permute.xlu0 %4997  ;;  %v1531_v11 = vpop.f32.mrf.mxu0 }
 0x2a4   : > { %6100 = vst [vmem:[#allocation2 + $0x128] sm:$0xf0] %v6092_v12  ;;  %6101 = vst [vmem:[#allocation2 + $0x38] sm:$0xf0] %v6093_v42  ;;  %v6129_v58 = vmul.f32 %v6118_v1, %v5002_v62  ;;  %v6130_v14 = vmul.f32 %v6122_v5, %v5001_v4  ;;  %v6110_v54 = vrot.slane %v10621_v2, %v7836_v56 }
 0x2a5   : > { %v6114_v22 = vrot.slane %v10621_v2, %v7825_v51  ;;  %5033 = vst [vmem:[#allocation2 + $0x138] sm:$0xf] %v5029_v41  ;;  %5034 = vst [vmem:[#allocation2 + $0x140] sm:$0xf] %v5030_v53  ;;  %v5630_v31 = vrot.slane %v5622_v26, 4  ;;  %v5631_v59 = vrot.slane %v5623_v47, 4  ;;  %v5000_v60 = vsel %vm4999_vm5, %v4996_v29, %v4998_v36  ;;  %v1533_v2 = vpop.f32.mrf.mxu0 }
 0x2a6   : > { %6133 = vst [vmem:[#allocation2 + $0x30] sm:$0xf] %v6129_v58  ;;  %6134 = vst [vmem:[#allocation2 + $0x198] sm:$0xf] %v6130_v14  ;;  %v5003_v57 = vsel %vm4999_vm5, %v4998_v36, %v4992_v45  ;;  %v5027_v15 = vmul.f32 %v5010_v8, %v5000_v60  ;;  %v5624_v38 = vmul.f32 %v5613_v63, %v5000_v60 }
 0x2a7   : > { %5638 = vst [vmem:[#allocation2] sm:$0xf0] %v5630_v31  ;;  %5639 = vst [vmem:[#allocation2 + $0x68] sm:$0xf0] %v5631_v59  ;;  %v5028_v56 = vmul.f32 %v5014_v33, %v5003_v57  ;;  %v5625_v13 = vmul.f32 %v5617_v32, %v5003_v57  ;;  %v6127_v51 = vmul.f32 %v6110_v54, %v5000_v60 }
 0x2a8   : > { %v6128_v18 = vmul.f32 %v6114_v22, %v5003_v57  ;;  %5031 = vst [vmem:[#allocation2 + $0xe0] sm:$0xf] %v5027_v15  ;;  %v5632_v10 = vrot.slane %v5624_v38, 4 }
 0x2a9   : > { %5032 = vst [vmem:[#allocation2 + $0x188] sm:$0xf] %v5028_v56  ;;  %v5633_v30 = vrot.slane %v5625_v13, 4  ;;  %6131 = vst [vmem:[#allocation2 + $0x58] sm:$0xf] %v6127_v51  ;;  %v10670_v13 = vld [vmem:[#allocation2 + $0xb0] sm:$0xff] }
 0x2aa   : > { %6132 = vst [vmem:[#allocation2 + $0xf0] sm:$0xf] %v6128_v18  ;;  %5640 = vst [vmem:[#allocation2 + $0x148] sm:$0xf0] %v5632_v10  ;;  %v10672_v51 = vld [vmem:[#allocation2 + $0xd8] sm:$0xff] }
 0x2ab   : > { %5641 = vst [vmem:[#allocation2 + $0x8] sm:$0xf0] %v5633_v30 }
 0x304   : > { %v1675_v48 = vpop.f32.mrf.mxu0 }
 0x305   : > { %v1676_v63 = vadd.f32 %v1675_v48, %v1531_v11  ;;  %v10679_v11 = vld [vmem:[%s10846_s10] sm:$0xff] }
 0x306   : > { %v1746_v55 = vpop.f32.mrf.mxu1  ;;  %v1677_v50 = vpop.f32.mrf.mxu0 }
 0x307   : > { %v1747_v32 = vadd.f32 %v1746_v55, %v1602_v9  ;;  %v1678_v12 = vadd.f32 %v1677_v50, %v1533_v2  ;;  %v10683_v2 = vld [vmem:[#allocation2 + $0x18] sm:$0xff] }
 0x308   : > { %v1748_v7 = vpop.f32.mrf.mxu1 }
 0x309   : > { %v1749_v42 = vadd.f32 %v1748_v7, %v1604_v16  ;;  %v10681_v16 = vld [vmem:[#allocation2 + $0x1b0] sm:$0xff]  ;;  %v5274_v7 = vld [vmem:[#allocation2 + $0xc0] sm:$0xff] }
 0x315   : > { %v2159_v6 = vpop.f32.mrf.mxu0  ;;  %v2230_v35 = vpop.f32.mrf.mxu1 }
 0x316   : > { %v2235_v58 = vadd.f32 %v2159_v6, %v1676_v63  ;;  %v2237_v14 = vadd.f32 %v2230_v35, %v1747_v32  ;;  %v5276_v6 = vld [vmem:[#allocation2 + $0xc8] sm:$0xff]  ;;  %v5273_v35 = vld [vmem:[#allocation2 + $0x90] sm:$0xff] }
 0x317   : > { %v2161_v45 = vpop.f32.mrf.mxu0  ;;  %v2232_v17 = vpop.f32.mrf.mxu1  ;;  %v4979_v63 = vld [vmem:[#allocation2 + $0x50] sm:$0xff] }
 0x318   : > { %v2236_v54 = vadd.f32 %v2161_v45, %v1678_v12  ;;  %v2238_v22 = vadd.f32 %v2232_v17, %v1749_v42  ;;  %v5275_v45 = vld [vmem:[#allocation2 + $0x178] sm:$0xff]  ;;  %v4981_v32 = vld [vmem:[#allocation2 + $0x130] sm:$0xff]  ;;  %v7453_v12 = vld [vmem:[%s10842_s6] sm:$0xf] }
 0x319   : > { %v5270_v17 = vld [vmem:[#allocation2 + $0xf8] sm:$0xff] }
 0x31a   : > { %v5877_v42 = vld [vmem:[#allocation2 + $0x78] sm:$0xff] }
 0x31b   : > { %v2436_v61 = vpop.f32.mrf.mxu0  ;;  %v2507_v28 = vpop.f32.mrf.mxu1 }
 0x31c   : > { %v2512_v18 = vadd.f32 %v2436_v61, %v2235_v58  ;;  %v2514_v10 = vadd.f32 %v2507_v28, %v2237_v14  ;;  %v5272_v61 = vld [vmem:[#allocation2 + $0xb8] sm:$0xff]  ;;  %v5269_v28 = vld [vmem:[#allocation2 + $0xe8] sm:$0xff]  ;;  %v5874_v58 = vld [vmem:[#allocation2 + $0x160] sm:$0xff] }
 0x31d   : > { %v2438_v0 = vpop.f32.mrf.mxu0  ;;  %v2509_v24 = vpop.f32.mrf.mxu1  ;;  %v5869_v14 = vld [vmem:[#allocation2 + $0xa8] sm:$0xff] }
 0x31e   : > { %v2513_v56 = vadd.f32 %v2438_v0, %v2236_v54  ;;  %v2515_v38 = vadd.f32 %v2509_v24, %v2238_v22  ;;  %v2521_v55 = vadd.f32 %v10240_v34, %v2512_v18  ;;  %v2523_v50 = vadd.f32 %v10240_v34, %v2514_v10  ;;  %v5271_v0 = vld [vmem:[#allocation2 + $0x190] sm:$0xff]  ;;  %v5266_v24 = vld [vmem:[#allocation2 + $0x1a8] sm:$0xff]  ;;  %v5871_v54 = vld [vmem:[#allocation2 + $0x1a0] sm:$0xff] }
 0x31f   : > { %v5868_v22 = vld [vmem:[#allocation2 + $0x40] sm:$0xff]  ;;  %v6136_v18 = vld [vmem:[#allocation2 + $0x38] sm:$0xff]  ;;  %v6138_v10 = vld [vmem:[#allocation2 + $0x170] sm:$0xff] }
 0x320   : > { %v2524_v48 = vadd.f32 %v10240_v34, %v2515_v38  ;;  %v6142_v38 = vld [vmem:[#allocation2 + $0x198] sm:$0xf] }
 0x324   : > { %v3359_v5 = vpop.f32.mrf.mxu1 }
 0x325   : > { %v3288_v1 = vpop.f32.mrf.mxu0 }
 0x326   : > { %v3361_v44 = vpop.f32.mrf.mxu1 }
 0x327   : > { %v3290_v21 = vpop.f32.mrf.mxu0 }
 0x32e   : > { %v3432_v20 = vpop.f32.mrf.mxu0  ;;  %v3503_v23 = vpop.f32.mrf.mxu1 }
 0x32f   : > { %v3433_v29 = vadd.f32 %v3432_v20, %v3288_v1  ;;  %v3504_v8 = vadd.f32 %v3503_v23, %v3359_v5  ;;  %v5268_v1 = vld [vmem:[#allocation2 + $0x28] sm:$0xff]  ;;  %v5265_v5 = vld [vmem:[#allocation2 + $0x80] sm:$0xff] }
 0x330   : > { %v3434_v27 = vpop.f32.mrf.mxu0  ;;  %v3505_v3 = vpop.f32.mrf.mxu1  ;;  %v5264_v20 = vld [vmem:[#allocation2 + $0x140] sm:$0xff] }
 0x331   : > { %v3435_v33 = vadd.f32 %v3434_v27, %v3290_v21  ;;  %v3506_v49 = vadd.f32 %v3505_v3, %v3361_v44  ;;  %v5267_v21 = vld [vmem:[#allocation2 + $0x1b8] sm:$0xff]  ;;  %v5262_v44 = vld [vmem:[#allocation2 + $0x188] sm:$0xff]  ;;  %v5261_v23 = vld [vmem:[#allocation2 + $0xe0] sm:$0xff]  ;;  %v5279_v3 = vpop.permute.xlu1 %5278 }
 0x332   : > { %v5263_v27 = vld [vmem:[#allocation2 + $0x138] sm:$0xff] }
 0x338   : > { %v3890_v39 = vpop.f32.mrf.mxu0  ;;  %v3961_v52 = vpop.f32.mrf.mxu1 }
 0x339   : > { %v3966_v25 = vadd.f32 %v3890_v39, %v3433_v29  ;;  %v3968_v19 = vadd.f32 %v3961_v52, %v3504_v8  ;;  %v4988_v39 = vld [vmem:[#allocation2 + $0x150] sm:$0xff]  ;;  %v4990_v52 = vld [vmem:[#allocation2 + $0x60] sm:$0xff]  ;;  %v4986_v8 = vld [vmem:[#allocation2 + $0x98] sm:$0xff] }
 0x33a   : > { %v3892_v43 = vpop.f32.mrf.mxu0  ;;  %v3963_v46 = vpop.f32.mrf.mxu1  ;;  %v4984_v29 = vld [vmem:[#allocation2 + $0x110] sm:$0xff] }
 0x33b   : > { %v3967_v41 = vadd.f32 %v3892_v43, %v3435_v33  ;;  %v3969_v53 = vadd.f32 %v3963_v46, %v3506_v49  ;;  %v4987_v43 = vld [vmem:[#allocation2 + $0x120] sm:$0xff]  ;;  %v4989_v46 = vld [vmem:[#allocation2 + $0x108] sm:$0xff]  ;;  %v4985_v49 = vld [vmem:[#allocation2 + $0x118] sm:$0xff] }
 0x33c   : > { %v4983_v33 = vld [vmem:[#allocation2 + $0x180] sm:$0xff] }
 0x33e   : > { %v4165_v4 = vpop.f32.mrf.mxu0  ;;  %v4236_v62 = vpop.f32.mrf.mxu1 }
 0x33f   : > { %v4241_v26 = vadd.f32 %v4165_v4, %v3966_v25  ;;  %v4243_v47 = vadd.f32 %v4236_v62, %v3968_v19  ;;  %v4980_v25 = vld [vmem:[#allocation2 + $0x168] sm:$0xff]  ;;  %v5879_v4 = vld [vmem:[#allocation2 + $0x158] sm:$0xff]  ;;  %v5876_v62 = vld [vmem:[#allocation2 + $0x70] sm:$0xff] }
 0x340   : > { %v4167_v31 = vpop.f32.mrf.mxu0  ;;  %v4238_v59 = vpop.f32.mrf.mxu1  ;;  %v4982_v19 = vld [vmem:[#allocation2 + $0x48] sm:$0xff] }
 0x341   : > { %v4250_v36 = vadd.f32 %v10122_v40, %v4241_v26  ;;  %v4252_v60 = vadd.f32 %v10122_v40, %v4243_v47  ;;  %v4242_v57 = vadd.f32 %v4167_v31, %v3967_v41  ;;  %v4244_v15 = vadd.f32 %v4238_v59, %v3969_v53  ;;  %v5878_v41 = vld [vmem:[#allocation2 + $0xa0] sm:$0xff]  ;;  %v5872_v47 = vld [vmem:[#allocation2 + $0x10] sm:$0xff]  ;;  %v5865_v59 = vld [vmem:[#allocation2 + $0x68] sm:$0xff] }
 0x342   : > { %v5873_v53 = vld [vmem:[#allocation2 + $0x100] sm:$0xff]  ;;  %v5870_v31 = vld [vmem:[#allocation2 + $0xd0] sm:$0xff] }
 0x343   : > { %v4251_v30 = vadd.f32 %v10122_v40, %v4242_v57  ;;  %v4253_v9 = vadd.f32 %v10122_v40, %v4244_v15  ;;  %6317 = vst [vmem:[#allocation2 + $0xb0] sm:$0xf] %v4250_v36  ;;  %6319 = vst [vmem:[#allocation2 + $0xd8] sm:$0xf] %v4252_v60  ;;  %v2522_v40 = vadd.f32 %v10240_v34, %v2513_v56  ;;  %v10704_v34 = vld [vmem:[%s10845_s9] sm:$0xff]  ;;  %v5866_v57 = vld [vmem:[#allocation2 + $0x148] sm:$0xff]  ;;  %v5881_v15 = vpop.permute.xlu0 %5880 }
 0x344   : > { %v5875_v26 = vld [vmem:[#allocation2 + $0x20] sm:$0xff]  ;;  %v6140_v56 = vld [vmem:[#allocation2 + $0xf0] sm:$0xf] }
 0x345   : > { %7324 = vmatprep.subr.msk.mxu0 %vm2357_vm11, %v4251_v30  ;;  %7327 = vmatprep.subr.msk.mxu1 %vm2357_vm11, %v4253_v9  ;;  %6318 = vst [vmem:[#allocation2 + $0x1b0] sm:$0xf] %v4251_v30  ;;  %6320 = vst [vmem:[#allocation2 + $0x18] sm:$0xf] %v4253_v9  ;;  %v6135_v30 = vld [vmem:[#allocation2 + $0x128] sm:$0xff] }
 0x346   : > { %7325 = vmatpush1.msk.msra.mxu0 %vm2357_vm11, %v4250_v36  ;;  %7328 = vmatpush1.msk.msra.mxu1 %vm2357_vm11, %v4252_v60  ;;  %v5867_v36 = vld [vmem:[#allocation2 + $0x8] sm:$0xff]  ;;  %v5864_v60 = vld [vmem:[#allocation2] sm:$0xff] }
 0x347   : > { %7326 = vmatmul.mubr.msk.f32.vlgmr.msra.gmra.mxu0 %vm4256_vm6, %v10679_v11  ;;  %7329 = vmatmul.mubr.msk.f32.vlgmr.msra.gmra.mxu1 %vm4256_vm6, %v10679_v11  ;;  %v6137_v9 = vld [vmem:[#allocation2 + $0x88] sm:$0xff] }
 0x348   : > { %7330 = vmatprep.subr.msk.mxu0 %vm2357_vm11, %v2522_v40  ;;  %7333 = vmatprep.subr.msk.mxu1 %vm2357_vm11, %v2524_v48 }
 0x349   : > { %7331 = vmatpush1.msk.msra.mxu0 %vm2357_vm11, %v2521_v55  ;;  %7334 = vmatpush1.msk.msra.mxu1 %vm2357_vm11, %v2523_v50  ;;  %v6316_v50 = vld [vmem:[%s10843_s7] sm:$0xf] }
 0x34a   : > { %5306 = vmatprep.subr.mxu0 %v5274_v7  ;;  %5377 = vmatprep.subr.mxu1 %v5276_v6  ;;  %v6321_v48 = vld [vmem:[#allocation2 + $0xb0] sm:$0xf]  ;;  %v6323_v55 = vld [vmem:[#allocation2 + $0xd8] sm:$0xf] }
 0x34b   : > { %4493 = vmatprep.mubr.f32.mxu0 %v11315_v37  ;;  %4564 = vmatprep.mubr.f32.mxu1 %v11315_v37 }
 0x34c   : > { %7332 = vmatmul.mubr.msk.f32.vlgmr.msra.gmra.mxu0 %vm4256_vm6, %v10704_v34  ;;  %7335 = vmatmul.mubr.msk.f32.vlgmr.msra.gmra.mxu1 %vm4256_vm6, %v10704_v34  ;;  %v6324_v40 = vld [vmem:[#allocation2 + $0x18] sm:$0xf] }
 0x34d   : > { %5307 = vmatpush1.msra.mxu0 %v5273_v35  ;;  %5378 = vmatpush1.msra.mxu1 %v5275_v45 }
 0x34e   : > { %5308 = vmatprep.subr.mxu0 %v5270_v17  ;;  %5379 = vmatprep.subr.mxu1 %v5272_v61 }
 0x34f   : > { %5309 = vmatpush1.msra.mxu0 %v5269_v28  ;;  %5380 = vmatpush1.msra.mxu1 %v5271_v0 }
 0x350   : > { %5310 = vmatprep.subr.mxu0 %v5266_v24  ;;  %5381 = vmatprep.subr.mxu1 %v5268_v1 }
 0x351   : > { %5311 = vmatpush1.msra.mxu0 %v5265_v5  ;;  %5382 = vmatpush1.msra.mxu1 %v5267_v21 }
 0x352   : > { %5312 = vmatprep.subr.mxu0 %v5262_v44  ;;  %5383 = vmatprep.subr.mxu1 %v5264_v20 }
 0x353   : > { %5313 = vmatpush1.msra.mxu0 %v5261_v23  ;;  %5346 = vmatprep.mubr.f32.mxu0 %v11315_v37 }
 0x354   : > { %5384 = vmatpush1.msra.mxu1 %v5263_v27  ;;  %5417 = vmatprep.mubr.f32.mxu1 %v11315_v37 }
 0x355   : > { %7352 = vmatmul.mubr.msk.f32.vlgmr.msra.gmra.mxu0 %vm1462_vm13, %v5279_v3  ;;  %7353 = vmatmul.mubr.msk.f32.vlgmr.msra.gmra.mxu1 %vm1462_vm13, %v5279_v3 }
 0x356   : > { %5450 = vmatprep.subr.mxu0 %v4988_v39  ;;  %5521 = vmatprep.subr.mxu1 %v4990_v52 }
 0x357   : > { %5451 = vmatpush1.msra.mxu0 %v4987_v43  ;;  %5522 = vmatpush1.msra.mxu1 %v4989_v46 }
 0x358   : > { %5452 = vmatprep.subr.mxu0 %v4984_v29  ;;  %5523 = vmatprep.subr.mxu1 %v4986_v8 }
 0x359   : > { %5453 = vmatpush1.msra.mxu0 %v4983_v33  ;;  %5524 = vmatpush1.msra.mxu1 %v4985_v49 }
 0x35a   : > { %5454 = vmatprep.subr.mxu0 %v4980_v25  ;;  %5525 = vmatprep.subr.mxu1 %v4982_v19 }
 0x35b   : > { %5455 = vmatpush1.msra.mxu0 %v4979_v63  ;;  %5526 = vmatpush1.msra.mxu1 %v4981_v32 }
 0x35c   : > { %5456 = vmatprep.subr.mxu0 %v10681_v16  ;;  %5527 = vmatprep.subr.mxu1 %v10683_v2  ;;  %v6144_v16 = vpop.permute.xlu1 %6143  ;;  %v6322_v2 = vld [vmem:[#allocation2 + $0x1b0] sm:$0xf] }
 0x35d   : > { %5457 = vmatpush1.msra.mxu0 %v10670_v13  ;;  %5490 = vmatprep.mubr.f32.mxu0 %v11315_v37  ;;  %v6139_v13 = vld [vmem:[#allocation2 + $0x58] sm:$0xf] }
 0x35e   : > { %5528 = vmatpush1.msra.mxu1 %v10672_v51  ;;  %5561 = vmatprep.mubr.f32.mxu1 %v11315_v37  ;;  %v6141_v51 = vld [vmem:[#allocation2 + $0x30] sm:$0xf] }
 0x35f   : > { %7354 = vmatmul.mubr.msk.f32.vlgmr.msra.gmra.mxu0 %vm1462_vm13, %v7453_v12  ;;  %7355 = vmatmul.mubr.msk.f32.vlgmr.msra.gmra.mxu1 %vm1462_vm13, %v7453_v12 }
 0x360   : > { %5908 = vmatprep.subr.mxu0 %v5877_v42  ;;  %5979 = vmatprep.subr.mxu1 %v5879_v4 }
 0x361   : > { %5909 = vmatpush1.msra.mxu0 %v5876_v62  ;;  %5980 = vmatpush1.msra.mxu1 %v5878_v41  ;;  %v6328_v62 = vpop.permute.xlu0 %6327 }
 0x362   : > { %5910 = vmatprep.subr.mxu0 %v5873_v53  ;;  %5981 = vmatprep.subr.mxu1 %v5875_v26  ;;  %v11329_v26 = vld [vmem:[#allocation5_spill] sm:$0xff] }
 0x363   : > { %5911 = vmatpush1.msra.mxu0 %v5872_v47  ;;  %5982 = vmatpush1.msra.mxu1 %v5874_v58  ;;  %v661_v47 = vadd.f32 %v11329_v26, %v11329_v26  ;;  %v11330_v58 = vld [vmem:[#allocation6_spill] sm:$0xff] }
 0x364   : > { %5912 = vmatprep.subr.mxu0 %v5869_v14  ;;  %5983 = vmatprep.subr.mxu1 %v5871_v54  ;;  %v663_v14 = vadd.f32 %v11330_v58, %v11330_v58 }
 0x365   : > { %5913 = vmatpush1.msra.mxu0 %v5868_v22  ;;  %5984 = vmatpush1.msra.mxu1 %v5870_v31 }
 0x366   : > { %5914 = vmatprep.subr.mxu0 %v5865_v59  ;;  %5985 = vmatprep.subr.mxu1 %v5867_v36 }
 0x367   : > { %5915 = vmatpush1.msra.mxu0 %v5864_v60  ;;  %5948 = vmatprep.mubr.f32.mxu0 %v11315_v37 }
 0x368   : > { %5986 = vmatpush1.msra.mxu1 %v5866_v57  ;;  %6019 = vmatprep.mubr.f32.mxu1 %v11315_v37 }
 0x369   : > { %7364 = vmatmul.mubr.msk.f32.vlgmr.msra.gmra.mxu0 %vm1462_vm13, %v5881_v15  ;;  %7365 = vmatmul.mubr.msk.f32.vlgmr.msra.gmra.mxu1 %vm1462_vm13, %v5881_v15  ;;  %vm6825_vm13 = vcmask 64512  }
 0x36a   : > { %7369 = vmatprep.subr.msk.mxu0 %vm2357_vm11, %v6140_v56  ;;  %7372 = vmatprep.subr.msk.mxu1 %vm2357_vm11, %v6142_v38 }
 0x36b   : > { %7370 = vmatpush1.msk.msra.mxu0 %vm2357_vm11, %v6139_v13  ;;  %7373 = vmatpush1.msk.msra.mxu1 %vm2357_vm11, %v6141_v51 }
 0x36c   : > { %6189 = vmatprep.subr.mxu0 %v6136_v18  ;;  %6260 = vmatprep.subr.mxu1 %v6138_v10  ;;  %v11331_v18 = vld [vmem:[#allocation3_spill] sm:$0xff] }
 0x36d   : > { %6190 = vmatpush1.msra.mxu0 %v6135_v30  ;;  %6223 = vmatprep.mubr.f32.mxu0 %v11315_v37  ;;  %v660_v10 = vadd.f32 %v11331_v18, %v11331_v18  ;;  %v11332_v30 = vld [vmem:[#allocation4_spill] sm:$0xff] }
 0x36e   : > { %6261 = vmatpush1.msra.mxu1 %v6137_v9  ;;  %6294 = vmatprep.mubr.f32.mxu1 %v11315_v37  ;;  %v662_v9 = vadd.f32 %v11332_v30, %v11332_v30 }
 0x36f   : > { %7371 = vmatmul.mubr.msk.f32.vlgmr.msra.gmra.mxu0 %vm2354_vm14, %v6144_v16  ;;  %7374 = vmatmul.mubr.msk.f32.vlgmr.msra.gmra.mxu1 %vm2354_vm14, %v6144_v16 }
 0x370   : > { %7376 = vmatprep.subr.msk.mxu0 %vm2357_vm11, %v6322_v2  ;;  %7379 = vmatprep.subr.msk.mxu1 %vm2357_vm11, %v6324_v40 }
 0x371   : > { %7377 = vmatpush1.msk.msra.mxu0 %vm2357_vm11, %v6321_v48  ;;  %7380 = vmatpush1.msk.msra.mxu1 %vm2357_vm11, %v6323_v55 }
 0x372   : > { %6409 = vmatprep.mubr.f32.mxu0 %v11315_v37  ;;  %6480 = vmatprep.mubr.f32.mxu1 %v11315_v37 }
 0x373   : > { %7378 = vmatmul.mubr.msk.f32.vlgmr.msra.gmra.mxu0 %vm4256_vm6, %v6316_v50  ;;  %7381 = vmatmul.mubr.msk.f32.vlgmr.msra.gmra.mxu1 %vm4256_vm6, %v6316_v50 }
 0x374   : > { %6572 = vmatprep.mubr.f32.mxu0 %v11315_v37  ;;  %6643 = vmatprep.mubr.f32.mxu1 %v11315_v37 }
 0x407   : > { %v4338_v7 = vpop.f32.mrf.mxu0  ;;  %v4409_v6 = vpop.f32.mrf.mxu1 }
 0x409   : > { %v4340_v35 = vpop.f32.mrf.mxu0  ;;  %v4411_v45 = vpop.f32.mrf.mxu1 }
 0x40c   : > { %v4495_v17 = vpop.f32.mrf.mxu0  ;;  %v4566_v61 = vpop.f32.mrf.mxu1 }
 0x40d   : > { %v10752_v28 = vadd.f32 %v4495_v17, %v4338_v7  ;;  %v10754_v0 = vadd.f32 %v4566_v61, %v4409_v6  ;;  %v6308_v7 = vpop.permute.xlu1 %6307 }
 0x40e   : > { %v4497_v24 = vpop.f32.mrf.mxu0  ;;  %v4568_v1 = vpop.f32.mrf.mxu1 }
 0x40f   : > { %v10756_v5 = vadd.f32 %v4497_v24, %v4340_v35  ;;  %v10758_v21 = vadd.f32 %v4568_v1, %v4411_v45 }
 0x415   : > { %v5348_v44 = vpop.f32.mrf.mxu0  ;;  %v5419_v20 = vpop.f32.mrf.mxu1 }
 0x417   : > { %v5350_v23 = vpop.f32.mrf.mxu0  ;;  %v5421_v27 = vpop.f32.mrf.mxu1 }
 0x41f   : > { %v5492_v3 = vpop.f32.mrf.mxu0  ;;  %v5563_v39 = vpop.f32.mrf.mxu1 }
 0x420   : > { %v5493_v41 = vadd.f32 %v5492_v3, %v5348_v44  ;;  %v5564_v53 = vadd.f32 %v5563_v39, %v5419_v20 }
 0x421   : > { %v5494_v52 = vpop.f32.mrf.mxu0  ;;  %v5565_v43 = vpop.f32.mrf.mxu1 }
 0x422   : > { %v5495_v32 = vadd.f32 %v5494_v52, %v5350_v23  ;;  %v5566_v12 = vadd.f32 %v5565_v43, %v5421_v27  ;;  %v6811_v52 = vpop.permute.xlu0 %6810 }
 0x429   : > { %v5950_v46 = vpop.f32.mrf.mxu0  ;;  %v6021_v29 = vpop.f32.mrf.mxu1 }
 0x42a   : > { %v6026_v57 = vadd.f32 %v5950_v46, %v5493_v41  ;;  %v6028_v15 = vadd.f32 %v6021_v29, %v5564_v53  ;;  %v6823_v41 = vld [vmem:[%s10849_s13] sm:$0xff] }
 0x42b   : > { %v5952_v8 = vpop.f32.mrf.mxu0  ;;  %v6023_v33 = vpop.f32.mrf.mxu1 }
 0x42c   : > { %v6027_v54 = vadd.f32 %v5952_v8, %v5495_v32  ;;  %v6029_v22 = vadd.f32 %v6023_v33, %v5566_v12 }
 0x42f   : > { %v6225_v49 = vpop.f32.mrf.mxu0  ;;  %v6296_v25 = vpop.f32.mrf.mxu1 }
 0x430   : > { %v6301_v16 = vadd.f32 %v6225_v49, %v6026_v57  ;;  %v6303_v2 = vadd.f32 %v6296_v25, %v6028_v15 }
 0x431   : > { %v6227_v19 = vpop.f32.mrf.mxu0  ;;  %v6298_v63 = vpop.f32.mrf.mxu1 }
 0x432   : > { %v6302_v13 = vadd.f32 %v6227_v19, %v6027_v54  ;;  %v6304_v51 = vadd.f32 %v6298_v63, %v6029_v22  ;;  %v6310_v45 = vadd.f32 %v6308_v7, %v6301_v16  ;;  %v6312_v17 = vadd.f32 %v6308_v7, %v6303_v2 }
 0x433   : > { %v6411_v42 = vpop.f32.mrf.mxu0  ;;  %v6482_v4 = vpop.f32.mrf.mxu1 }
 0x434   : > { %v6412_v31 = vadd.f32 %v6411_v42, %v6328_v62  ;;  %v6483_v59 = vadd.f32 %v6482_v4, %v6328_v62  ;;  %v6311_v6 = vadd.f32 %v6308_v7, %v6302_v13  ;;  %v6313_v35 = vadd.f32 %v6308_v7, %v6304_v51 }
 0x435   : > { %v6413_v36 = vpop.f32.mrf.mxu0  ;;  %v6484_v60 = vpop.f32.mrf.mxu1 }
 0x436   : > { %v6414_v56 = vadd.f32 %v6413_v36, %v6328_v62  ;;  %v6485_v38 = vadd.f32 %v6484_v60, %v6328_v62  ;;  %v6487_v55 = vadd.f32 %v6412_v31, %v660_v10  ;;  %v6489_v50 = vadd.f32 %v6483_v59, %v662_v9 }
 0x438   : > { %v6488_v40 = vadd.f32 %v6414_v56, %v661_v47  ;;  %v6490_v48 = vadd.f32 %v6485_v38, %v663_v14  ;;  %v6822_v47 = vld [vmem:[%s10848_s12 + $0x8] sm:$0xff] }
 0x43a   : > { %7382 = vmatprep.subr.msk.mxu0 %vm2357_vm11, %v6488_v40  ;;  %7385 = vmatprep.subr.msk.mxu1 %vm2357_vm11, %v6490_v48 }
 0x43b   : > { %7383 = vmatpush1.msk.msra.mxu0 %vm2357_vm11, %v6487_v55  ;;  %7386 = vmatpush1.msk.msra.mxu1 %vm2357_vm11, %v6489_v50 }
 0x43c   : > { %7384 = vmatmul.mubr.msk.f32.vlgmr.msra.gmra.mxu0 %vm4256_vm6, %v10679_v11  ;;  %7387 = vmatmul.mubr.msk.f32.vlgmr.msra.gmra.mxu1 %vm4256_vm6, %v10679_v11 }
 0x43d   : > { %7388 = vmatprep.subr.msk.mxu0 %vm2357_vm11, %v6311_v6  ;;  %7391 = vmatprep.subr.msk.mxu1 %vm2357_vm11, %v6313_v35 }
 0x43e   : > { %7389 = vmatpush1.msk.msra.mxu0 %vm2357_vm11, %v6310_v45  ;;  %7392 = vmatpush1.msk.msra.mxu1 %vm2357_vm11, %v6312_v17 }
 0x43f   : > { %6729 = vmatprep.mubr.f32.mxu0 %v11315_v37  ;;  %6800 = vmatprep.mubr.f32.mxu1 %v11315_v37 }
 0x440   : > { %7390 = vmatmul.mubr.msk.f32.vlgmr.msra.gmra.mxu0 %vm4256_vm6, %v10704_v34  ;;  %7393 = vmatmul.mubr.msk.f32.vlgmr.msra.gmra.mxu1 %vm4256_vm6, %v10704_v34  ;;  %v4575_v34 = vpop.permute.xlu1 %4574 }
 0x441   : > { %6896 = vmatprep.mubr.f32.mxu0 %v11315_v37  ;;  %6973 = vmatprep.mubr.f32.mxu1 %v11315_v37  ;;  %v4578_v25 = vadd.f32 %v4575_v34, %v10756_v5  ;;  %v4580_v19 = vadd.f32 %v4575_v34, %v10758_v21  ;;  %v4577_v63 = vadd.f32 %v4575_v34, %v10752_v28  ;;  %v6824_v28 = vld [vmem:[%s10849_s13 + $0x8] sm:$0xff] }
 0x442   : > { %v4579_v32 = vadd.f32 %v4575_v34, %v10754_v0  ;;  %v6821_v0 = vld [vmem:[%s10848_s12] sm:$0xff] }
 0x443   : > { %v4582_v53 = vmax.f32 %v4578_v25, 0.0  ;;  %v4584_v26 = vmax.f32 %v4580_v19, 0.0  ;;  %v4581_v5 = vmax.f32 %v4577_v63, 0.0 }
 0x444   : > { %v4583_v21 = vmax.f32 %v4579_v32, 0.0  ;;  %v7156_v17 = vpop.permute.xlu1 %7155 }
 0x4fc   : > { %v6574_v11 = vpop.f32.mrf.mxu0  ;;  %v6645_v61 = vpop.f32.mrf.mxu1 }
 0x4fe   : > { %v6576_v24 = vpop.f32.mrf.mxu0  ;;  %v6647_v1 = vpop.f32.mrf.mxu1 }
 0x500   : > { %v6731_v44 = vpop.f32.mrf.mxu0  ;;  %v6802_v20 = vpop.f32.mrf.mxu1 }
 0x501   : > { %v6732_v23 = vadd.f32 %v6731_v44, %v6574_v11  ;;  %v6803_v27 = vadd.f32 %v6802_v20, %v6645_v61 }
 0x502   : > { %v6733_v3 = vpop.f32.mrf.mxu0  ;;  %v6804_v39 = vpop.f32.mrf.mxu1 }
 0x503   : > { %v6734_v43 = vadd.f32 %v6733_v3, %v6576_v24  ;;  %v6805_v46 = vadd.f32 %v6804_v39, %v6647_v1  ;;  %v6813_v29 = vadd.f32 %v6811_v52, %v6732_v23  ;;  %v6815_v8 = vadd.f32 %v6811_v52, %v6803_v27 }
 0x505   : > { %v6814_v33 = vadd.f32 %v6811_v52, %v6734_v43  ;;  %v6816_v49 = vadd.f32 %v6811_v52, %v6805_v46  ;;  %v6817_v4 = vmax.f32 %v6813_v29, 0.0  ;;  %v6819_v62 = vmax.f32 %v6815_v8, 0.0 }
 0x507   : > { %v6818_v12 = vmax.f32 %v6814_v33, 0.0  ;;  %v6820_v42 = vmax.f32 %v6816_v49, 0.0 }
 0x509   : > { %6862 = vmatprep.subr.mxu0 %v6818_v12  ;;  %6939 = vmatprep.subr.mxu1 %v6820_v42 }
 0x50a   : > { %6863 = vmatpush1.msra.mxu0 %v6817_v4  ;;  %6940 = vmatpush1.msra.mxu1 %v6819_v62 }
 0x50b   : > { %7394 = vmatmul.mubr.msk.f32.vlgmr.msra.gmra.mxu0 %vm6825_vm13, %v6823_v41  ;;  %7396 = vmatmul.mubr.msk.f32.vlgmr.msra.gmra.mxu1 %vm6825_vm13, %v6823_v41 }
 0x50c   : > { %7022 = vmatprep.subr.mxu0 %v4582_v53  ;;  %7099 = vmatprep.subr.mxu1 %v4584_v26 }
 0x50d   : > { %7023 = vmatpush1.msra.mxu0 %v4581_v5  ;;  %7100 = vmatpush1.msra.mxu1 %v4583_v21 }
 0x50e   : > { %6902 = vmatprep.mubr.f32.mxu0 %v11315_v37  ;;  %6979 = vmatprep.mubr.f32.mxu1 %v11315_v37 }
 0x50f   : > { %7395 = vmatmul.mubr.msk.f32.gmra.mxu0 %vm6825_vm13, %v6824_v28  ;;  %7397 = vmatmul.mubr.msk.f32.gmra.mxu1 %vm6825_vm13, %v6824_v28 }
 0x510   : > { %7056 = vmatprep.mubr.f32.mxu0 %v11315_v37  ;;  %7133 = vmatprep.mubr.f32.mxu1 %v11315_v37 }
 0x513   : > { %7398 = vmatmul.mubr.msk.f32.vlgmr.msra.gmra.mxu0 %vm6825_vm13, %v6821_v0  ;;  %7400 = vmatmul.mubr.msk.f32.vlgmr.msra.gmra.mxu1 %vm6825_vm13, %v6821_v0 }
 0x514   : > { %7062 = vmatprep.mubr.f32.mxu0 %v11315_v37  ;;  %7139 = vmatprep.mubr.f32.mxu1 %v11315_v37  ;;  %v7151_v37 = vpop.permute.xlu0 %7150 }
 0x517   : > { %7399 = vmatmul.mubr.msk.f32.gmra.mxu0 %vm6825_vm13, %v6822_v47  ;;  %7401 = vmatmul.mubr.msk.f32.gmra.mxu1 %vm6825_vm13, %v6822_v47 }
 0x5cb   : > { %v6898_v58 = vpop.f32.mrf.mxu0  ;;  %v6975_v14 = vpop.f32.mrf.mxu1 }
 0x5cd   : > { %v6900_v54 = vpop.f32.mrf.mxu0  ;;  %v6977_v22 = vpop.f32.mrf.mxu1 }
 0x5cf   : > { %v6904_v31 = vpop.f32.mrf.mxu0  ;;  %v6981_v59 = vpop.f32.mrf.mxu1 }
 0x5d1   : > { %v6906_v36 = vpop.f32.mrf.mxu0  ;;  %v6983_v60 = vpop.f32.mrf.mxu1 }
 0x5d3   : > { %v7058_v57 = vpop.f32.mrf.mxu0  ;;  %v7135_v15 = vpop.f32.mrf.mxu1 }
 0x5d4   : > { %v7059_v56 = vadd.f32 %v7058_v57, %v6898_v58  ;;  %v7136_v38 = vadd.f32 %v7135_v15, %v6975_v14 }
 0x5d5   : > { %v7060_v13 = vpop.f32.mrf.mxu0  ;;  %v7137_v51 = vpop.f32.mrf.mxu1 }
 0x5d6   : > { %v7158_v18 = vadd.f32 %v7151_v37, %v7059_v56  ;;  %v7160_v10 = vadd.f32 %v7151_v37, %v7136_v38  ;;  %v7061_v30 = vadd.f32 %v7060_v13, %v6900_v54  ;;  %v7138_v9 = vadd.f32 %v7137_v51, %v6977_v22 }
 0x5d7   : > { %v7064_v16 = vpop.f32.mrf.mxu0  ;;  %v7141_v2 = vpop.f32.mrf.mxu1 }
 0x5d8   : > { %v7166_v40 = vmax.f32 %v7158_v18, 0.0  ;;  %v7168_v48 = vmax.f32 %v7160_v10, 0.0  ;;  %v7159_v55 = vadd.f32 %v7151_v37, %v7061_v30  ;;  %v7161_v50 = vadd.f32 %v7151_v37, %v7138_v9 }
 0x5d9   : > { %v7065_v7 = vadd.f32 %v7064_v16, %v6904_v31  ;;  %v7142_v6 = vadd.f32 %v7141_v2, %v6981_v59  ;;  %v7066_v35 = vpop.f32.mrf.mxu0  ;;  %v7143_v45 = vpop.f32.mrf.mxu1 }
 0x5da   : > { %7174 = vst [vmem:[%s10823_s28] sm:$0xff] %v7166_v40  ;;  %7176 = vst [vmem:[%s10823_s28 + $0x10] sm:$0xff] %v7168_v48  ;;  %v7167_v11 = vmax.f32 %v7159_v55, 0.0  ;;  %v7169_v61 = vmax.f32 %v7161_v50, 0.0  ;;  %v7067_v24 = vadd.f32 %v7066_v35, %v6906_v36  ;;  %v7144_v1 = vadd.f32 %v7143_v45, %v6983_v60 }
 0x5db   : > { %v7162_v44 = vadd.f32 %v7156_v17, %v7065_v7  ;;  %v7164_v20 = vadd.f32 %v7156_v17, %v7142_v6 }
 0x5dc   : > { %7175 = vst [vmem:[%s10823_s28 + $0x8] sm:$0xff] %v7167_v11  ;;  %7177 = vst [vmem:[%s10823_s28 + $0x18] sm:$0xff] %v7169_v61  ;;  %v7163_v23 = vadd.f32 %v7156_v17, %v7067_v24  ;;  %v7165_v27 = vadd.f32 %v7156_v17, %v7144_v1 }
 0x5dd   : > { %v7170_v3 = vmax.f32 %v7162_v44, 0.0  ;;  %v7172_v39 = vmax.f32 %v7164_v20, 0.0 }
 0x5de   : > { %v7171_v52 = vmax.f32 %v7163_v23, 0.0  ;;  %v7173_v43 = vmax.f32 %v7165_v27, 0.0 }
 0x5df   : > { %7178 = vst [vmem:[%s10823_s28 + $0x20] sm:$0xff] %v7170_v3  ;;  %7180 = vst [vmem:[%s10823_s28 + $0x30] sm:$0xff] %v7172_v39 }
 0x5e0   : > { %7179 = vst [vmem:[%s10823_s28 + $0x28] sm:$0xff] %v7171_v52  ;;  %7181 = vst [vmem:[%s10823_s28 + $0x38] sm:$0xff] %v7173_v43 }
 0x5e1 PF: > { %s25_s18 = sadd.s32 1, %s7460_s18  }
 0x5e2   : > { %p22_p4 = scmp.ge.s32.totalorder %s25_s18, 4  }
 0x5e4   :  { %24 = sbr.rel (!%p22_p4) target bundleno = 1 (0x1), region = 190 }

</bundles_post_ra>
